<compile_context>
chip_gen: v6e
topology: v6e:2x2x1
jax: 0.10.0
libtpu: 0.0.40
codegen_flags: <defaults>
</compile_context>

<pallas_src>
import functools

import numpy as np
import jax
import jax.numpy as jnp
from jax import lax
from jax.experimental import pallas as pl
from jax.experimental.pallas import tpu as pltpu


MXU_DTYPE = jnp.bfloat16


# --------------------------------------------------------------------------- #
# Static schedule (all indices are Python-static, derived from T and stride)
# --------------------------------------------------------------------------- #
def _static_schedule(T, stride):
    # GRU-1 input rows (matches x[:, slc_day[::-1], :] in the torch module).
    slc_day = list(range(T, -1, -stride))[1:]
    idx1 = slc_day[::-1]
    # GRU-2 sequence: rows [start..T-1] of x, then p_last appended.
    start = 1 if T % 2 == 0 else 0
    L = (T - start) + 1
    idx2 = list(range(L - 1, 0, -stride))[::-1]
    idx3 = list(range(L - 2, -1, -stride))[::-1]
    assert len(idx2) == len(idx3)
    steps2 = []
    for ja, jb in zip(idx2, idx3):
        a_from_x = ja != (L - 1)          # only the final step's "a" is p_last
        a_row = (ja + start) if a_from_x else -1
        steps2.append((a_from_x, a_row, jb + start))
    return idx1, steps2


# --------------------------------------------------------------------------- #
# Fused kernel: GRU-1 + static re-slicing + GRU-2, one model per grid step
# --------------------------------------------------------------------------- #
def _gru_cell(gi_rz, gi_n, h_prev, whh_rz, whh_n, b_hn_b, gate, mxu_dtype):
    """One GRU step. gi_* already contain the input projection + folded
    (b_ih+b_hh) rz bias / b_ih n bias; only the n-gate hidden bias stays inside
    gh (needed under the r* multiply, matching torch.nn.GRU)."""
    hb = h_prev.astype(mxu_dtype)
    gh_rz = jnp.dot(hb, whh_rz, preferred_element_type=jnp.float32)
    gh_n = jnp.dot(hb, whh_n, preferred_element_type=jnp.float32) + b_hn_b
    rz = jax.nn.sigmoid(gi_rz + gh_rz)
    r = rz[:, :gate]
    z = rz[:, gate:]
    n = jnp.tanh(gi_n + r * gh_n)
    return (1.0 - z) * n + z * h_prev


def _predictrnn_kernel(
    x_ref,
    w1x_rz_ref, w1x_n_ref, w1h_rz_ref, w1h_n_ref,
    b1_rz_ref, b1_in_ref, b1_hn_ref,
    w2a_rz_ref, w2a_n_ref, w2b_rz_ref, w2b_n_ref,
    w2h_rz_ref, w2h_n_ref,
    b2_rz_ref, b2_in_ref, b2_hn_ref,
    ph_ref, xh_ref,
    *, idx1, steps2, bs, H, F, mxu_dtype):
    # x_ref:  (T, bs, H) bf16 for this model (leading model dim squeezed)
    # ph_ref: (len1-1, bs, H) f32   (GRU-1 hidden sequence minus the last step)
    # xh_ref: (bs, F) f32           (GRU-2 final hidden)
    f32 = jnp.float32

    # Hoist weight loads and bias broadcasts out of the unrolled loops
    # (JAX does not CSE broadcast_in_dim).
    w1x_rz = w1x_rz_ref[...]
    w1x_n = w1x_n_ref[...]
    w1h_rz = w1h_rz_ref[...]
    w1h_n = w1h_n_ref[...]
    b1_rz = jnp.broadcast_to(b1_rz_ref[...], (bs, 2 * H))
    b1_in = jnp.broadcast_to(b1_in_ref[...], (bs, H))
    b1_hn = jnp.broadcast_to(b1_hn_ref[...], (bs, H))

    w2a_rz = w2a_rz_ref[...]
    w2a_n = w2a_n_ref[...]
    w2b_rz = w2b_rz_ref[...]
    w2b_n = w2b_n_ref[...]
    w2h_rz = w2h_rz_ref[...]
    w2h_n = w2h_n_ref[...]
    b2_rz = jnp.broadcast_to(b2_rz_ref[...], (bs, 2 * F))
    b2_in = jnp.broadcast_to(b2_in_ref[...], (bs, F))
    b2_hn = jnp.broadcast_to(b2_hn_ref[...], (bs, F))

    # ---- GRU 1 over the statically gathered rows idx1.
    # Python loop (not fori_loop) because each step uses a *different* static
    # row index; trip counts are tiny so full unroll is fine.
    h = jnp.zeros((bs, H), f32)
    len1 = len(idx1)
    for k, t in enumerate(idx1):
        xt = x_ref[t]                                          # (bs, H) bf16
        gi_rz = jnp.dot(xt, w1x_rz, preferred_element_type=f32) + b1_rz
        gi_n = jnp.dot(xt, w1x_n, preferred_element_type=f32) + b1_in
        h = _gru_cell(gi_rz, gi_n, h, w1h_rz, w1h_n, b1_hn, H, mxu_dtype)
        if k < len1 - 1:
            ph_ref[k] = h                                      # stays in VMEM
    p_last_b = h.astype(mxu_dtype)

    # ---- GRU 2: input is concat(a, b) along features; projected as two
    # half-width matmuls so no 2H-wide concat is ever materialized.  Exactly
    # one step (the last) uses p_last for the "a" half.
    h2 = jnp.zeros((bs, F), f32)
    for (a_from_x, a_row, b_row) in steps2:
        a_bf = x_ref[a_row] if a_from_x else p_last_b
        b_bf = x_ref[b_row]
        gi_rz = (jnp.dot(a_bf, w2a_rz, preferred_element_type=f32)
                 + jnp.dot(b_bf, w2b_rz, preferred_element_type=f32) + b2_rz)
        gi_n = (jnp.dot(a_bf, w2a_n, preferred_element_type=f32)
                + jnp.dot(b_bf, w2b_n, preferred_element_type=f32) + b2_in)
        h2 = _gru_cell(gi_rz, gi_n, h2, w2h_rz, w2h_n, b2_hn, F, mxu_dtype)

    xh_ref[...] = h2


def _model_spec(arr):
    """BlockSpec selecting one model's slab; leading (model) dim squeezed."""
    ndim_rest = arr.ndim - 1
    return pl.BlockSpec((None,) + tuple(arr.shape[1:]),
                        lambda m, _nd=ndim_rest: (m,) + (0,) * _nd)


def _fused_group_forward(x_g, weights, *, T, bs, H, F, stride, mxu_dtype):
    """One pallas_call for a group of models sharing the same stride.
    x_g: (g, T, bs, H) in mxu_dtype.  Returns (ph (g,len1-1,bs,H) f32,
    xh (g,bs,F) f32, idx1)."""
    g = x_g.shape[0]
    idx1, steps2 = _static_schedule(T, stride)
    len1 = len(idx1)
    assert len1 >= 2, "need at least 2 GRU-1 steps"

    kernel = functools.partial(
        _predictrnn_kernel, idx1=tuple(idx1), steps2=tuple(steps2),
        bs=bs, H=H, F=F, mxu_dtype=mxu_dtype)

    in_specs = [_model_spec(x_g)] + [_model_spec(w) for w in weights]
    out_specs = (
        pl.BlockSpec((None, len1 - 1, bs, H), lambda m: (m, 0, 0, 0)),
        pl.BlockSpec((None, bs, F), lambda m: (m, 0, 0)),
    )
    out_shape = (
        jax.ShapeDtypeStruct((g, len1 - 1, bs, H), jnp.float32),
        jax.ShapeDtypeStruct((g, bs, F), jnp.float32),
    )
    ph_g, xh_g = pl.pallas_call(
        kernel,
        grid=(g,),
        in_specs=in_specs,
        out_specs=out_specs,
        out_shape=out_shape,
        compiler_params=pltpu.CompilerParams(
            dimension_semantics=("parallel",)),   # v7x: shard models across TCs
    )(x_g, *weights)
    return ph_g, xh_g, idx1


# --------------------------------------------------------------------------- #
# Parameter packing (done once, outside the hot path)
# --------------------------------------------------------------------------- #
def pack_predictrnn_params(params, stride2_list, hidden_size, hidden_feat,
                           mxu_dtype=MXU_DTYPE):
    """Split PyTorch-layout GRU weights into rz / n blocks (and GRU-2's W_ih
    into x2/x3 row halves), fold b_hh[r|z] into b_ih[r|z], cast matmul
    operands to bf16, and stack models sharing the same stride."""
    H, F = hidden_size, hidden_feat
    groups = {}
    for i, s in enumerate(stride2_list):
        groups.setdefault(int(s), []).append(i)

    bias_slots = {4, 5, 6, 13, 14, 15}
    packed_groups = []
    for stride, ids in sorted(groups.items()):
        per_model = []
        for i in ids:
            w_ih1, w_hh1, b_ih1, b_hh1 = params[f"gru1_{i}"]
            w_ih2, w_hh2, b_ih2, b_hh2 = params[f"gru2_{i}"]
            w1x = w_ih1.T            # (H, 3H)
            w1h = w_hh1.T            # (H, 3H)
            w2x = w_ih2.T            # (2H, 3F)
            w2h = w_hh2.T            # (F, 3F)
            entry = [
                w1x[:, :2 * H], w1x[:, 2 * H:],                 # GRU1 input rz | n
                w1h[:, :2 * H], w1h[:, 2 * H:],                 # GRU1 hidden rz | n
                (b_ih1[:2 * H] + b_hh1[:2 * H]).reshape(1, 2 * H),
                b_ih1[2 * H:].reshape(1, H),
                b_hh1[2 * H:].reshape(1, H),
                w2x[:H, :2 * F], w2x[:H, 2 * F:],               # GRU2 input, x2 half
                w2x[H:, :2 * F], w2x[H:, 2 * F:],               # GRU2 input, x3 half
                w2h[:, :2 * F], w2h[:, 2 * F:],                 # GRU2 hidden rz | n
                (b_ih2[:2 * F] + b_hh2[:2 * F]).reshape(1, 2 * F),
                b_ih2[2 * F:].reshape(1, F),
                b_hh2[2 * F:].reshape(1, F),
            ]
            per_model.append(entry)
        stacked = []
        for j in range(len(per_model[0])):
            arr = jnp.stack([per_model[k][j] for k in range(len(per_model))], axis=0)
            arr = arr.astype(jnp.float32 if j in bias_slots else mxu_dtype)
            stacked.append(arr)
        packed_groups.append((stride, tuple(ids), tuple(stacked)))
    return packed_groups


# --------------------------------------------------------------------------- #
# PREDICTRNN forward (Pallas path)
# --------------------------------------------------------------------------- #
def predictrnn_forward(x, packed_groups, hidden_size, hidden_feat,
                       mxu_dtype=MXU_DTYPE):
    bs, T, n_models, _ = x.shape
    H, F = hidden_size, hidden_feat
    ps_hidden = [None] * n_models
    slc_days = [None] * n_models
    xh_cols = [None] * n_models
    for stride, ids, weights in packed_groups:
        if list(ids) == list(range(n_models)):
            x_sel = x
        else:
            x_sel = jnp.take(x, jnp.asarray(ids), axis=2)
        # (bs, T, g, H) -> (g, T, bs, H), bf16 — the only per-call glue op.
        x_g = jnp.transpose(x_sel, (2, 1, 0, 3)).astype(mxu_dtype)
        ph_g, xh_g, idx1 = _fused_group_forward(
            x_g, weights, T=T, bs=bs, H=H, F=F, stride=stride,
            mxu_dtype=mxu_dtype)
        ps_g = jnp.transpose(ph_g, (0, 2, 1, 3))     # (g, bs, len1-1, H)
        sdays = np.asarray(idx1[:-1]) + 1
        for k, i in enumerate(ids):
            ps_hidden[i] = ps_g[k]
            xh_cols[i] = xh_g[k]
            slc_days[i] = sdays
    x_hidden = jnp.stack(xh_cols, axis=2)            # (bs, F, n_models)
    return x_hidden, ps_hidden, slc_days


# --------------------------------------------------------------------------- #
# Pure-JAX reference (correctness check; matmul operands rounded like the
# kernel so the comparison isolates kernel correctness, not bf16 drift)
# --------------------------------------------------------------------------- #
def gru_ref(x_btd, w_ih, w_hh, b_ih, b_hh, matmul_dtype=jnp.float32):
    B, T, D = x_btd.shape
    H = w_hh.shape[1]
    wih_t = w_ih.T.astype(matmul_dtype)
    whh_t = w_hh.T.astype(matmul_dtype)

    def step(h, x_t):
        gi = jnp.dot(x_t.astype(matmul_dtype), wih_t,
                     preferred_element_type=jnp.float32) + b_ih
        gh = jnp.dot(h.astype(matmul_dtype), whh_t,
                     preferred_element_type=jnp.float32) + b_hh
        r = jax.nn.sigmoid(gi[:, :H] + gh[:, :H])
        z = jax.nn.sigmoid(gi[:, H:2 * H] + gh[:, H:2 * H])
        n = jnp.tanh(gi[:, 2 * H:] + r * gh[:, 2 * H:])
        h_new = (1.0 - z) * n + z * h
        return h_new, h_new

    h0 = jnp.zeros((B, H), jnp.float32)
    _, hs = lax.scan(step, h0, jnp.transpose(x_btd, (1, 0, 2)))
    return jnp.transpose(hs, (1, 0, 2))


def predictrnn_forward_ref(x, params, stride2_list, hidden_size, hidden_feat,
                           matmul_dtype=jnp.float32):
    bs, T, n_models, _ = x.shape
    x_hidden = []
    ps_hidden = []
    slc_days = []
    for i in range(n_models):
        x_temp = x[:, :, i, :]
        stride2 = stride2_list[i]
        slc_day = list(range(x_temp.shape[1], -1, -stride2))[1:]
        idx1 = slc_day[::-1]
        x1 = jnp.take(x_temp, jnp.asarray(idx1), axis=1)
        p_hidden = gru_ref(x1, *params[f"gru1_{i}"], matmul_dtype=matmul_dtype)
        ps_hidden.append(p_hidden[:, :-1, :])
        slc_days.append(np.array(idx1)[:-1] + 1)
        p_last = p_hidden[:, -1, :].reshape(bs, 1, hidden_size)
        if not x_temp.shape[1] % 2:
            x_temp = x_temp[:, 1:, :]
        x_temp = jnp.concatenate([x_temp, p_last], axis=1)
        L = x_temp.shape[1]
        idx2 = list(range(L - 1, 0, -stride2))[::-1]
        x2 = jnp.take(x_temp, jnp.asarray(idx2), axis=1)
        idx3 = list(range(L - 2, -1, -stride2))[::-1]
        x3 = jnp.take(x_temp, jnp.asarray(idx3), axis=1)
        x23 = jnp.concatenate([x2, x3], axis=2)
        h2 = gru_ref(x23, *params[f"gru2_{i}"], matmul_dtype=matmul_dtype)
        x_hidden.append(h2[:, -1, :][:, :, None])
    x_hidden = jnp.concatenate(x_hidden, axis=2)
    return x_hidden, ps_hidden, slc_days


# --------------------------------------------------------------------------- #
# Deterministic parameter init (PyTorch GRU default: U(-1/sqrt(H), 1/sqrt(H)))
# --------------------------------------------------------------------------- #
def init_gru_params(key, input_size, hidden):
    k = 1.0 / np.sqrt(hidden)
    k0, k1, k2, k3 = jax.random.split(key, 4)
    w_ih = jax.random.uniform(k0, (3 * hidden, input_size), jnp.float32, -k, k)
    w_hh = jax.random.uniform(k1, (3 * hidden, hidden), jnp.float32, -k, k)
    b_ih = jax.random.uniform(k2, (3 * hidden,), jnp.float32, -k, k)
    b_hh = jax.random.uniform(k3, (3 * hidden,), jnp.float32, -k, k)
    return (w_ih, w_hh, b_ih, b_hh)


if __name__ == "__main__":
    hidden_size = 32
    hidden_feat = 32
    n_models = 1
    stride2 = [1]
    bs, T = 2, 8

    key = jax.random.PRNGKey(0)
    keys = jax.random.split(key, 1 + 2 * n_models)
    kx, pkeys = keys[0], keys[1:]

    x = jax.random.normal(kx, (bs, T, n_models, hidden_size), jnp.float32)

    params = {}
    for i in range(n_models):
        params[f"gru1_{i}"] = init_gru_params(pkeys[2 * i], hidden_size, hidden_size)
        params[f"gru2_{i}"] = init_gru_params(pkeys[2 * i + 1], hidden_size * 2, hidden_feat)

    # One-time parameter packing (split / fold / cast / stack per stride group).
    packed = pack_predictrnn_params(params, stride2, hidden_size, hidden_feat)

    # Pallas fused forward.
    x_hidden, ps_hidden, slc_days = predictrnn_forward(
        x, packed, hidden_size, hidden_feat)
    jax.block_until_ready(x_hidden)
    for p in ps_hidden:
        jax.block_until_ready(p)

    # Pure-JAX reference with matching bf16 matmul-operand rounding.
    x_hidden_ref, ps_hidden_ref, slc_days_ref = predictrnn_forward_ref(
        x, params, stride2, hidden_size, hidden_feat, matmul_dtype=MXU_DTYPE)

    np.testing.assert_allclose(np.asarray(x_hidden), np.asarray(x_hidden_ref),
                               rtol=2e-2, atol=2e-2)
    for p, pr in zip(ps_hidden, ps_hidden_ref):
        np.testing.assert_allclose(np.asarray(p), np.asarray(pr),
                                   rtol=2e-2, atol=2e-2)
    for s, sr in zip(slc_days, slc_days_ref):
        assert np.array_equal(np.asarray(s), np.asarray(sr))

    assert x_hidden.shape == (bs, hidden_feat, n_models)
    assert ps_hidden[0].shape == (bs, T - 1, hidden_size)
    assert slc_days[0].shape == (T - 1,)

    print("KERNEL_OK")
</pallas_src>

<mosaic_0001>
module attributes {stable_mosaic.version = 11 : i64} {
  func.func @_predictrnn_kernel(%arg0: i32, %arg1: memref<1x8x2x32xbf16, #tpu.memory_space<vmem>>, %arg2: memref<1x32x64xbf16, #tpu.memory_space<vmem>>, %arg3: memref<1x32x32xbf16, #tpu.memory_space<vmem>>, %arg4: memref<1x32x64xbf16, #tpu.memory_space<vmem>>, %arg5: memref<1x32x32xbf16, #tpu.memory_space<vmem>>, %arg6: memref<1x1x64xf32, #tpu.memory_space<vmem>>, %arg7: memref<1x1x32xf32, #tpu.memory_space<vmem>>, %arg8: memref<1x1x32xf32, #tpu.memory_space<vmem>>, %arg9: memref<1x32x64xbf16, #tpu.memory_space<vmem>>, %arg10: memref<1x32x32xbf16, #tpu.memory_space<vmem>>, %arg11: memref<1x32x64xbf16, #tpu.memory_space<vmem>>, %arg12: memref<1x32x32xbf16, #tpu.memory_space<vmem>>, %arg13: memref<1x32x64xbf16, #tpu.memory_space<vmem>>, %arg14: memref<1x32x32xbf16, #tpu.memory_space<vmem>>, %arg15: memref<1x1x64xf32, #tpu.memory_space<vmem>>, %arg16: memref<1x1x32xf32, #tpu.memory_space<vmem>>, %arg17: memref<1x1x32xf32, #tpu.memory_space<vmem>>, %arg18: memref<1x7x2x32xf32, #tpu.memory_space<vmem>>, %arg19: memref<1x2x32xf32, #tpu.memory_space<vmem>>) attributes {dimension_semantics = [#tpu.dimension_semantics<parallel>], iteration_bounds = array<i64: 1>, scalar_prefetch = 0 : i64, scratch_operands = 0 : i64, tpu.core_type = #tpu.core_type<tc>, window_params = [{transform_indices = @transform_0, window_bounds = array<i64: 1, 8, 2, 32>}, {transform_indices = @transform_1, window_bounds = array<i64: 1, 32, 64>}, {transform_indices = @transform_2, window_bounds = array<i64: 1, 32, 32>}, {transform_indices = @transform_3, window_bounds = array<i64: 1, 32, 64>}, {transform_indices = @transform_4, window_bounds = array<i64: 1, 32, 32>}, {transform_indices = @transform_5, window_bounds = array<i64: 1, 1, 64>}, {transform_indices = @transform_6, window_bounds = array<i64: 1, 1, 32>}, {transform_indices = @transform_7, window_bounds = array<i64: 1, 1, 32>}, {transform_indices = @transform_8, window_bounds = array<i64: 1, 32, 64>}, {transform_indices = @transform_9, window_bounds = array<i64: 1, 32, 32>}, {transform_indices = @transform_10, window_bounds = array<i64: 1, 32, 64>}, {transform_indices = @transform_11, window_bounds = array<i64: 1, 32, 32>}, {transform_indices = @transform_12, window_bounds = array<i64: 1, 32, 64>}, {transform_indices = @transform_13, window_bounds = array<i64: 1, 32, 32>}, {transform_indices = @transform_14, window_bounds = array<i64: 1, 1, 64>}, {transform_indices = @transform_15, window_bounds = array<i64: 1, 1, 32>}, {transform_indices = @transform_16, window_bounds = array<i64: 1, 1, 32>}, {transform_indices = @transform_17, window_bounds = array<i64: 1, 7, 2, 32>}, {transform_indices = @transform_18, window_bounds = array<i64: 1, 2, 32>}]} {
    %c0 = arith.constant 0 : index
    %c0_0 = arith.constant 0 : index
    %c0_1 = arith.constant 0 : index
    %0 = vector.load %arg2[%c0, %c0_0, %c0_1] : memref<1x32x64xbf16, #tpu.memory_space<vmem>>, vector<1x32x64xbf16>
    %1 = vector.shape_cast %0 : vector<1x32x64xbf16> to vector<32x64xbf16>
    %c0_2 = arith.constant 0 : index
    %c0_3 = arith.constant 0 : index
    %c0_4 = arith.constant 0 : index
    %2 = vector.load %arg3[%c0_2, %c0_3, %c0_4] : memref<1x32x32xbf16, #tpu.memory_space<vmem>>, vector<1x32x32xbf16>
    %3 = vector.shape_cast %2 : vector<1x32x32xbf16> to vector<32x32xbf16>
    %c0_5 = arith.constant 0 : index
    %c0_6 = arith.constant 0 : index
    %c0_7 = arith.constant 0 : index
    %4 = vector.load %arg4[%c0_5, %c0_6, %c0_7] : memref<1x32x64xbf16, #tpu.memory_space<vmem>>, vector<1x32x64xbf16>
    %5 = vector.shape_cast %4 : vector<1x32x64xbf16> to vector<32x64xbf16>
    %c0_8 = arith.constant 0 : index
    %c0_9 = arith.constant 0 : index
    %c0_10 = arith.constant 0 : index
    %6 = vector.load %arg5[%c0_8, %c0_9, %c0_10] : memref<1x32x32xbf16, #tpu.memory_space<vmem>>, vector<1x32x32xbf16>
    %7 = vector.shape_cast %6 : vector<1x32x32xbf16> to vector<32x32xbf16>
    %c0_11 = arith.constant 0 : index
    %c0_12 = arith.constant 0 : index
    %c0_13 = arith.constant 0 : index
    %8 = vector.load %arg6[%c0_11, %c0_12, %c0_13] : memref<1x1x64xf32, #tpu.memory_space<vmem>>, vector<1x1x64xf32>
    %9 = vector.shape_cast %8 : vector<1x1x64xf32> to vector<1x64xf32>
    %10 = vector.shape_cast %9 : vector<1x64xf32> to vector<1x64xf32>
    %11 = vector.broadcast %10 : vector<1x64xf32> to vector<2x64xf32>
    %c0_14 = arith.constant 0 : index
    %c0_15 = arith.constant 0 : index
    %c0_16 = arith.constant 0 : index
    %12 = vector.load %arg7[%c0_14, %c0_15, %c0_16] : memref<1x1x32xf32, #tpu.memory_space<vmem>>, vector<1x1x32xf32>
    %13 = vector.shape_cast %12 : vector<1x1x32xf32> to vector<1x32xf32>
    %14 = vector.shape_cast %13 : vector<1x32xf32> to vector<1x32xf32>
    %15 = vector.broadcast %14 : vector<1x32xf32> to vector<2x32xf32>
    %c0_17 = arith.constant 0 : index
    %c0_18 = arith.constant 0 : index
    %c0_19 = arith.constant 0 : index
    %16 = vector.load %arg8[%c0_17, %c0_18, %c0_19] : memref<1x1x32xf32, #tpu.memory_space<vmem>>, vector<1x1x32xf32>
    %17 = vector.shape_cast %16 : vector<1x1x32xf32> to vector<1x32xf32>
    %18 = vector.shape_cast %17 : vector<1x32xf32> to vector<1x32xf32>
    %19 = vector.broadcast %18 : vector<1x32xf32> to vector<2x32xf32>
    %c0_20 = arith.constant 0 : index
    %c0_21 = arith.constant 0 : index
    %c0_22 = arith.constant 0 : index
    %20 = vector.load %arg9[%c0_20, %c0_21, %c0_22] : memref<1x32x64xbf16, #tpu.memory_space<vmem>>, vector<1x32x64xbf16>
    %21 = vector.shape_cast %20 : vector<1x32x64xbf16> to vector<32x64xbf16>
    %c0_23 = arith.constant 0 : index
    %c0_24 = arith.constant 0 : index
    %c0_25 = arith.constant 0 : index
    %22 = vector.load %arg10[%c0_23, %c0_24, %c0_25] : memref<1x32x32xbf16, #tpu.memory_space<vmem>>, vector<1x32x32xbf16>
    %23 = vector.shape_cast %22 : vector<1x32x32xbf16> to vector<32x32xbf16>
    %c0_26 = arith.constant 0 : index
    %c0_27 = arith.constant 0 : index
    %c0_28 = arith.constant 0 : index
    %24 = vector.load %arg11[%c0_26, %c0_27, %c0_28] : memref<1x32x64xbf16, #tpu.memory_space<vmem>>, vector<1x32x64xbf16>
    %25 = vector.shape_cast %24 : vector<1x32x64xbf16> to vector<32x64xbf16>
    %c0_29 = arith.constant 0 : index
    %c0_30 = arith.constant 0 : index
    %c0_31 = arith.constant 0 : index
    %26 = vector.load %arg12[%c0_29, %c0_30, %c0_31] : memref<1x32x32xbf16, #tpu.memory_space<vmem>>, vector<1x32x32xbf16>
    %27 = vector.shape_cast %26 : vector<1x32x32xbf16> to vector<32x32xbf16>
    %c0_32 = arith.constant 0 : index
    %c0_33 = arith.constant 0 : index
    %c0_34 = arith.constant 0 : index
    %28 = vector.load %arg13[%c0_32, %c0_33, %c0_34] : memref<1x32x64xbf16, #tpu.memory_space<vmem>>, vector<1x32x64xbf16>
    %29 = vector.shape_cast %28 : vector<1x32x64xbf16> to vector<32x64xbf16>
    %c0_35 = arith.constant 0 : index
    %c0_36 = arith.constant 0 : index
    %c0_37 = arith.constant 0 : index
    %30 = vector.load %arg14[%c0_35, %c0_36, %c0_37] : memref<1x32x32xbf16, #tpu.memory_space<vmem>>, vector<1x32x32xbf16>
    %31 = vector.shape_cast %30 : vector<1x32x32xbf16> to vector<32x32xbf16>
    %c0_38 = arith.constant 0 : index
    %c0_39 = arith.constant 0 : index
    %c0_40 = arith.constant 0 : index
    %32 = vector.load %arg15[%c0_38, %c0_39, %c0_40] : memref<1x1x64xf32, #tpu.memory_space<vmem>>, vector<1x1x64xf32>
    %33 = vector.shape_cast %32 : vector<1x1x64xf32> to vector<1x64xf32>
    %34 = vector.shape_cast %33 : vector<1x64xf32> to vector<1x64xf32>
    %35 = vector.broadcast %34 : vector<1x64xf32> to vector<2x64xf32>
    %c0_41 = arith.constant 0 : index
    %c0_42 = arith.constant 0 : index
    %c0_43 = arith.constant 0 : index
    %36 = vector.load %arg16[%c0_41, %c0_42, %c0_43] : memref<1x1x32xf32, #tpu.memory_space<vmem>>, vector<1x1x32xf32>
    %37 = vector.shape_cast %36 : vector<1x1x32xf32> to vector<1x32xf32>
    %38 = vector.shape_cast %37 : vector<1x32xf32> to vector<1x32xf32>
    %39 = vector.broadcast %38 : vector<1x32xf32> to vector<2x32xf32>
    %c0_44 = arith.constant 0 : index
    %c0_45 = arith.constant 0 : index
    %c0_46 = arith.constant 0 : index
    %40 = vector.load %arg17[%c0_44, %c0_45, %c0_46] : memref<1x1x32xf32, #tpu.memory_space<vmem>>, vector<1x1x32xf32>
    %41 = vector.shape_cast %40 : vector<1x1x32xf32> to vector<1x32xf32>
    %42 = vector.shape_cast %41 : vector<1x32xf32> to vector<1x32xf32>
    %43 = vector.broadcast %42 : vector<1x32xf32> to vector<2x32xf32>
    %cst = arith.constant 0.000000e+00 : f32
    %44 = vector.broadcast %cst : f32 to vector<2x32xf32>
    %c0_47 = arith.constant 0 : index
    %c0_48 = arith.constant 0 : index
    %c0_49 = arith.constant 0 : index
    %c0_50 = arith.constant 0 : index
    %45 = vector.load %arg1[%c0_47, %c0_48, %c0_49, %c0_50] : memref<1x8x2x32xbf16, #tpu.memory_space<vmem>>, vector<1x1x2x32xbf16>
    %46 = vector.shape_cast %45 : vector<1x1x2x32xbf16> to vector<2x32xbf16>
    %cst_51 = arith.constant dense<0.000000e+00> : vector<2x64xf32>
    %47 = tpu.matmul %46, %1, %cst_51 {dimension_numbers = #tpu.dot_dimension_numbers<[1], [0], [0], [1], [0, 0, 1, 1], [], []>} : vector<2x32xbf16>, vector<32x64xbf16>, vector<2x64xf32> -> vector<2x64xf32>
    %48 = arith.addf %47, %11 : vector<2x64xf32>
    %cst_52 = arith.constant dense<0.000000e+00> : vector<2x32xf32>
    %49 = tpu.matmul %46, %3, %cst_52 {dimension_numbers = #tpu.dot_dimension_numbers<[1], [0], [0], [1], [0, 0, 1, 1], [], []>} : vector<2x32xbf16>, vector<32x32xbf16>, vector<2x32xf32> -> vector<2x32xf32>
    %50 = arith.addf %49, %15 : vector<2x32xf32>
    %51 = arith.truncf %44 : vector<2x32xf32> to vector<2x32xbf16>
    %cst_53 = arith.constant dense<0.000000e+00> : vector<2x64xf32>
    %52 = tpu.matmul %51, %5, %cst_53 {dimension_numbers = #tpu.dot_dimension_numbers<[1], [0], [0], [1], [0, 0, 1, 1], [], []>} : vector<2x32xbf16>, vector<32x64xbf16>, vector<2x64xf32> -> vector<2x64xf32>
    %cst_54 = arith.constant dense<0.000000e+00> : vector<2x32xf32>
    %53 = tpu.matmul %51, %7, %cst_54 {dimension_numbers = #tpu.dot_dimension_numbers<[1], [0], [0], [1], [0, 0, 1, 1], [], []>} : vector<2x32xbf16>, vector<32x32xbf16>, vector<2x32xf32> -> vector<2x32xf32>
    %54 = arith.addf %53, %19 : vector<2x32xf32>
    %55 = arith.addf %48, %52 : vector<2x64xf32>
    %56 = arith.negf %55 : vector<2x64xf32>
    %57 = math.exp %56 : vector<2x64xf32>
    %cst_55 = arith.constant 1.000000e+00 : f32
    %58 = vector.broadcast %cst_55 : f32 to vector<2x64xf32>
    %59 = arith.addf %58, %57 : vector<2x64xf32>
    %60 = arith.divf %58, %59 : vector<2x64xf32>
    %61 = vector.extract_strided_slice %60 {offsets = [0, 0], sizes = [2, 32], strides = [1, 1]} : vector<2x64xf32> to vector<2x32xf32>
    %62 = vector.extract_strided_slice %60 {offsets = [0, 32], sizes = [2, 32], strides = [1, 1]} : vector<2x64xf32> to vector<2x32xf32>
    %63 = arith.mulf %61, %54 : vector<2x32xf32>
    %64 = arith.addf %50, %63 : vector<2x32xf32>
    %65 = math.tanh %64 : vector<2x32xf32>
    %cst_56 = arith.constant 1.000000e+00 : f32
    %66 = vector.broadcast %cst_56 : f32 to vector<2x32xf32>
    %67 = arith.subf %66, %62 : vector<2x32xf32>
    %68 = arith.mulf %67, %65 : vector<2x32xf32>
    %69 = arith.mulf %62, %44 : vector<2x32xf32>
    %70 = arith.addf %68, %69 : vector<2x32xf32>
    %c0_57 = arith.constant 0 : index
    %c0_58 = arith.constant 0 : index
    %c0_59 = arith.constant 0 : index
    %c0_60 = arith.constant 0 : index
    %71 = vector.load %arg18[%c0_57, %c0_58, %c0_59, %c0_60] : memref<1x7x2x32xf32, #tpu.memory_space<vmem>>, vector<1x1x2x32xf32>
    %72 = vector.shape_cast %71 : vector<1x1x2x32xf32> to vector<2x32xf32>
    %73 = vector.shape_cast %70 : vector<2x32xf32> to vector<1x1x2x32xf32>
    tpu.vector_store %arg18[%c0_57, %c0_58, %c0_59, %c0_60], %73 {strides = array<i32>} : memref<1x7x2x32xf32, #tpu.memory_space<vmem>>, vector<1x1x2x32xf32>,
    %c0_61 = arith.constant 0 : index
    %c1 = arith.constant 1 : index
    %c0_62 = arith.constant 0 : index
    %c0_63 = arith.constant 0 : index
    %74 = vector.load %arg1[%c0_61, %c1, %c0_62, %c0_63] : memref<1x8x2x32xbf16, #tpu.memory_space<vmem>>, vector<1x1x2x32xbf16>
    %75 = vector.shape_cast %74 : vector<1x1x2x32xbf16> to vector<2x32xbf16>
    %cst_64 = arith.constant dense<0.000000e+00> : vector<2x64xf32>
    %76 = tpu.matmul %75, %1, %cst_64 {dimension_numbers = #tpu.dot_dimension_numbers<[1], [0], [0], [1], [0, 0, 1, 1], [], []>} : vector<2x32xbf16>, vector<32x64xbf16>, vector<2x64xf32> -> vector<2x64xf32>
    %77 = arith.addf %76, %11 : vector<2x64xf32>
    %cst_65 = arith.constant dense<0.000000e+00> : vector<2x32xf32>
    %78 = tpu.matmul %75, %3, %cst_65 {dimension_numbers = #tpu.dot_dimension_numbers<[1], [0], [0], [1], [0, 0, 1, 1], [], []>} : vector<2x32xbf16>, vector<32x32xbf16>, vector<2x32xf32> -> vector<2x32xf32>
    %79 = arith.addf %78, %15 : vector<2x32xf32>
    %80 = arith.truncf %70 : vector<2x32xf32> to vector<2x32xbf16>
    %cst_66 = arith.constant dense<0.000000e+00> : vector<2x64xf32>
    %81 = tpu.matmul %80, %5, %cst_66 {dimension_numbers = #tpu.dot_dimension_numbers<[1], [0], [0], [1], [0, 0, 1, 1], [], []>} : vector<2x32xbf16>, vector<32x64xbf16>, vector<2x64xf32> -> vector<2x64xf32>
    %cst_67 = arith.constant dense<0.000000e+00> : vector<2x32xf32>
    %82 = tpu.matmul %80, %7, %cst_67 {dimension_numbers = #tpu.dot_dimension_numbers<[1], [0], [0], [1], [0, 0, 1, 1], [], []>} : vector<2x32xbf16>, vector<32x32xbf16>, vector<2x32xf32> -> vector<2x32xf32>
    %83 = arith.addf %82, %19 : vector<2x32xf32>
    %84 = arith.addf %77, %81 : vector<2x64xf32>
    %85 = arith.negf %84 : vector<2x64xf32>
    %86 = math.exp %85 : vector<2x64xf32>
    %cst_68 = arith.constant 1.000000e+00 : f32
    %87 = vector.broadcast %cst_68 : f32 to vector<2x64xf32>
    %88 = arith.addf %87, %86 : vector<2x64xf32>
    %89 = arith.divf %87, %88 : vector<2x64xf32>
    %90 = vector.extract_strided_slice %89 {offsets = [0, 0], sizes = [2, 32], strides = [1, 1]} : vector<2x64xf32> to vector<2x32xf32>
    %91 = vector.extract_strided_slice %89 {offsets = [0, 32], sizes = [2, 32], strides = [1, 1]} : vector<2x64xf32> to vector<2x32xf32>
    %92 = arith.mulf %90, %83 : vector<2x32xf32>
    %93 = arith.addf %79, %92 : vector<2x32xf32>
    %94 = math.tanh %93 : vector<2x32xf32>
    %cst_69 = arith.constant 1.000000e+00 : f32
    %95 = vector.broadcast %cst_69 : f32 to vector<2x32xf32>
    %96 = arith.subf %95, %91 : vector<2x32xf32>
    %97 = arith.mulf %96, %94 : vector<2x32xf32>
    %98 = arith.mulf %91, %70 : vector<2x32xf32>
    %99 = arith.addf %97, %98 : vector<2x32xf32>
    %c0_70 = arith.constant 0 : index
    %c1_71 = arith.constant 1 : index
    %c0_72 = arith.constant 0 : index
    %c0_73 = arith.constant 0 : index
    %100 = vector.load %arg18[%c0_70, %c1_71, %c0_72, %c0_73] : memref<1x7x2x32xf32, #tpu.memory_space<vmem>>, vector<1x1x2x32xf32>
    %101 = vector.shape_cast %100 : vector<1x1x2x32xf32> to vector<2x32xf32>
    %102 = vector.shape_cast %99 : vector<2x32xf32> to vector<1x1x2x32xf32>
    tpu.vector_store %arg18[%c0_70, %c1_71, %c0_72, %c0_73], %102 {strides = array<i32>} : memref<1x7x2x32xf32, #tpu.memory_space<vmem>>, vector<1x1x2x32xf32>,
    %c0_74 = arith.constant 0 : index
    %c2 = arith.constant 2 : index
    %c0_75 = arith.constant 0 : index
    %c0_76 = arith.constant 0 : index
    %103 = vector.load %arg1[%c0_74, %c2, %c0_75, %c0_76] : memref<1x8x2x32xbf16, #tpu.memory_space<vmem>>, vector<1x1x2x32xbf16>
    %104 = vector.shape_cast %103 : vector<1x1x2x32xbf16> to vector<2x32xbf16>
    %cst_77 = arith.constant dense<0.000000e+00> : vector<2x64xf32>
    %105 = tpu.matmul %104, %1, %cst_77 {dimension_numbers = #tpu.dot_dimension_numbers<[1], [0], [0], [1], [0, 0, 1, 1], [], []>} : vector<2x32xbf16>, vector<32x64xbf16>, vector<2x64xf32> -> vector<2x64xf32>
    %106 = arith.addf %105, %11 : vector<2x64xf32>
    %cst_78 = arith.constant dense<0.000000e+00> : vector<2x32xf32>
    %107 = tpu.matmul %104, %3, %cst_78 {dimension_numbers = #tpu.dot_dimension_numbers<[1], [0], [0], [1], [0, 0, 1, 1], [], []>} : vector<2x32xbf16>, vector<32x32xbf16>, vector<2x32xf32> -> vector<2x32xf32>
    %108 = arith.addf %107, %15 : vector<2x32xf32>
    %109 = arith.truncf %99 : vector<2x32xf32> to vector<2x32xbf16>
    %cst_79 = arith.constant dense<0.000000e+00> : vector<2x64xf32>
    %110 = tpu.matmul %109, %5, %cst_79 {dimension_numbers = #tpu.dot_dimension_numbers<[1], [0], [0], [1], [0, 0, 1, 1], [], []>} : vector<2x32xbf16>, vector<32x64xbf16>, vector<2x64xf32> -> vector<2x64xf32>
    %cst_80 = arith.constant dense<0.000000e+00> : vector<2x32xf32>
    %111 = tpu.matmul %109, %7, %cst_80 {dimension_numbers = #tpu.dot_dimension_numbers<[1], [0], [0], [1], [0, 0, 1, 1], [], []>} : vector<2x32xbf16>, vector<32x32xbf16>, vector<2x32xf32> -> vector<2x32xf32>
    %112 = arith.addf %111, %19 : vector<2x32xf32>
    %113 = arith.addf %106, %110 : vector<2x64xf32>
    %114 = arith.negf %113 : vector<2x64xf32>
    %115 = math.exp %114 : vector<2x64xf32>
    %cst_81 = arith.constant 1.000000e+00 : f32
    %116 = vector.broadcast %cst_81 : f32 to vector<2x64xf32>
    %117 = arith.addf %116, %115 : vector<2x64xf32>
    %118 = arith.divf %116, %117 : vector<2x64xf32>
    %119 = vector.extract_strided_slice %118 {offsets = [0, 0], sizes = [2, 32], strides = [1, 1]} : vector<2x64xf32> to vector<2x32xf32>
    %120 = vector.extract_strided_slice %118 {offsets = [0, 32], sizes = [2, 32], strides = [1, 1]} : vector<2x64xf32> to vector<2x32xf32>
    %121 = arith.mulf %119, %112 : vector<2x32xf32>
    %122 = arith.addf %108, %121 : vector<2x32xf32>
    %123 = math.tanh %122 : vector<2x32xf32>
    %cst_82 = arith.constant 1.000000e+00 : f32
    %124 = vector.broadcast %cst_82 : f32 to vector<2x32xf32>
    %125 = arith.subf %124, %120 : vector<2x32xf32>
    %126 = arith.mulf %125, %123 : vector<2x32xf32>
    %127 = arith.mulf %120, %99 : vector<2x32xf32>
    %128 = arith.addf %126, %127 : vector<2x32xf32>
    %c0_83 = arith.constant 0 : index
    %c2_84 = arith.constant 2 : index
    %c0_85 = arith.constant 0 : index
    %c0_86 = arith.constant 0 : index
    %129 = vector.load %arg18[%c0_83, %c2_84, %c0_85, %c0_86] : memref<1x7x2x32xf32, #tpu.memory_space<vmem>>, vector<1x1x2x32xf32>
    %130 = vector.shape_cast %129 : vector<1x1x2x32xf32> to vector<2x32xf32>
    %131 = vector.shape_cast %128 : vector<2x32xf32> to vector<1x1x2x32xf32>
    tpu.vector_store %arg18[%c0_83, %c2_84, %c0_85, %c0_86], %131 {strides = array<i32>} : memref<1x7x2x32xf32, #tpu.memory_space<vmem>>, vector<1x1x2x32xf32>,
    %c0_87 = arith.constant 0 : index
    %c3 = arith.constant 3 : index
    %c0_88 = arith.constant 0 : index
    %c0_89 = arith.constant 0 : index
    %132 = vector.load %arg1[%c0_87, %c3, %c0_88, %c0_89] : memref<1x8x2x32xbf16, #tpu.memory_space<vmem>>, vector<1x1x2x32xbf16>
    %133 = vector.shape_cast %132 : vector<1x1x2x32xbf16> to vector<2x32xbf16>
    %cst_90 = arith.constant dense<0.000000e+00> : vector<2x64xf32>
    %134 = tpu.matmul %133, %1, %cst_90 {dimension_numbers = #tpu.dot_dimension_numbers<[1], [0], [0], [1], [0, 0, 1, 1], [], []>} : vector<2x32xbf16>, vector<32x64xbf16>, vector<2x64xf32> -> vector<2x64xf32>
    %135 = arith.addf %134, %11 : vector<2x64xf32>
    %cst_91 = arith.constant dense<0.000000e+00> : vector<2x32xf32>
    %136 = tpu.matmul %133, %3, %cst_91 {dimension_numbers = #tpu.dot_dimension_numbers<[1], [0], [0], [1], [0, 0, 1, 1], [], []>} : vector<2x32xbf16>, vector<32x32xbf16>, vector<2x32xf32> -> vector<2x32xf32>
    %137 = arith.addf %136, %15 : vector<2x32xf32>
    %138 = arith.truncf %128 : vector<2x32xf32> to vector<2x32xbf16>
    %cst_92 = arith.constant dense<0.000000e+00> : vector<2x64xf32>
    %139 = tpu.matmul %138, %5, %cst_92 {dimension_numbers = #tpu.dot_dimension_numbers<[1], [0], [0], [1], [0, 0, 1, 1], [], []>} : vector<2x32xbf16>, vector<32x64xbf16>, vector<2x64xf32> -> vector<2x64xf32>
    %cst_93 = arith.constant dense<0.000000e+00> : vector<2x32xf32>
    %140 = tpu.matmul %138, %7, %cst_93 {dimension_numbers = #tpu.dot_dimension_numbers<[1], [0], [0], [1], [0, 0, 1, 1], [], []>} : vector<2x32xbf16>, vector<32x32xbf16>, vector<2x32xf32> -> vector<2x32xf32>
    %141 = arith.addf %140, %19 : vector<2x32xf32>
    %142 = arith.addf %135, %139 : vector<2x64xf32>
    %143 = arith.negf %142 : vector<2x64xf32>
    %144 = math.exp %143 : vector<2x64xf32>
    %cst_94 = arith.constant 1.000000e+00 : f32
    %145 = vector.broadcast %cst_94 : f32 to vector<2x64xf32>
    %146 = arith.addf %145, %144 : vector<2x64xf32>
    %147 = arith.divf %145, %146 : vector<2x64xf32>
    %148 = vector.extract_strided_slice %147 {offsets = [0, 0], sizes = [2, 32], strides = [1, 1]} : vector<2x64xf32> to vector<2x32xf32>
    %149 = vector.extract_strided_slice %147 {offsets = [0, 32], sizes = [2, 32], strides = [1, 1]} : vector<2x64xf32> to vector<2x32xf32>
    %150 = arith.mulf %148, %141 : vector<2x32xf32>
    %151 = arith.addf %137, %150 : vector<2x32xf32>
    %152 = math.tanh %151 : vector<2x32xf32>
    %cst_95 = arith.constant 1.000000e+00 : f32
    %153 = vector.broadcast %cst_95 : f32 to vector<2x32xf32>
    %154 = arith.subf %153, %149 : vector<2x32xf32>
    %155 = arith.mulf %154, %152 : vector<2x32xf32>
    %156 = arith.mulf %149, %128 : vector<2x32xf32>
    %157 = arith.addf %155, %156 : vector<2x32xf32>
    %c0_96 = arith.constant 0 : index
    %c3_97 = arith.constant 3 : index
    %c0_98 = arith.constant 0 : index
    %c0_99 = arith.constant 0 : index
    %158 = vector.load %arg18[%c0_96, %c3_97, %c0_98, %c0_99] : memref<1x7x2x32xf32, #tpu.memory_space<vmem>>, vector<1x1x2x32xf32>
    %159 = vector.shape_cast %158 : vector<1x1x2x32xf32> to vector<2x32xf32>
    %160 = vector.shape_cast %157 : vector<2x32xf32> to vector<1x1x2x32xf32>
    tpu.vector_store %arg18[%c0_96, %c3_97, %c0_98, %c0_99], %160 {strides = array<i32>} : memref<1x7x2x32xf32, #tpu.memory_space<vmem>>, vector<1x1x2x32xf32>,
    %c0_100 = arith.constant 0 : index
    %c4 = arith.constant 4 : index
    %c0_101 = arith.constant 0 : index
    %c0_102 = arith.constant 0 : index
    %161 = vector.load %arg1[%c0_100, %c4, %c0_101, %c0_102] : memref<1x8x2x32xbf16, #tpu.memory_space<vmem>>, vector<1x1x2x32xbf16>
    %162 = vector.shape_cast %161 : vector<1x1x2x32xbf16> to vector<2x32xbf16>
    %cst_103 = arith.constant dense<0.000000e+00> : vector<2x64xf32>
    %163 = tpu.matmul %162, %1, %cst_103 {dimension_numbers = #tpu.dot_dimension_numbers<[1], [0], [0], [1], [0, 0, 1, 1], [], []>} : vector<2x32xbf16>, vector<32x64xbf16>, vector<2x64xf32> -> vector<2x64xf32>
    %164 = arith.addf %163, %11 : vector<2x64xf32>
    %cst_104 = arith.constant dense<0.000000e+00> : vector<2x32xf32>
    %165 = tpu.matmul %162, %3, %cst_104 {dimension_numbers = #tpu.dot_dimension_numbers<[1], [0], [0], [1], [0, 0, 1, 1], [], []>} : vector<2x32xbf16>, vector<32x32xbf16>, vector<2x32xf32> -> vector<2x32xf32>
    %166 = arith.addf %165, %15 : vector<2x32xf32>
    %167 = arith.truncf %157 : vector<2x32xf32> to vector<2x32xbf16>
    %cst_105 = arith.constant dense<0.000000e+00> : vector<2x64xf32>
    %168 = tpu.matmul %167, %5, %cst_105 {dimension_numbers = #tpu.dot_dimension_numbers<[1], [0], [0], [1], [0, 0, 1, 1], [], []>} : vector<2x32xbf16>, vector<32x64xbf16>, vector<2x64xf32> -> vector<2x64xf32>
    %cst_106 = arith.constant dense<0.000000e+00> : vector<2x32xf32>
    %169 = tpu.matmul %167, %7, %cst_106 {dimension_numbers = #tpu.dot_dimension_numbers<[1], [0], [0], [1], [0, 0, 1, 1], [], []>} : vector<2x32xbf16>, vector<32x32xbf16>, vector<2x32xf32> -> vector<2x32xf32>
    %170 = arith.addf %169, %19 : vector<2x32xf32>
    %171 = arith.addf %164, %168 : vector<2x64xf32>
    %172 = arith.negf %171 : vector<2x64xf32>
    %173 = math.exp %172 : vector<2x64xf32>
    %cst_107 = arith.constant 1.000000e+00 : f32
    %174 = vector.broadcast %cst_107 : f32 to vector<2x64xf32>
    %175 = arith.addf %174, %173 : vector<2x64xf32>
    %176 = arith.divf %174, %175 : vector<2x64xf32>
    %177 = vector.extract_strided_slice %176 {offsets = [0, 0], sizes = [2, 32], strides = [1, 1]} : vector<2x64xf32> to vector<2x32xf32>
    %178 = vector.extract_strided_slice %176 {offsets = [0, 32], sizes = [2, 32], strides = [1, 1]} : vector<2x64xf32> to vector<2x32xf32>
    %179 = arith.mulf %177, %170 : vector<2x32xf32>
    %180 = arith.addf %166, %179 : vector<2x32xf32>
    %181 = math.tanh %180 : vector<2x32xf32>
    %cst_108 = arith.constant 1.000000e+00 : f32
    %182 = vector.broadcast %cst_108 : f32 to vector<2x32xf32>
    %183 = arith.subf %182, %178 : vector<2x32xf32>
    %184 = arith.mulf %183, %181 : vector<2x32xf32>
    %185 = arith.mulf %178, %157 : vector<2x32xf32>
    %186 = arith.addf %184, %185 : vector<2x32xf32>
    %c0_109 = arith.constant 0 : index
    %c4_110 = arith.constant 4 : index
    %c0_111 = arith.constant 0 : index
    %c0_112 = arith.constant 0 : index
    %187 = vector.load %arg18[%c0_109, %c4_110, %c0_111, %c0_112] : memref<1x7x2x32xf32, #tpu.memory_space<vmem>>, vector<1x1x2x32xf32>
    %188 = vector.shape_cast %187 : vector<1x1x2x32xf32> to vector<2x32xf32>
    %189 = vector.shape_cast %186 : vector<2x32xf32> to vector<1x1x2x32xf32>
    tpu.vector_store %arg18[%c0_109, %c4_110, %c0_111, %c0_112], %189 {strides = array<i32>} : memref<1x7x2x32xf32, #tpu.memory_space<vmem>>, vector<1x1x2x32xf32>,
    %c0_113 = arith.constant 0 : index
    %c5 = arith.constant 5 : index
    %c0_114 = arith.constant 0 : index
    %c0_115 = arith.constant 0 : index
    %190 = vector.load %arg1[%c0_113, %c5, %c0_114, %c0_115] : memref<1x8x2x32xbf16, #tpu.memory_space<vmem>>, vector<1x1x2x32xbf16>
    %191 = vector.shape_cast %190 : vector<1x1x2x32xbf16> to vector<2x32xbf16>
    %cst_116 = arith.constant dense<0.000000e+00> : vector<2x64xf32>
    %192 = tpu.matmul %191, %1, %cst_116 {dimension_numbers = #tpu.dot_dimension_numbers<[1], [0], [0], [1], [0, 0, 1, 1], [], []>} : vector<2x32xbf16>, vector<32x64xbf16>, vector<2x64xf32> -> vector<2x64xf32>
    %193 = arith.addf %192, %11 : vector<2x64xf32>
    %cst_117 = arith.constant dense<0.000000e+00> : vector<2x32xf32>
    %194 = tpu.matmul %191, %3, %cst_117 {dimension_numbers = #tpu.dot_dimension_numbers<[1], [0], [0], [1], [0, 0, 1, 1], [], []>} : vector<2x32xbf16>, vector<32x32xbf16>, vector<2x32xf32> -> vector<2x32xf32>
    %195 = arith.addf %194, %15 : vector<2x32xf32>
    %196 = arith.truncf %186 : vector<2x32xf32> to vector<2x32xbf16>
    %cst_118 = arith.constant dense<0.000000e+00> : vector<2x64xf32>
    %197 = tpu.matmul %196, %5, %cst_118 {dimension_numbers = #tpu.dot_dimension_numbers<[1], [0], [0], [1], [0, 0, 1, 1], [], []>} : vector<2x32xbf16>, vector<32x64xbf16>, vector<2x64xf32> -> vector<2x64xf32>
    %cst_119 = arith.constant dense<0.000000e+00> : vector<2x32xf32>
    %198 = tpu.matmul %196, %7, %cst_119 {dimension_numbers = #tpu.dot_dimension_numbers<[1], [0], [0], [1], [0, 0, 1, 1], [], []>} : vector<2x32xbf16>, vector<32x32xbf16>, vector<2x32xf32> -> vector<2x32xf32>
    %199 = arith.addf %198, %19 : vector<2x32xf32>
    %200 = arith.addf %193, %197 : vector<2x64xf32>
    %201 = arith.negf %200 : vector<2x64xf32>
    %202 = math.exp %201 : vector<2x64xf32>
    %cst_120 = arith.constant 1.000000e+00 : f32
    %203 = vector.broadcast %cst_120 : f32 to vector<2x64xf32>
    %204 = arith.addf %203, %202 : vector<2x64xf32>
    %205 = arith.divf %203, %204 : vector<2x64xf32>
    %206 = vector.extract_strided_slice %205 {offsets = [0, 0], sizes = [2, 32], strides = [1, 1]} : vector<2x64xf32> to vector<2x32xf32>
    %207 = vector.extract_strided_slice %205 {offsets = [0, 32], sizes = [2, 32], strides = [1, 1]} : vector<2x64xf32> to vector<2x32xf32>
    %208 = arith.mulf %206, %199 : vector<2x32xf32>
    %209 = arith.addf %195, %208 : vector<2x32xf32>
    %210 = math.tanh %209 : vector<2x32xf32>
    %cst_121 = arith.constant 1.000000e+00 : f32
    %211 = vector.broadcast %cst_121 : f32 to vector<2x32xf32>
    %212 = arith.subf %211, %207 : vector<2x32xf32>
    %213 = arith.mulf %212, %210 : vector<2x32xf32>
    %214 = arith.mulf %207, %186 : vector<2x32xf32>
    %215 = arith.addf %213, %214 : vector<2x32xf32>
    %c0_122 = arith.constant 0 : index
    %c5_123 = arith.constant 5 : index
    %c0_124 = arith.constant 0 : index
    %c0_125 = arith.constant 0 : index
    %216 = vector.load %arg18[%c0_122, %c5_123, %c0_124, %c0_125] : memref<1x7x2x32xf32, #tpu.memory_space<vmem>>, vector<1x1x2x32xf32>
    %217 = vector.shape_cast %216 : vector<1x1x2x32xf32> to vector<2x32xf32>
    %218 = vector.shape_cast %215 : vector<2x32xf32> to vector<1x1x2x32xf32>
    tpu.vector_store %arg18[%c0_122, %c5_123, %c0_124, %c0_125], %218 {strides = array<i32>} : memref<1x7x2x32xf32, #tpu.memory_space<vmem>>, vector<1x1x2x32xf32>,
    %c0_126 = arith.constant 0 : index
    %c6 = arith.constant 6 : index
    %c0_127 = arith.constant 0 : index
    %c0_128 = arith.constant 0 : index
    %219 = vector.load %arg1[%c0_126, %c6, %c0_127, %c0_128] : memref<1x8x2x32xbf16, #tpu.memory_space<vmem>>, vector<1x1x2x32xbf16>
    %220 = vector.shape_cast %219 : vector<1x1x2x32xbf16> to vector<2x32xbf16>
    %cst_129 = arith.constant dense<0.000000e+00> : vector<2x64xf32>
    %221 = tpu.matmul %220, %1, %cst_129 {dimension_numbers = #tpu.dot_dimension_numbers<[1], [0], [0], [1], [0, 0, 1, 1], [], []>} : vector<2x32xbf16>, vector<32x64xbf16>, vector<2x64xf32> -> vector<2x64xf32>
    %222 = arith.addf %221, %11 : vector<2x64xf32>
    %cst_130 = arith.constant dense<0.000000e+00> : vector<2x32xf32>
    %223 = tpu.matmul %220, %3, %cst_130 {dimension_numbers = #tpu.dot_dimension_numbers<[1], [0], [0], [1], [0, 0, 1, 1], [], []>} : vector<2x32xbf16>, vector<32x32xbf16>, vector<2x32xf32> -> vector<2x32xf32>
    %224 = arith.addf %223, %15 : vector<2x32xf32>
    %225 = arith.truncf %215 : vector<2x32xf32> to vector<2x32xbf16>
    %cst_131 = arith.constant dense<0.000000e+00> : vector<2x64xf32>
    %226 = tpu.matmul %225, %5, %cst_131 {dimension_numbers = #tpu.dot_dimension_numbers<[1], [0], [0], [1], [0, 0, 1, 1], [], []>} : vector<2x32xbf16>, vector<32x64xbf16>, vector<2x64xf32> -> vector<2x64xf32>
    %cst_132 = arith.constant dense<0.000000e+00> : vector<2x32xf32>
    %227 = tpu.matmul %225, %7, %cst_132 {dimension_numbers = #tpu.dot_dimension_numbers<[1], [0], [0], [1], [0, 0, 1, 1], [], []>} : vector<2x32xbf16>, vector<32x32xbf16>, vector<2x32xf32> -> vector<2x32xf32>
    %228 = arith.addf %227, %19 : vector<2x32xf32>
    %229 = arith.addf %222, %226 : vector<2x64xf32>
    %230 = arith.negf %229 : vector<2x64xf32>
    %231 = math.exp %230 : vector<2x64xf32>
    %cst_133 = arith.constant 1.000000e+00 : f32
    %232 = vector.broadcast %cst_133 : f32 to vector<2x64xf32>
    %233 = arith.addf %232, %231 : vector<2x64xf32>
    %234 = arith.divf %232, %233 : vector<2x64xf32>
    %235 = vector.extract_strided_slice %234 {offsets = [0, 0], sizes = [2, 32], strides = [1, 1]} : vector<2x64xf32> to vector<2x32xf32>
    %236 = vector.extract_strided_slice %234 {offsets = [0, 32], sizes = [2, 32], strides = [1, 1]} : vector<2x64xf32> to vector<2x32xf32>
    %237 = arith.mulf %235, %228 : vector<2x32xf32>
    %238 = arith.addf %224, %237 : vector<2x32xf32>
    %239 = math.tanh %238 : vector<2x32xf32>
    %cst_134 = arith.constant 1.000000e+00 : f32
    %240 = vector.broadcast %cst_134 : f32 to vector<2x32xf32>
    %241 = arith.subf %240, %236 : vector<2x32xf32>
    %242 = arith.mulf %241, %239 : vector<2x32xf32>
    %243 = arith.mulf %236, %215 : vector<2x32xf32>
    %244 = arith.addf %242, %243 : vector<2x32xf32>
    %c0_135 = arith.constant 0 : index
    %c6_136 = arith.constant 6 : index
    %c0_137 = arith.constant 0 : index
    %c0_138 = arith.constant 0 : index
    %245 = vector.load %arg18[%c0_135, %c6_136, %c0_137, %c0_138] : memref<1x7x2x32xf32, #tpu.memory_space<vmem>>, vector<1x1x2x32xf32>
    %246 = vector.shape_cast %245 : vector<1x1x2x32xf32> to vector<2x32xf32>
    %247 = vector.shape_cast %244 : vector<2x32xf32> to vector<1x1x2x32xf32>
    tpu.vector_store %arg18[%c0_135, %c6_136, %c0_137, %c0_138], %247 {strides = array<i32>} : memref<1x7x2x32xf32, #tpu.memory_space<vmem>>, vector<1x1x2x32xf32>,
    %c0_139 = arith.constant 0 : index
    %c7 = arith.constant 7 : index
    %c0_140 = arith.constant 0 : index
    %c0_141 = arith.constant 0 : index
    %248 = vector.load %arg1[%c0_139, %c7, %c0_140, %c0_141] : memref<1x8x2x32xbf16, #tpu.memory_space<vmem>>, vector<1x1x2x32xbf16>
    %249 = vector.shape_cast %248 : vector<1x1x2x32xbf16> to vector<2x32xbf16>
    %cst_142 = arith.constant dense<0.000000e+00> : vector<2x64xf32>
    %250 = tpu.matmul %249, %1, %cst_142 {dimension_numbers = #tpu.dot_dimension_numbers<[1], [0], [0], [1], [0, 0, 1, 1], [], []>} : vector<2x32xbf16>, vector<32x64xbf16>, vector<2x64xf32> -> vector<2x64xf32>
    %251 = arith.addf %250, %11 : vector<2x64xf32>
    %cst_143 = arith.constant dense<0.000000e+00> : vector<2x32xf32>
    %252 = tpu.matmul %249, %3, %cst_143 {dimension_numbers = #tpu.dot_dimension_numbers<[1], [0], [0], [1], [0, 0, 1, 1], [], []>} : vector<2x32xbf16>, vector<32x32xbf16>, vector<2x32xf32> -> vector<2x32xf32>
    %253 = arith.addf %252, %15 : vector<2x32xf32>
    %254 = arith.truncf %244 : vector<2x32xf32> to vector<2x32xbf16>
    %cst_144 = arith.constant dense<0.000000e+00> : vector<2x64xf32>
    %255 = tpu.matmul %254, %5, %cst_144 {dimension_numbers = #tpu.dot_dimension_numbers<[1], [0], [0], [1], [0, 0, 1, 1], [], []>} : vector<2x32xbf16>, vector<32x64xbf16>, vector<2x64xf32> -> vector<2x64xf32>
    %cst_145 = arith.constant dense<0.000000e+00> : vector<2x32xf32>
    %256 = tpu.matmul %254, %7, %cst_145 {dimension_numbers = #tpu.dot_dimension_numbers<[1], [0], [0], [1], [0, 0, 1, 1], [], []>} : vector<2x32xbf16>, vector<32x32xbf16>, vector<2x32xf32> -> vector<2x32xf32>
    %257 = arith.addf %256, %19 : vector<2x32xf32>
    %258 = arith.addf %251, %255 : vector<2x64xf32>
    %259 = arith.negf %258 : vector<2x64xf32>
    %260 = math.exp %259 : vector<2x64xf32>
    %cst_146 = arith.constant 1.000000e+00 : f32
    %261 = vector.broadcast %cst_146 : f32 to vector<2x64xf32>
    %262 = arith.addf %261, %260 : vector<2x64xf32>
    %263 = arith.divf %261, %262 : vector<2x64xf32>
    %264 = vector.extract_strided_slice %263 {offsets = [0, 0], sizes = [2, 32], strides = [1, 1]} : vector<2x64xf32> to vector<2x32xf32>
    %265 = vector.extract_strided_slice %263 {offsets = [0, 32], sizes = [2, 32], strides = [1, 1]} : vector<2x64xf32> to vector<2x32xf32>
    %266 = arith.mulf %264, %257 : vector<2x32xf32>
    %267 = arith.addf %253, %266 : vector<2x32xf32>
    %268 = math.tanh %267 : vector<2x32xf32>
    %cst_147 = arith.constant 1.000000e+00 : f32
    %269 = vector.broadcast %cst_147 : f32 to vector<2x32xf32>
    %270 = arith.subf %269, %265 : vector<2x32xf32>
    %271 = arith.mulf %270, %268 : vector<2x32xf32>
    %272 = arith.mulf %265, %244 : vector<2x32xf32>
    %273 = arith.addf %271, %272 : vector<2x32xf32>
    %274 = arith.truncf %273 : vector<2x32xf32> to vector<2x32xbf16>
    %cst_148 = arith.constant 0.000000e+00 : f32
    %275 = vector.broadcast %cst_148 : f32 to vector<2x32xf32>
    %c0_149 = arith.constant 0 : index
    %c2_150 = arith.constant 2 : index
    %c0_151 = arith.constant 0 : index
    %c0_152 = arith.constant 0 : index
    %276 = vector.load %arg1[%c0_149, %c2_150, %c0_151, %c0_152] : memref<1x8x2x32xbf16, #tpu.memory_space<vmem>>, vector<1x1x2x32xbf16>
    %277 = vector.shape_cast %276 : vector<1x1x2x32xbf16> to vector<2x32xbf16>
    %c0_153 = arith.constant 0 : index
    %c1_154 = arith.constant 1 : index
    %c0_155 = arith.constant 0 : index
    %c0_156 = arith.constant 0 : index
    %278 = vector.load %arg1[%c0_153, %c1_154, %c0_155, %c0_156] : memref<1x8x2x32xbf16, #tpu.memory_space<vmem>>, vector<1x1x2x32xbf16>
    %279 = vector.shape_cast %278 : vector<1x1x2x32xbf16> to vector<2x32xbf16>
    %cst_157 = arith.constant dense<0.000000e+00> : vector<2x64xf32>
    %280 = tpu.matmul %277, %21, %cst_157 {dimension_numbers = #tpu.dot_dimension_numbers<[1], [0], [0], [1], [0, 0, 1, 1], [], []>} : vector<2x32xbf16>, vector<32x64xbf16>, vector<2x64xf32> -> vector<2x64xf32>
    %cst_158 = arith.constant dense<0.000000e+00> : vector<2x64xf32>
    %281 = tpu.matmul %279, %25, %cst_158 {dimension_numbers = #tpu.dot_dimension_numbers<[1], [0], [0], [1], [0, 0, 1, 1], [], []>} : vector<2x32xbf16>, vector<32x64xbf16>, vector<2x64xf32> -> vector<2x64xf32>
    %282 = arith.addf %280, %281 : vector<2x64xf32>
    %283 = arith.addf %282, %35 : vector<2x64xf32>
    %cst_159 = arith.constant dense<0.000000e+00> : vector<2x32xf32>
    %284 = tpu.matmul %277, %23, %cst_159 {dimension_numbers = #tpu.dot_dimension_numbers<[1], [0], [0], [1], [0, 0, 1, 1], [], []>} : vector<2x32xbf16>, vector<32x32xbf16>, vector<2x32xf32> -> vector<2x32xf32>
    %cst_160 = arith.constant dense<0.000000e+00> : vector<2x32xf32>
    %285 = tpu.matmul %279, %27, %cst_160 {dimension_numbers = #tpu.dot_dimension_numbers<[1], [0], [0], [1], [0, 0, 1, 1], [], []>} : vector<2x32xbf16>, vector<32x32xbf16>, vector<2x32xf32> -> vector<2x32xf32>
    %286 = arith.addf %284, %285 : vector<2x32xf32>
    %287 = arith.addf %286, %39 : vector<2x32xf32>
    %288 = arith.truncf %275 : vector<2x32xf32> to vector<2x32xbf16>
    %cst_161 = arith.constant dense<0.000000e+00> : vector<2x64xf32>
    %289 = tpu.matmul %288, %29, %cst_161 {dimension_numbers = #tpu.dot_dimension_numbers<[1], [0], [0], [1], [0, 0, 1, 1], [], []>} : vector<2x32xbf16>, vector<32x64xbf16>, vector<2x64xf32> -> vector<2x64xf32>
    %cst_162 = arith.constant dense<0.000000e+00> : vector<2x32xf32>
    %290 = tpu.matmul %288, %31, %cst_162 {dimension_numbers = #tpu.dot_dimension_numbers<[1], [0], [0], [1], [0, 0, 1, 1], [], []>} : vector<2x32xbf16>, vector<32x32xbf16>, vector<2x32xf32> -> vector<2x32xf32>
    %291 = arith.addf %290, %43 : vector<2x32xf32>
    %292 = arith.addf %283, %289 : vector<2x64xf32>
    %293 = arith.negf %292 : vector<2x64xf32>
    %294 = math.exp %293 : vector<2x64xf32>
    %cst_163 = arith.constant 1.000000e+00 : f32
    %295 = vector.broadcast %cst_163 : f32 to vector<2x64xf32>
    %296 = arith.addf %295, %294 : vector<2x64xf32>
    %297 = arith.divf %295, %296 : vector<2x64xf32>
    %298 = vector.extract_strided_slice %297 {offsets = [0, 0], sizes = [2, 32], strides = [1, 1]} : vector<2x64xf32> to vector<2x32xf32>
    %299 = vector.extract_strided_slice %297 {offsets = [0, 32], sizes = [2, 32], strides = [1, 1]} : vector<2x64xf32> to vector<2x32xf32>
    %300 = arith.mulf %298, %291 : vector<2x32xf32>
    %301 = arith.addf %287, %300 : vector<2x32xf32>
    %302 = math.tanh %301 : vector<2x32xf32>
    %cst_164 = arith.constant 1.000000e+00 : f32
    %303 = vector.broadcast %cst_164 : f32 to vector<2x32xf32>
    %304 = arith.subf %303, %299 : vector<2x32xf32>
    %305 = arith.mulf %304, %302 : vector<2x32xf32>
    %306 = arith.mulf %299, %275 : vector<2x32xf32>
    %307 = arith.addf %305, %306 : vector<2x32xf32>
    %c0_165 = arith.constant 0 : index
    %c3_166 = arith.constant 3 : index
    %c0_167 = arith.constant 0 : index
    %c0_168 = arith.constant 0 : index
    %308 = vector.load %arg1[%c0_165, %c3_166, %c0_167, %c0_168] : memref<1x8x2x32xbf16, #tpu.memory_space<vmem>>, vector<1x1x2x32xbf16>
    %309 = vector.shape_cast %308 : vector<1x1x2x32xbf16> to vector<2x32xbf16>
    %c0_169 = arith.constant 0 : index
    %c2_170 = arith.constant 2 : index
    %c0_171 = arith.constant 0 : index
    %c0_172 = arith.constant 0 : index
    %310 = vector.load %arg1[%c0_169, %c2_170, %c0_171, %c0_172] : memref<1x8x2x32xbf16, #tpu.memory_space<vmem>>, vector<1x1x2x32xbf16>
    %311 = vector.shape_cast %310 : vector<1x1x2x32xbf16> to vector<2x32xbf16>
    %cst_173 = arith.constant dense<0.000000e+00> : vector<2x64xf32>
    %312 = tpu.matmul %309, %21, %cst_173 {dimension_numbers = #tpu.dot_dimension_numbers<[1], [0], [0], [1], [0, 0, 1, 1], [], []>} : vector<2x32xbf16>, vector<32x64xbf16>, vector<2x64xf32> -> vector<2x64xf32>
    %cst_174 = arith.constant dense<0.000000e+00> : vector<2x64xf32>
    %313 = tpu.matmul %311, %25, %cst_174 {dimension_numbers = #tpu.dot_dimension_numbers<[1], [0], [0], [1], [0, 0, 1, 1], [], []>} : vector<2x32xbf16>, vector<32x64xbf16>, vector<2x64xf32> -> vector<2x64xf32>
    %314 = arith.addf %312, %313 : vector<2x64xf32>
    %315 = arith.addf %314, %35 : vector<2x64xf32>
    %cst_175 = arith.constant dense<0.000000e+00> : vector<2x32xf32>
    %316 = tpu.matmul %309, %23, %cst_175 {dimension_numbers = #tpu.dot_dimension_numbers<[1], [0], [0], [1], [0, 0, 1, 1], [], []>} : vector<2x32xbf16>, vector<32x32xbf16>, vector<2x32xf32> -> vector<2x32xf32>
    %cst_176 = arith.constant dense<0.000000e+00> : vector<2x32xf32>
    %317 = tpu.matmul %311, %27, %cst_176 {dimension_numbers = #tpu.dot_dimension_numbers<[1], [0], [0], [1], [0, 0, 1, 1], [], []>} : vector<2x32xbf16>, vector<32x32xbf16>, vector<2x32xf32> -> vector<2x32xf32>
    %318 = arith.addf %316, %317 : vector<2x32xf32>
    %319 = arith.addf %318, %39 : vector<2x32xf32>
    %320 = arith.truncf %307 : vector<2x32xf32> to vector<2x32xbf16>
    %cst_177 = arith.constant dense<0.000000e+00> : vector<2x64xf32>
    %321 = tpu.matmul %320, %29, %cst_177 {dimension_numbers = #tpu.dot_dimension_numbers<[1], [0], [0], [1], [0, 0, 1, 1], [], []>} : vector<2x32xbf16>, vector<32x64xbf16>, vector<2x64xf32> -> vector<2x64xf32>
    %cst_178 = arith.constant dense<0.000000e+00> : vector<2x32xf32>
    %322 = tpu.matmul %320, %31, %cst_178 {dimension_numbers = #tpu.dot_dimension_numbers<[1], [0], [0], [1], [0, 0, 1, 1], [], []>} : vector<2x32xbf16>, vector<32x32xbf16>, vector<2x32xf32> -> vector<2x32xf32>
    %323 = arith.addf %322, %43 : vector<2x32xf32>
    %324 = arith.addf %315, %321 : vector<2x64xf32>
    %325 = arith.negf %324 : vector<2x64xf32>
    %326 = math.exp %325 : vector<2x64xf32>
    %cst_179 = arith.constant 1.000000e+00 : f32
    %327 = vector.broadcast %cst_179 : f32 to vector<2x64xf32>
    %328 = arith.addf %327, %326 : vector<2x64xf32>
    %329 = arith.divf %327, %328 : vector<2x64xf32>
    %330 = vector.extract_strided_slice %329 {offsets = [0, 0], sizes = [2, 32], strides = [1, 1]} : vector<2x64xf32> to vector<2x32xf32>
    %331 = vector.extract_strided_slice %329 {offsets = [0, 32], sizes = [2, 32], strides = [1, 1]} : vector<2x64xf32> to vector<2x32xf32>
    %332 = arith.mulf %330, %323 : vector<2x32xf32>
    %333 = arith.addf %319, %332 : vector<2x32xf32>
    %334 = math.tanh %333 : vector<2x32xf32>
    %cst_180 = arith.constant 1.000000e+00 : f32
    %335 = vector.broadcast %cst_180 : f32 to vector<2x32xf32>
    %336 = arith.subf %335, %331 : vector<2x32xf32>
    %337 = arith.mulf %336, %334 : vector<2x32xf32>
    %338 = arith.mulf %331, %307 : vector<2x32xf32>
    %339 = arith.addf %337, %338 : vector<2x32xf32>
    %c0_181 = arith.constant 0 : index
    %c4_182 = arith.constant 4 : index
    %c0_183 = arith.constant 0 : index
    %c0_184 = arith.constant 0 : index
    %340 = vector.load %arg1[%c0_181, %c4_182, %c0_183, %c0_184] : memref<1x8x2x32xbf16, #tpu.memory_space<vmem>>, vector<1x1x2x32xbf16>
    %341 = vector.shape_cast %340 : vector<1x1x2x32xbf16> to vector<2x32xbf16>
    %c0_185 = arith.constant 0 : index
    %c3_186 = arith.constant 3 : index
    %c0_187 = arith.constant 0 : index
    %c0_188 = arith.constant 0 : index
    %342 = vector.load %arg1[%c0_185, %c3_186, %c0_187, %c0_188] : memref<1x8x2x32xbf16, #tpu.memory_space<vmem>>, vector<1x1x2x32xbf16>
    %343 = vector.shape_cast %342 : vector<1x1x2x32xbf16> to vector<2x32xbf16>
    %cst_189 = arith.constant dense<0.000000e+00> : vector<2x64xf32>
    %344 = tpu.matmul %341, %21, %cst_189 {dimension_numbers = #tpu.dot_dimension_numbers<[1], [0], [0], [1], [0, 0, 1, 1], [], []>} : vector<2x32xbf16>, vector<32x64xbf16>, vector<2x64xf32> -> vector<2x64xf32>
    %cst_190 = arith.constant dense<0.000000e+00> : vector<2x64xf32>
    %345 = tpu.matmul %343, %25, %cst_190 {dimension_numbers = #tpu.dot_dimension_numbers<[1], [0], [0], [1], [0, 0, 1, 1], [], []>} : vector<2x32xbf16>, vector<32x64xbf16>, vector<2x64xf32> -> vector<2x64xf32>
    %346 = arith.addf %344, %345 : vector<2x64xf32>
    %347 = arith.addf %346, %35 : vector<2x64xf32>
    %cst_191 = arith.constant dense<0.000000e+00> : vector<2x32xf32>
    %348 = tpu.matmul %341, %23, %cst_191 {dimension_numbers = #tpu.dot_dimension_numbers<[1], [0], [0], [1], [0, 0, 1, 1], [], []>} : vector<2x32xbf16>, vector<32x32xbf16>, vector<2x32xf32> -> vector<2x32xf32>
    %cst_192 = arith.constant dense<0.000000e+00> : vector<2x32xf32>
    %349 = tpu.matmul %343, %27, %cst_192 {dimension_numbers = #tpu.dot_dimension_numbers<[1], [0], [0], [1], [0, 0, 1, 1], [], []>} : vector<2x32xbf16>, vector<32x32xbf16>, vector<2x32xf32> -> vector<2x32xf32>
    %350 = arith.addf %348, %349 : vector<2x32xf32>
    %351 = arith.addf %350, %39 : vector<2x32xf32>
    %352 = arith.truncf %339 : vector<2x32xf32> to vector<2x32xbf16>
    %cst_193 = arith.constant dense<0.000000e+00> : vector<2x64xf32>
    %353 = tpu.matmul %352, %29, %cst_193 {dimension_numbers = #tpu.dot_dimension_numbers<[1], [0], [0], [1], [0, 0, 1, 1], [], []>} : vector<2x32xbf16>, vector<32x64xbf16>, vector<2x64xf32> -> vector<2x64xf32>
    %cst_194 = arith.constant dense<0.000000e+00> : vector<2x32xf32>
    %354 = tpu.matmul %352, %31, %cst_194 {dimension_numbers = #tpu.dot_dimension_numbers<[1], [0], [0], [1], [0, 0, 1, 1], [], []>} : vector<2x32xbf16>, vector<32x32xbf16>, vector<2x32xf32> -> vector<2x32xf32>
    %355 = arith.addf %354, %43 : vector<2x32xf32>
    %356 = arith.addf %347, %353 : vector<2x64xf32>
    %357 = arith.negf %356 : vector<2x64xf32>
    %358 = math.exp %357 : vector<2x64xf32>
    %cst_195 = arith.constant 1.000000e+00 : f32
    %359 = vector.broadcast %cst_195 : f32 to vector<2x64xf32>
    %360 = arith.addf %359, %358 : vector<2x64xf32>
    %361 = arith.divf %359, %360 : vector<2x64xf32>
    %362 = vector.extract_strided_slice %361 {offsets = [0, 0], sizes = [2, 32], strides = [1, 1]} : vector<2x64xf32> to vector<2x32xf32>
    %363 = vector.extract_strided_slice %361 {offsets = [0, 32], sizes = [2, 32], strides = [1, 1]} : vector<2x64xf32> to vector<2x32xf32>
    %364 = arith.mulf %362, %355 : vector<2x32xf32>
    %365 = arith.addf %351, %364 : vector<2x32xf32>
    %366 = math.tanh %365 : vector<2x32xf32>
    %cst_196 = arith.constant 1.000000e+00 : f32
    %367 = vector.broadcast %cst_196 : f32 to vector<2x32xf32>
    %368 = arith.subf %367, %363 : vector<2x32xf32>
    %369 = arith.mulf %368, %366 : vector<2x32xf32>
    %370 = arith.mulf %363, %339 : vector<2x32xf32>
    %371 = arith.addf %369, %370 : vector<2x32xf32>
    %c0_197 = arith.constant 0 : index
    %c5_198 = arith.constant 5 : index
    %c0_199 = arith.constant 0 : index
    %c0_200 = arith.constant 0 : index
    %372 = vector.load %arg1[%c0_197, %c5_198, %c0_199, %c0_200] : memref<1x8x2x32xbf16, #tpu.memory_space<vmem>>, vector<1x1x2x32xbf16>
    %373 = vector.shape_cast %372 : vector<1x1x2x32xbf16> to vector<2x32xbf16>
    %c0_201 = arith.constant 0 : index
    %c4_202 = arith.constant 4 : index
    %c0_203 = arith.constant 0 : index
    %c0_204 = arith.constant 0 : index
    %374 = vector.load %arg1[%c0_201, %c4_202, %c0_203, %c0_204] : memref<1x8x2x32xbf16, #tpu.memory_space<vmem>>, vector<1x1x2x32xbf16>
    %375 = vector.shape_cast %374 : vector<1x1x2x32xbf16> to vector<2x32xbf16>
    %cst_205 = arith.constant dense<0.000000e+00> : vector<2x64xf32>
    %376 = tpu.matmul %373, %21, %cst_205 {dimension_numbers = #tpu.dot_dimension_numbers<[1], [0], [0], [1], [0, 0, 1, 1], [], []>} : vector<2x32xbf16>, vector<32x64xbf16>, vector<2x64xf32> -> vector<2x64xf32>
    %cst_206 = arith.constant dense<0.000000e+00> : vector<2x64xf32>
    %377 = tpu.matmul %375, %25, %cst_206 {dimension_numbers = #tpu.dot_dimension_numbers<[1], [0], [0], [1], [0, 0, 1, 1], [], []>} : vector<2x32xbf16>, vector<32x64xbf16>, vector<2x64xf32> -> vector<2x64xf32>
    %378 = arith.addf %376, %377 : vector<2x64xf32>
    %379 = arith.addf %378, %35 : vector<2x64xf32>
    %cst_207 = arith.constant dense<0.000000e+00> : vector<2x32xf32>
    %380 = tpu.matmul %373, %23, %cst_207 {dimension_numbers = #tpu.dot_dimension_numbers<[1], [0], [0], [1], [0, 0, 1, 1], [], []>} : vector<2x32xbf16>, vector<32x32xbf16>, vector<2x32xf32> -> vector<2x32xf32>
    %cst_208 = arith.constant dense<0.000000e+00> : vector<2x32xf32>
    %381 = tpu.matmul %375, %27, %cst_208 {dimension_numbers = #tpu.dot_dimension_numbers<[1], [0], [0], [1], [0, 0, 1, 1], [], []>} : vector<2x32xbf16>, vector<32x32xbf16>, vector<2x32xf32> -> vector<2x32xf32>
    %382 = arith.addf %380, %381 : vector<2x32xf32>
    %383 = arith.addf %382, %39 : vector<2x32xf32>
    %384 = arith.truncf %371 : vector<2x32xf32> to vector<2x32xbf16>
    %cst_209 = arith.constant dense<0.000000e+00> : vector<2x64xf32>
    %385 = tpu.matmul %384, %29, %cst_209 {dimension_numbers = #tpu.dot_dimension_numbers<[1], [0], [0], [1], [0, 0, 1, 1], [], []>} : vector<2x32xbf16>, vector<32x64xbf16>, vector<2x64xf32> -> vector<2x64xf32>
    %cst_210 = arith.constant dense<0.000000e+00> : vector<2x32xf32>
    %386 = tpu.matmul %384, %31, %cst_210 {dimension_numbers = #tpu.dot_dimension_numbers<[1], [0], [0], [1], [0, 0, 1, 1], [], []>} : vector<2x32xbf16>, vector<32x32xbf16>, vector<2x32xf32> -> vector<2x32xf32>
    %387 = arith.addf %386, %43 : vector<2x32xf32>
    %388 = arith.addf %379, %385 : vector<2x64xf32>
    %389 = arith.negf %388 : vector<2x64xf32>
    %390 = math.exp %389 : vector<2x64xf32>
    %cst_211 = arith.constant 1.000000e+00 : f32
    %391 = vector.broadcast %cst_211 : f32 to vector<2x64xf32>
    %392 = arith.addf %391, %390 : vector<2x64xf32>
    %393 = arith.divf %391, %392 : vector<2x64xf32>
    %394 = vector.extract_strided_slice %393 {offsets = [0, 0], sizes = [2, 32], strides = [1, 1]} : vector<2x64xf32> to vector<2x32xf32>
    %395 = vector.extract_strided_slice %393 {offsets = [0, 32], sizes = [2, 32], strides = [1, 1]} : vector<2x64xf32> to vector<2x32xf32>
    %396 = arith.mulf %394, %387 : vector<2x32xf32>
    %397 = arith.addf %383, %396 : vector<2x32xf32>
    %398 = math.tanh %397 : vector<2x32xf32>
    %cst_212 = arith.constant 1.000000e+00 : f32
    %399 = vector.broadcast %cst_212 : f32 to vector<2x32xf32>
    %400 = arith.subf %399, %395 : vector<2x32xf32>
    %401 = arith.mulf %400, %398 : vector<2x32xf32>
    %402 = arith.mulf %395, %371 : vector<2x32xf32>
    %403 = arith.addf %401, %402 : vector<2x32xf32>
    %c0_213 = arith.constant 0 : index
    %c6_214 = arith.constant 6 : index
    %c0_215 = arith.constant 0 : index
    %c0_216 = arith.constant 0 : index
    %404 = vector.load %arg1[%c0_213, %c6_214, %c0_215, %c0_216] : memref<1x8x2x32xbf16, #tpu.memory_space<vmem>>, vector<1x1x2x32xbf16>
    %405 = vector.shape_cast %404 : vector<1x1x2x32xbf16> to vector<2x32xbf16>
    %c0_217 = arith.constant 0 : index
    %c5_218 = arith.constant 5 : index
    %c0_219 = arith.constant 0 : index
    %c0_220 = arith.constant 0 : index
    %406 = vector.load %arg1[%c0_217, %c5_218, %c0_219, %c0_220] : memref<1x8x2x32xbf16, #tpu.memory_space<vmem>>, vector<1x1x2x32xbf16>
    %407 = vector.shape_cast %406 : vector<1x1x2x32xbf16> to vector<2x32xbf16>
    %cst_221 = arith.constant dense<0.000000e+00> : vector<2x64xf32>
    %408 = tpu.matmul %405, %21, %cst_221 {dimension_numbers = #tpu.dot_dimension_numbers<[1], [0], [0], [1], [0, 0, 1, 1], [], []>} : vector<2x32xbf16>, vector<32x64xbf16>, vector<2x64xf32> -> vector<2x64xf32>
    %cst_222 = arith.constant dense<0.000000e+00> : vector<2x64xf32>
    %409 = tpu.matmul %407, %25, %cst_222 {dimension_numbers = #tpu.dot_dimension_numbers<[1], [0], [0], [1], [0, 0, 1, 1], [], []>} : vector<2x32xbf16>, vector<32x64xbf16>, vector<2x64xf32> -> vector<2x64xf32>
    %410 = arith.addf %408, %409 : vector<2x64xf32>
    %411 = arith.addf %410, %35 : vector<2x64xf32>
    %cst_223 = arith.constant dense<0.000000e+00> : vector<2x32xf32>
    %412 = tpu.matmul %405, %23, %cst_223 {dimension_numbers = #tpu.dot_dimension_numbers<[1], [0], [0], [1], [0, 0, 1, 1], [], []>} : vector<2x32xbf16>, vector<32x32xbf16>, vector<2x32xf32> -> vector<2x32xf32>
    %cst_224 = arith.constant dense<0.000000e+00> : vector<2x32xf32>
    %413 = tpu.matmul %407, %27, %cst_224 {dimension_numbers = #tpu.dot_dimension_numbers<[1], [0], [0], [1], [0, 0, 1, 1], [], []>} : vector<2x32xbf16>, vector<32x32xbf16>, vector<2x32xf32> -> vector<2x32xf32>
    %414 = arith.addf %412, %413 : vector<2x32xf32>
    %415 = arith.addf %414, %39 : vector<2x32xf32>
    %416 = arith.truncf %403 : vector<2x32xf32> to vector<2x32xbf16>
    %cst_225 = arith.constant dense<0.000000e+00> : vector<2x64xf32>
    %417 = tpu.matmul %416, %29, %cst_225 {dimension_numbers = #tpu.dot_dimension_numbers<[1], [0], [0], [1], [0, 0, 1, 1], [], []>} : vector<2x32xbf16>, vector<32x64xbf16>, vector<2x64xf32> -> vector<2x64xf32>
    %cst_226 = arith.constant dense<0.000000e+00> : vector<2x32xf32>
    %418 = tpu.matmul %416, %31, %cst_226 {dimension_numbers = #tpu.dot_dimension_numbers<[1], [0], [0], [1], [0, 0, 1, 1], [], []>} : vector<2x32xbf16>, vector<32x32xbf16>, vector<2x32xf32> -> vector<2x32xf32>
    %419 = arith.addf %418, %43 : vector<2x32xf32>
    %420 = arith.addf %411, %417 : vector<2x64xf32>
    %421 = arith.negf %420 : vector<2x64xf32>
    %422 = math.exp %421 : vector<2x64xf32>
    %cst_227 = arith.constant 1.000000e+00 : f32
    %423 = vector.broadcast %cst_227 : f32 to vector<2x64xf32>
    %424 = arith.addf %423, %422 : vector<2x64xf32>
    %425 = arith.divf %423, %424 : vector<2x64xf32>
    %426 = vector.extract_strided_slice %425 {offsets = [0, 0], sizes = [2, 32], strides = [1, 1]} : vector<2x64xf32> to vector<2x32xf32>
    %427 = vector.extract_strided_slice %425 {offsets = [0, 32], sizes = [2, 32], strides = [1, 1]} : vector<2x64xf32> to vector<2x32xf32>
    %428 = arith.mulf %426, %419 : vector<2x32xf32>
    %429 = arith.addf %415, %428 : vector<2x32xf32>
    %430 = math.tanh %429 : vector<2x32xf32>
    %cst_228 = arith.constant 1.000000e+00 : f32
    %431 = vector.broadcast %cst_228 : f32 to vector<2x32xf32>
    %432 = arith.subf %431, %427 : vector<2x32xf32>
    %433 = arith.mulf %432, %430 : vector<2x32xf32>
    %434 = arith.mulf %427, %403 : vector<2x32xf32>
    %435 = arith.addf %433, %434 : vector<2x32xf32>
    %c0_229 = arith.constant 0 : index
    %c7_230 = arith.constant 7 : index
    %c0_231 = arith.constant 0 : index
    %c0_232 = arith.constant 0 : index
    %436 = vector.load %arg1[%c0_229, %c7_230, %c0_231, %c0_232] : memref<1x8x2x32xbf16, #tpu.memory_space<vmem>>, vector<1x1x2x32xbf16>
    %437 = vector.shape_cast %436 : vector<1x1x2x32xbf16> to vector<2x32xbf16>
    %c0_233 = arith.constant 0 : index
    %c6_234 = arith.constant 6 : index
    %c0_235 = arith.constant 0 : index
    %c0_236 = arith.constant 0 : index
    %438 = vector.load %arg1[%c0_233, %c6_234, %c0_235, %c0_236] : memref<1x8x2x32xbf16, #tpu.memory_space<vmem>>, vector<1x1x2x32xbf16>
    %439 = vector.shape_cast %438 : vector<1x1x2x32xbf16> to vector<2x32xbf16>
    %cst_237 = arith.constant dense<0.000000e+00> : vector<2x64xf32>
    %440 = tpu.matmul %437, %21, %cst_237 {dimension_numbers = #tpu.dot_dimension_numbers<[1], [0], [0], [1], [0, 0, 1, 1], [], []>} : vector<2x32xbf16>, vector<32x64xbf16>, vector<2x64xf32> -> vector<2x64xf32>
    %cst_238 = arith.constant dense<0.000000e+00> : vector<2x64xf32>
    %441 = tpu.matmul %439, %25, %cst_238 {dimension_numbers = #tpu.dot_dimension_numbers<[1], [0], [0], [1], [0, 0, 1, 1], [], []>} : vector<2x32xbf16>, vector<32x64xbf16>, vector<2x64xf32> -> vector<2x64xf32>
    %442 = arith.addf %440, %441 : vector<2x64xf32>
    %443 = arith.addf %442, %35 : vector<2x64xf32>
    %cst_239 = arith.constant dense<0.000000e+00> : vector<2x32xf32>
    %444 = tpu.matmul %437, %23, %cst_239 {dimension_numbers = #tpu.dot_dimension_numbers<[1], [0], [0], [1], [0, 0, 1, 1], [], []>} : vector<2x32xbf16>, vector<32x32xbf16>, vector<2x32xf32> -> vector<2x32xf32>
    %cst_240 = arith.constant dense<0.000000e+00> : vector<2x32xf32>
    %445 = tpu.matmul %439, %27, %cst_240 {dimension_numbers = #tpu.dot_dimension_numbers<[1], [0], [0], [1], [0, 0, 1, 1], [], []>} : vector<2x32xbf16>, vector<32x32xbf16>, vector<2x32xf32> -> vector<2x32xf32>
    %446 = arith.addf %444, %445 : vector<2x32xf32>
    %447 = arith.addf %446, %39 : vector<2x32xf32>
    %448 = arith.truncf %435 : vector<2x32xf32> to vector<2x32xbf16>
    %cst_241 = arith.constant dense<0.000000e+00> : vector<2x64xf32>
    %449 = tpu.matmul %448, %29, %cst_241 {dimension_numbers = #tpu.dot_dimension_numbers<[1], [0], [0], [1], [0, 0, 1, 1], [], []>} : vector<2x32xbf16>, vector<32x64xbf16>, vector<2x64xf32> -> vector<2x64xf32>
    %cst_242 = arith.constant dense<0.000000e+00> : vector<2x32xf32>
    %450 = tpu.matmul %448, %31, %cst_242 {dimension_numbers = #tpu.dot_dimension_numbers<[1], [0], [0], [1], [0, 0, 1, 1], [], []>} : vector<2x32xbf16>, vector<32x32xbf16>, vector<2x32xf32> -> vector<2x32xf32>
    %451 = arith.addf %450, %43 : vector<2x32xf32>
    %452 = arith.addf %443, %449 : vector<2x64xf32>
    %453 = arith.negf %452 : vector<2x64xf32>
    %454 = math.exp %453 : vector<2x64xf32>
    %cst_243 = arith.constant 1.000000e+00 : f32
    %455 = vector.broadcast %cst_243 : f32 to vector<2x64xf32>
    %456 = arith.addf %455, %454 : vector<2x64xf32>
    %457 = arith.divf %455, %456 : vector<2x64xf32>
    %458 = vector.extract_strided_slice %457 {offsets = [0, 0], sizes = [2, 32], strides = [1, 1]} : vector<2x64xf32> to vector<2x32xf32>
    %459 = vector.extract_strided_slice %457 {offsets = [0, 32], sizes = [2, 32], strides = [1, 1]} : vector<2x64xf32> to vector<2x32xf32>
    %460 = arith.mulf %458, %451 : vector<2x32xf32>
    %461 = arith.addf %447, %460 : vector<2x32xf32>
    %462 = math.tanh %461 : vector<2x32xf32>
    %cst_244 = arith.constant 1.000000e+00 : f32
    %463 = vector.broadcast %cst_244 : f32 to vector<2x32xf32>
    %464 = arith.subf %463, %459 : vector<2x32xf32>
    %465 = arith.mulf %464, %462 : vector<2x32xf32>
    %466 = arith.mulf %459, %435 : vector<2x32xf32>
    %467 = arith.addf %465, %466 : vector<2x32xf32>
    %c0_245 = arith.constant 0 : index
    %c7_246 = arith.constant 7 : index
    %c0_247 = arith.constant 0 : index
    %c0_248 = arith.constant 0 : index
    %468 = vector.load %arg1[%c0_245, %c7_246, %c0_247, %c0_248] : memref<1x8x2x32xbf16, #tpu.memory_space<vmem>>, vector<1x1x2x32xbf16>
    %469 = vector.shape_cast %468 : vector<1x1x2x32xbf16> to vector<2x32xbf16>
    %cst_249 = arith.constant dense<0.000000e+00> : vector<2x64xf32>
    %470 = tpu.matmul %274, %21, %cst_249 {dimension_numbers = #tpu.dot_dimension_numbers<[1], [0], [0], [1], [0, 0, 1, 1], [], []>} : vector<2x32xbf16>, vector<32x64xbf16>, vector<2x64xf32> -> vector<2x64xf32>
    %cst_250 = arith.constant dense<0.000000e+00> : vector<2x64xf32>
    %471 = tpu.matmul %469, %25, %cst_250 {dimension_numbers = #tpu.dot_dimension_numbers<[1], [0], [0], [1], [0, 0, 1, 1], [], []>} : vector<2x32xbf16>, vector<32x64xbf16>, vector<2x64xf32> -> vector<2x64xf32>
    %472 = arith.addf %470, %471 : vector<2x64xf32>
    %473 = arith.addf %472, %35 : vector<2x64xf32>
    %cst_251 = arith.constant dense<0.000000e+00> : vector<2x32xf32>
    %474 = tpu.matmul %274, %23, %cst_251 {dimension_numbers = #tpu.dot_dimension_numbers<[1], [0], [0], [1], [0, 0, 1, 1], [], []>} : vector<2x32xbf16>, vector<32x32xbf16>, vector<2x32xf32> -> vector<2x32xf32>
    %cst_252 = arith.constant dense<0.000000e+00> : vector<2x32xf32>
    %475 = tpu.matmul %469, %27, %cst_252 {dimension_numbers = #tpu.dot_dimension_numbers<[1], [0], [0], [1], [0, 0, 1, 1], [], []>} : vector<2x32xbf16>, vector<32x32xbf16>, vector<2x32xf32> -> vector<2x32xf32>
    %476 = arith.addf %474, %475 : vector<2x32xf32>
    %477 = arith.addf %476, %39 : vector<2x32xf32>
    %478 = arith.truncf %467 : vector<2x32xf32> to vector<2x32xbf16>
    %cst_253 = arith.constant dense<0.000000e+00> : vector<2x64xf32>
    %479 = tpu.matmul %478, %29, %cst_253 {dimension_numbers = #tpu.dot_dimension_numbers<[1], [0], [0], [1], [0, 0, 1, 1], [], []>} : vector<2x32xbf16>, vector<32x64xbf16>, vector<2x64xf32> -> vector<2x64xf32>
    %cst_254 = arith.constant dense<0.000000e+00> : vector<2x32xf32>
    %480 = tpu.matmul %478, %31, %cst_254 {dimension_numbers = #tpu.dot_dimension_numbers<[1], [0], [0], [1], [0, 0, 1, 1], [], []>} : vector<2x32xbf16>, vector<32x32xbf16>, vector<2x32xf32> -> vector<2x32xf32>
    %481 = arith.addf %480, %43 : vector<2x32xf32>
    %482 = arith.addf %473, %479 : vector<2x64xf32>
    %483 = arith.negf %482 : vector<2x64xf32>
    %484 = math.exp %483 : vector<2x64xf32>
    %cst_255 = arith.constant 1.000000e+00 : f32
    %485 = vector.broadcast %cst_255 : f32 to vector<2x64xf32>
    %486 = arith.addf %485, %484 : vector<2x64xf32>
    %487 = arith.divf %485, %486 : vector<2x64xf32>
    %488 = vector.extract_strided_slice %487 {offsets = [0, 0], sizes = [2, 32], strides = [1, 1]} : vector<2x64xf32> to vector<2x32xf32>
    %489 = vector.extract_strided_slice %487 {offsets = [0, 32], sizes = [2, 32], strides = [1, 1]} : vector<2x64xf32> to vector<2x32xf32>
    %490 = arith.mulf %488, %481 : vector<2x32xf32>
    %491 = arith.addf %477, %490 : vector<2x32xf32>
    %492 = math.tanh %491 : vector<2x32xf32>
    %cst_256 = arith.constant 1.000000e+00 : f32
    %493 = vector.broadcast %cst_256 : f32 to vector<2x32xf32>
    %494 = arith.subf %493, %489 : vector<2x32xf32>
    %495 = arith.mulf %494, %492 : vector<2x32xf32>
    %496 = arith.mulf %489, %467 : vector<2x32xf32>
    %497 = arith.addf %495, %496 : vector<2x32xf32>
    %c0_257 = arith.constant 0 : index
    %c0_258 = arith.constant 0 : index
    %c0_259 = arith.constant 0 : index
    %498 = vector.load %arg19[%c0_257, %c0_258, %c0_259] : memref<1x2x32xf32, #tpu.memory_space<vmem>>, vector<1x2x32xf32>
    %499 = vector.shape_cast %498 : vector<1x2x32xf32> to vector<2x32xf32>
    %500 = vector.shape_cast %497 : vector<2x32xf32> to vector<1x2x32xf32>
    tpu.vector_store %arg19[%c0_257, %c0_258, %c0_259], %500 {strides = array<i32>} : memref<1x2x32xf32, #tpu.memory_space<vmem>>, vector<1x2x32xf32>,
    return
  }
  func.func @transform_0(%arg0: i32) -> (i32, i32, i32, i32) {
    %c0_i32 = arith.constant 0 : i32
    %c0_i32_0 = arith.constant 0 : i32
    %c0_i32_1 = arith.constant 0 : i32
    %c0_i32_2 = arith.constant 0 : i32
    return %arg0, %c0_i32, %c0_i32_0, %c0_i32_1 : i32, i32, i32, i32
  }
  func.func @transform_1(%arg0: i32) -> (i32, i32, i32) {
    %c0_i32 = arith.constant 0 : i32
    %c0_i32_0 = arith.constant 0 : i32
    %c0_i32_1 = arith.constant 0 : i32
    return %arg0, %c0_i32, %c0_i32_0 : i32, i32, i32
  }
  func.func @transform_2(%arg0: i32) -> (i32, i32, i32) {
    %c0_i32 = arith.constant 0 : i32
    %c0_i32_0 = arith.constant 0 : i32
    %c0_i32_1 = arith.constant 0 : i32
    return %arg0, %c0_i32, %c0_i32_0 : i32, i32, i32
  }
  func.func @transform_3(%arg0: i32) -> (i32, i32, i32) {
    %c0_i32 = arith.constant 0 : i32
    %c0_i32_0 = arith.constant 0 : i32
    %c0_i32_1 = arith.constant 0 : i32
    return %arg0, %c0_i32, %c0_i32_0 : i32, i32, i32
  }
  func.func @transform_4(%arg0: i32) -> (i32, i32, i32) {
    %c0_i32 = arith.constant 0 : i32
    %c0_i32_0 = arith.constant 0 : i32
    %c0_i32_1 = arith.constant 0 : i32
    return %arg0, %c0_i32, %c0_i32_0 : i32, i32, i32
  }
  func.func @transform_5(%arg0: i32) -> (i32, i32, i32) {
    %c0_i32 = arith.constant 0 : i32
    %c0_i32_0 = arith.constant 0 : i32
    %c0_i32_1 = arith.constant 0 : i32
    return %arg0, %c0_i32, %c0_i32_0 : i32, i32, i32
  }
  func.func @transform_6(%arg0: i32) -> (i32, i32, i32) {
    %c0_i32 = arith.constant 0 : i32
    %c0_i32_0 = arith.constant 0 : i32
    %c0_i32_1 = arith.constant 0 : i32
    return %arg0, %c0_i32, %c0_i32_0 : i32, i32, i32
  }
  func.func @transform_7(%arg0: i32) -> (i32, i32, i32) {
    %c0_i32 = arith.constant 0 : i32
    %c0_i32_0 = arith.constant 0 : i32
    %c0_i32_1 = arith.constant 0 : i32
    return %arg0, %c0_i32, %c0_i32_0 : i32, i32, i32
  }
  func.func @transform_8(%arg0: i32) -> (i32, i32, i32) {
    %c0_i32 = arith.constant 0 : i32
    %c0_i32_0 = arith.constant 0 : i32
    %c0_i32_1 = arith.constant 0 : i32
    return %arg0, %c0_i32, %c0_i32_0 : i32, i32, i32
  }
  func.func @transform_9(%arg0: i32) -> (i32, i32, i32) {
    %c0_i32 = arith.constant 0 : i32
    %c0_i32_0 = arith.constant 0 : i32
    %c0_i32_1 = arith.constant 0 : i32
    return %arg0, %c0_i32, %c0_i32_0 : i32, i32, i32
  }
  func.func @transform_10(%arg0: i32) -> (i32, i32, i32) {
    %c0_i32 = arith.constant 0 : i32
    %c0_i32_0 = arith.constant 0 : i32
    %c0_i32_1 = arith.constant 0 : i32
    return %arg0, %c0_i32, %c0_i32_0 : i32, i32, i32
  }
  func.func @transform_11(%arg0: i32) -> (i32, i32, i32) {
    %c0_i32 = arith.constant 0 : i32
    %c0_i32_0 = arith.constant 0 : i32
    %c0_i32_1 = arith.constant 0 : i32
    return %arg0, %c0_i32, %c0_i32_0 : i32, i32, i32
  }
  func.func @transform_12(%arg0: i32) -> (i32, i32, i32) {
    %c0_i32 = arith.constant 0 : i32
    %c0_i32_0 = arith.constant 0 : i32
    %c0_i32_1 = arith.constant 0 : i32
    return %arg0, %c0_i32, %c0_i32_0 : i32, i32, i32
  }
  func.func @transform_13(%arg0: i32) -> (i32, i32, i32) {
    %c0_i32 = arith.constant 0 : i32
    %c0_i32_0 = arith.constant 0 : i32
    %c0_i32_1 = arith.constant 0 : i32
    return %arg0, %c0_i32, %c0_i32_0 : i32, i32, i32
  }
  func.func @transform_14(%arg0: i32) -> (i32, i32, i32) {
    %c0_i32 = arith.constant 0 : i32
    %c0_i32_0 = arith.constant 0 : i32
    %c0_i32_1 = arith.constant 0 : i32
    return %arg0, %c0_i32, %c0_i32_0 : i32, i32, i32
  }
  func.func @transform_15(%arg0: i32) -> (i32, i32, i32) {
    %c0_i32 = arith.constant 0 : i32
    %c0_i32_0 = arith.constant 0 : i32
    %c0_i32_1 = arith.constant 0 : i32
    return %arg0, %c0_i32, %c0_i32_0 : i32, i32, i32
  }
  func.func @transform_16(%arg0: i32) -> (i32, i32, i32) {
    %c0_i32 = arith.constant 0 : i32
    %c0_i32_0 = arith.constant 0 : i32
    %c0_i32_1 = arith.constant 0 : i32
    return %arg0, %c0_i32, %c0_i32_0 : i32, i32, i32
  }
  func.func @transform_17(%arg0: i32) -> (i32, i32, i32, i32) {
    %c0_i32 = arith.constant 0 : i32
    %c0_i32_0 = arith.constant 0 : i32
    %c0_i32_1 = arith.constant 0 : i32
    %c0_i32_2 = arith.constant 0 : i32
    return %arg0, %c0_i32, %c0_i32_0, %c0_i32_1 : i32, i32, i32, i32
  }
  func.func @transform_18(%arg0: i32) -> (i32, i32, i32) {
    %c0_i32 = arith.constant 0 : i32
    %c0_i32_0 = arith.constant 0 : i32
    %c0_i32_1 = arith.constant 0 : i32
    return %arg0, %c0_i32, %c0_i32_0 : i32, i32, i32
  }
}

</mosaic_0001>

<bundles_post_ra>
// kernel: tpu_custom_call.1
= control target key start
LH: loop header
LB: loop body
LE: loop exit
PB: predicated region body
PF: predicated region fallthrough
CT: control target
= control target key end

     0   :  { %s6291_s0 = inlined_call_operand.hbm [shape: bf16[1,8,2,32], index: 0, kind: input, shape index: {}]   ;;  %s6292_s1 = inlined_call_operand.hbm [shape: bf16[1,32,64], index: 1, kind: input, shape index: {}]   ;;  %s6293_s2 = inlined_call_operand.hbm [shape: bf16[1,32,32], index: 2, kind: input, shape index: {}]   ;;  %s6294_s3 = inlined_call_operand.hbm [shape: bf16[1,32,64], index: 3, kind: input, shape index: {}]   ;;  %s6295_s4 = inlined_call_operand.hbm [shape: bf16[1,32,32], index: 4, kind: input, shape index: {}]   ;;  %s6296_s5 = inlined_call_operand.hbm [shape: f32[1,1,64], index: 5, kind: input, shape index: {}]   ;;  %s6297_s6 = inlined_call_operand.hbm [shape: f32[1,1,32], index: 6, kind: input, shape index: {}]   ;;  %s6298_s7 = inlined_call_operand.hbm [shape: f32[1,1,32], index: 7, kind: input, shape index: {}]   ;;  %s6299_s8 = inlined_call_operand.hbm [shape: bf16[1,32,64], index: 8, kind: input, shape index: {}]   ;;  %s6300_s9 = inlined_call_operand.vmem [shape: bf16[1,32,32], index: 9, kind: input, shape index: {}]   ;;  %s6301_s10 = inlined_call_operand.hbm [shape: bf16[1,32,64], index: 10, kind: input, shape index: {}]   ;;  %s6302_s11 = inlined_call_operand.hbm [shape: bf16[1,32,32], index: 11, kind: input, shape index: {}]   ;;  %s6303_s12 = inlined_call_operand.hbm [shape: bf16[1,32,64], index: 12, kind: input, shape index: {}]   ;;  %s6304_s13 = inlined_call_operand.hbm [shape: bf16[1,32,32], index: 13, kind: input, shape index: {}]   ;;  %s6305_s14 = inlined_call_operand.vmem [shape: f32[1,1,64], index: 14, kind: input, shape index: {}]   ;;  %s6306_s15 = inlined_call_operand.vmem [shape: f32[1,1,32], index: 15, kind: input, shape index: {}]   ;;  %s6307_s16 = inlined_call_operand.vmem [shape: f32[1,1,32], index: 16, kind: input, shape index: {}]   ;;  %s6308_s17 = inlined_call_operand.hbm [shape: f32[1,7,2,32], index: 17, kind: output, shape index: {0}]   ;;  %s6309_s18 = inlined_call_operand.hbm [shape: f32[1,2,32], index: 18, kind: output, shape index: {1}]  }
   0x1   :  { %6310 = sst [smem:[#allocation35_spill]] %s6291_s0 }
   0x2   :  { %6311 = sst [smem:[#allocation36_spill]] %s6292_s1 }
   0x3   :  { %6312 = sst [smem:[#allocation37_spill]] %s6293_s2 }
   0x4   :  { %24 = vsyncpa [#allocation3], 0 }
   0x5   :  { %25 = vsyncpa [#allocation6], 0 }
   0x6   :  { %26 = vsyncpa [#allocation9], 0 }
   0x7   :  { %27 = vsyncpa [#allocation12], 0 }
   0x8   :  { %28 = vsyncpa [#allocation15], 0 }
   0x9   :  { %29 = vsyncpa [#allocation18], 0 }
   0xa   :  { %30 = vsyncpa [#allocation21], 0 }
   0xb   :  { %31 = vsyncpa [#allocation4], 0 }
   0xc   :  { %32 = vsyncpa [#allocation25], 0  ;;  %s5323_s27 = smov [#allocation5]  }
   0xd   :  { %s50_s28 = sshll.u32 %s5323_s27, 4  ;;  %s51_s28 = int_to_ptr.vmem [resolvable:$true] %s50_s28 }
   0xe   :  { %s5013_s29 = scalar_lea.vmem %s51_s28, 256  ;;  %p5018_p1 = scmp.lt.s32.totalorder %s51_s28, %s51_s28 }
   0xf   :  { %p5014_p0 = scmp.ne.s32.totalorder %s51_s28, %s5013_s29  ;;  %p5019_p2 = scmp.lt.s32.totalorder %s5013_s29, %s5013_s29 }
  0x11   :  { %p5020_p3 = por %p5019_p2, %p5018_p1 }
  0x13   :  { %p5021_p4 = pnand %p5020_p3, %p5014_p0 }
  0x15   :  { %5024 = shalt.err (!%p5021_p4)
}
  0x16   :  { %s5324_s30 = smov 64   ;;  %s5325_s0 = smov 4  }
  0x17   :  { %s6313_s20 = sld [smem:[#allocation36_spill]]  ;;  %s5326_s21 = smov [#allocation8]  }
  0x18   :  { %s74_s22 = sshll.u32 %s5326_s21, 4  ;;  %s5327_s2 = smov [#allocation11]   ;;  %s75_s22 = int_to_ptr.vmem [resolvable:$true] %s74_s22 }
  0x19   :  { %s99_s23 = sshll.u32 %s5327_s2, 4  ;;  %s5033_s24 = scalar_lea.vmem %s75_s22, 256  ;;  %s100_s23 = int_to_ptr.vmem [resolvable:$true] %s99_s23 }
  0x1a   :  { %p5034_p5 = scmp.ne.s32.totalorder %s75_s22, %s5033_s24  ;;  %p5038_p6 = scmp.lt.s32.totalorder %s75_s22, %s75_s22 }
  0x1b   :  { %p5039_p7 = scmp.lt.s32.totalorder %s5033_s24, %s5033_s24 }
  0x1d   :  { %56 = dma.hbm_to_vmem [thread:$0]  %s6313_s20, 256, %s51_s28, [#allocation6], %s5324_s30, %s5324_s30, %s5325_s0  }
  0x1e   :  { %p5040_p8 = por %p5039_p7, %p5038_p6 }
  0x20   :  { %p5041_p9 = pnand %p5040_p8, %p5034_p5 }
  0x22   :  { %5044 = shalt.err (!%p5041_p9)
}
  0x23   :  { %80 = dma.hbm_to_vmem [thread:$0]  %s6294_s3, 256, %s75_s22, [#allocation9], %s5324_s30, %s5324_s30, %s5325_s0  }
  0x24   :  { %s5053_s27 = scalar_lea.vmem %s100_s23, 16  ;;  %s5057_s28 = scalar_lea.vmem %s100_s23, 32 }
  0x25   :  { %p5054_p10 = scmp.ne.s32.totalorder %s100_s23, %s5053_s27  ;;  %p5058_p11 = scmp.lt.s32.totalorder %s100_s23, %s100_s23 }
  0x26   :  { %p5059_p12 = scmp.lt.s32.totalorder %s5057_s28, %s5053_s27 }
  0x28   :  { %p5060_p13 = por %p5059_p12, %p5058_p11 }
  0x2a   :  { %p5061_p0 = pnand %p5060_p13, %p5054_p10 }
  0x2c   :  { %5064 = shalt.err (!%p5061_p0)
}
  0x2d   :  { %102 = dma.hbm_to_vmem [thread:$0]  %s6296_s5, 16, %s100_s23, [#allocation12]  }
  0x2e   :  { %s5328_s1 = smov [#allocation14]   ;;  %s5329_s21 = smov [#allocation17]  }
  0x2f   :  { %s119_s20 = sshll.u32 %s5328_s1, 4  ;;  %s142_s2 = sshll.u32 %s5329_s21, 4  ;;  %s120_s20 = int_to_ptr.vmem [resolvable:$true] %s119_s20  ;;  %s143_s2 = int_to_ptr.vmem [resolvable:$true] %s142_s2 }
  0x30   :  { %s5073_s24 = scalar_lea.vmem %s120_s20, 16  ;;  %s5077_s3 = scalar_lea.vmem %s120_s20, 32 }
  0x31   :  { %p5074_p1 = scmp.ne.s32.totalorder %s120_s20, %s5073_s24  ;;  %p5078_p2 = scmp.lt.s32.totalorder %s120_s20, %s120_s20 }
  0x32   :  { %p5079_p3 = scmp.lt.s32.totalorder %s5077_s3, %s5073_s24 }
  0x34   :  { %p5080_p4 = por %p5079_p3, %p5078_p2 }
  0x36   :  { %p5081_p5 = pnand %p5080_p4, %p5074_p1 }
  0x38   :  { %5084 = shalt.err (!%p5081_p5)
}
  0x39   :  { %122 = dma.hbm_to_vmem [thread:$0]  %s6298_s7, 16, %s120_s20, [#allocation15]  }
  0x3a   :  { %s5093_s26 = scalar_lea.vmem %s143_s2, 256  ;;  %p5098_p7 = scmp.lt.s32.totalorder %s143_s2, %s143_s2 }
  0x3b   :  { %p5094_p6 = scmp.ne.s32.totalorder %s143_s2, %s5093_s26  ;;  %p5099_p8 = scmp.lt.s32.totalorder %s5093_s26, %s5093_s26 }
  0x3d   :  { %p5100_p9 = por %p5099_p8, %p5098_p7 }
  0x3f   :  { %p5101_p10 = pnand %p5100_p9, %p5094_p6 }
  0x41   :  { %5104 = shalt.err (!%p5101_p10)
}
  0x42   :  { %148 = dma.hbm_to_vmem [thread:$0]  %s6301_s10, 256, %s143_s2, [#allocation18], %s5324_s30, %s5324_s30, %s5325_s0  }
  0x43   :  { %s5330_s27 = smov [#allocation20]   ;;  %s5331_s29 = smov [#allocation2]  }
  0x44   :  { %s166_s28 = sshll.u32 %s5330_s27, 4  ;;  %s38_s7 = sshll.u32 %s5331_s29, 4  ;;  %s167_s28 = int_to_ptr.vmem [resolvable:$true] %s166_s28  ;;  %s39_s7 = int_to_ptr.vmem [resolvable:$true] %s38_s7 }
  0x45   :  { %s5113_s19 = scalar_lea.vmem %s167_s28, 256  ;;  %p5118_p12 = scmp.lt.s32.totalorder %s167_s28, %s167_s28 }
  0x46   :  { %p5114_p11 = scmp.ne.s32.totalorder %s167_s28, %s5113_s19  ;;  %p5119_p13 = scmp.lt.s32.totalorder %s5113_s19, %s5113_s19 }
  0x48   :  { %p5120_p0 = por %p5119_p13, %p5118_p12 }
  0x4a   :  { %p5121_p1 = pnand %p5120_p0, %p5114_p11 }
  0x4c   :  { %5124 = shalt.err (!%p5121_p1)
}
  0x4d   :  { %172 = dma.hbm_to_vmem [thread:$0]  %s6303_s12, 256, %s167_s28, [#allocation21], %s5324_s30, %s5324_s30, %s5325_s0  }
  0x4e   :  { %s5133_s10 = scalar_lea.vmem %s39_s7, 128  ;;  %p5138_p3 = scmp.lt.s32.totalorder %s39_s7, %s39_s7 }
  0x4f   :  { %p5134_p2 = scmp.ne.s32.totalorder %s39_s7, %s5133_s10  ;;  %p5139_p4 = scmp.lt.s32.totalorder %s5133_s10, %s5133_s10 }
  0x51   :  { %p5140_p5 = por %p5139_p4, %p5138_p3 }
  0x53   :  { %p5141_p6 = pnand %p5140_p5, %p5134_p2 }
  0x55   :  { %5144 = shalt.err (!%p5141_p6)
}
  0x56   :  { %s5332_s21 = smov 16   ;;  %s5333_s2 = smov 1  }
  0x57   :  { %s6314_s22 = sld [smem:[#allocation35_spill]]  ;;  %s5334_s25 = smov [#allocation7]  }
  0x58   :  { %s62_s26 = sshll.u32 %s5334_s25, 4  ;;  %s5335_s5 = smov [#allocation10]   ;;  %s63_s26 = int_to_ptr.vmem [resolvable:$true] %s62_s26 }
  0x59   :  { %s86_s23 = sshll.u32 %s5335_s5, 4  ;;  %s5153_s12 = scalar_lea.vmem %s63_s26, 256  ;;  %s87_s23 = int_to_ptr.vmem [resolvable:$true] %s86_s23 }
  0x5a   :  { %p5154_p7 = scmp.ne.s32.totalorder %s63_s26, %s5153_s12  ;;  %p5158_p8 = scmp.lt.s32.totalorder %s63_s26, %s63_s26 }
  0x5b   :  { %p5159_p9 = scmp.lt.s32.totalorder %s5153_s12, %s5153_s12 }
  0x5d   :  { %44 = dma.hbm_to_vmem [thread:$0]  %s6314_s22, 128, %s39_s7, [#allocation3], %s5332_s21, %s5332_s21, %s5333_s2  }
  0x5e   :  { %p5160_p10 = por %p5159_p9, %p5158_p8 }
  0x60   :  { %p5161_p11 = pnand %p5160_p10, %p5154_p7 }
  0x62   :  { %5164 = shalt.err (!%p5161_p11)
}
  0x63   :  { %s6315_s29 = sld [smem:[#allocation37_spill]]  ;;  %s5173_s7 = scalar_lea.vmem %s87_s23, 256 }
  0x64   :  { %p5174_p12 = scmp.ne.s32.totalorder %s87_s23, %s5173_s7  ;;  %p5178_p13 = scmp.lt.s32.totalorder %s87_s23, %s87_s23 }
  0x65   :  { %p5179_p0 = scmp.lt.s32.totalorder %s5173_s7, %s5173_s7 }
  0x67   :  { %p5180_p1 = por %p5179_p0, %p5178_p13 }
  0x69   :  { %68 = dma.hbm_to_vmem [thread:$0]  %s6315_s29, 256, %s63_s26, [#allocation6], %s5324_s30, %s5324_s30, %s5325_s0  }
  0x6a   :  { %p5181_p2 = pnand %p5180_p1, %p5174_p12 }
  0x6c   :  { %5184 = shalt.err (!%p5181_p2)
}
  0x6d   :  { %92 = dma.hbm_to_vmem [thread:$0]  %s6295_s4, 256, %s87_s23, [#allocation9], %s5324_s30, %s5324_s30, %s5325_s0  }
  0x6e   :  { %s5336_s20 = smov [#allocation13]   ;;  %s5337_s21 = smov [#allocation16]  }
  0x6f   :  { %s109_s10 = sshll.u32 %s5336_s20, 4  ;;  %s128_s2 = sshll.u32 %s5337_s21, 4  ;;  %s110_s10 = int_to_ptr.vmem [resolvable:$true] %s109_s10  ;;  %s129_s2 = int_to_ptr.vmem [resolvable:$true] %s128_s2 }
  0x70   :  { %s5193_s24 = scalar_lea.vmem %s110_s10, 16  ;;  %s5197_s3 = scalar_lea.vmem %s110_s10, 32 }
  0x71   :  { %p5194_p3 = scmp.ne.s32.totalorder %s110_s10, %s5193_s24  ;;  %p5198_p4 = scmp.lt.s32.totalorder %s110_s10, %s110_s10 }
  0x72   :  { %p5199_p5 = scmp.lt.s32.totalorder %s5197_s3, %s5193_s24 }
  0x74   :  { %p5200_p6 = por %p5199_p5, %p5198_p4 }
  0x76   :  { %p5201_p7 = pnand %p5200_p6, %p5194_p3 }
  0x78   :  { %5204 = shalt.err (!%p5201_p7)
}
  0x79   :  { %112 = dma.hbm_to_vmem [thread:$0]  %s6297_s6, 16, %s110_s10, [#allocation12]  }
  0x7a   :  { %s5213_s26 = scalar_lea.vmem %s129_s2, 256  ;;  %p5218_p9 = scmp.lt.s32.totalorder %s129_s2, %s129_s2 }
  0x7b   :  { %p5214_p8 = scmp.ne.s32.totalorder %s129_s2, %s5213_s26  ;;  %p5219_p10 = scmp.lt.s32.totalorder %s5213_s26, %s5213_s26 }
  0x7d   :  { %p5220_p11 = por %p5219_p10, %p5218_p9 }
  0x7f   :  { %p5221_p12 = pnand %p5220_p11, %p5214_p8 }
  0x81   :  { %5224 = shalt.err (!%p5221_p12)
}
  0x82   :  { %134 = dma.hbm_to_vmem [thread:$0]  %s6299_s8, 256, %s129_s2, [#allocation15], %s5324_s30, %s5324_s30, %s5325_s0  }
  0x83   :  { %s5338_s23 = smov [#allocation19]   ;;  %s5339_s27 = smov [#allocation22]  }
  0x84   :  { %s154_s12 = sshll.u32 %s5338_s23, 4  ;;  %s178_s6 = sshll.u32 %s5339_s27, 4  ;;  %s155_s12 = int_to_ptr.vmem [resolvable:$true] %s154_s12  ;;  %s179_s6 = int_to_ptr.vmem [resolvable:$true] %s178_s6 }
  0x85   :  { %s5233_s28 = scalar_lea.vmem %s155_s12, 256  ;;  %p5238_p0 = scmp.lt.s32.totalorder %s155_s12, %s155_s12 }
  0x86   :  { %p5234_p13 = scmp.ne.s32.totalorder %s155_s12, %s5233_s28  ;;  %p5239_p1 = scmp.lt.s32.totalorder %s5233_s28, %s5233_s28 }
  0x88   :  { %p5240_p2 = por %p5239_p1, %p5238_p0 }
  0x8a   :  { %p5241_p3 = pnand %p5240_p2, %p5234_p13 }
  0x8c   :  { %5244 = shalt.err (!%p5241_p3)
}
  0x8d   :  { %160 = dma.hbm_to_vmem [thread:$0]  %s6302_s11, 256, %s155_s12, [#allocation18], %s5324_s30, %s5324_s30, %s5325_s0  }
  0x8e   :  { %s5253_s8 = scalar_lea.vmem %s179_s6, 256  ;;  %p5258_p5 = scmp.lt.s32.totalorder %s179_s6, %s179_s6 }
  0x8f   :  { %p5254_p4 = scmp.ne.s32.totalorder %s179_s6, %s5253_s8  ;;  %p5259_p6 = scmp.lt.s32.totalorder %s5253_s8, %s5253_s8 }
  0x91   :  { %p5260_p7 = por %p5259_p6, %p5258_p5 }
  0x93   :  { %p5261_p8 = pnand %p5260_p7, %p5254_p4 }
  0x95   :  { %5264 = shalt.err (!%p5261_p8)
}
  0x96   :  { %184 = dma.hbm_to_vmem [thread:$0]  %s6304_s13, 256, %s179_s6, [#allocation21], %s5324_s30, %s5324_s30, %s5325_s0  }
  0x97   :  { %5305 = dma.done.wait [#allocation3], 128  }
  0x98   :  { %5306 = vsyncadd [#allocation3], 4294967168 }
  0x99   :  { %5307 = dma.done.wait [#allocation6], 512  }
  0x9a   :  { %5308 = vsyncadd [#allocation6], 4294966784 }
  0x9b   :  { %5309 = dma.done.wait [#allocation9], 512  }
  0x9c   :  { %5310 = vsyncadd [#allocation9], 4294966784 }
  0x9d   :  { %5311 = dma.done.wait [#allocation12], 32  }
  0x9e   :  { %5312 = vsyncadd [#allocation12], 4294967264 }
  0x9f   :  { %5313 = dma.done.wait [#allocation15], 272  }
  0xa0   :  { %5314 = vsyncadd [#allocation15], 4294967024 }
  0xa1   :  { %5315 = dma.done.wait [#allocation18], 512  }
  0xa2   :  { %5316 = vsyncadd [#allocation18], 4294966784 }
  0xa3   :  { %5317 = dma.done.wait [#allocation21], 512  }
  0xa4   :  { %5318 = vsyncadd [#allocation21], 4294966784  ;;  %v5340_v0 = vmov 0.0   ;;  %vm5341_vm0 = vmmov 0   ;;  %v5515_v1 = vld [vmem:[#allocation5 + $0x8] sm:$0xff]   ;;  %v5518_v2 = vld [vmem:[#allocation5] sm:$0xff]  }
  0xa5   :  { %4259 = vmatprep.subr.bf16.mxu0 %v5340_v0  ;;  %4263 = vmatprep.mubr.msk.bf16.mxu0 %vm5341_vm0, %v5340_v0  ;;  %v313_v3 = vld [vmem:[#allocation2] sm:$0x1]  ;;  %vm326_vm1 = vcmask 261120   ;;  %v5524_v5 = vld [vmem:[#allocation8 + $0x8] sm:$0xff]   ;;  %v5528_v6 = vld [vmem:[#allocation7] sm:$0xff]   ;;  %v5342_v10 = vmov 0  }
  0xa6   :  { %4267 = vmatprep.subr.bf16.mxu1 %v5340_v0  ;;  %4271 = vmatprep.mubr.msk.bf16.mxu1 %vm5341_vm0, %v5340_v0  ;;  %v5521_v4 = vld [vmem:[#allocation7 + $0x8] sm:$0xff]   ;;  %v5530_v7 = vld [vmem:[#allocation8] sm:$0xff]   ;;  %v5542_v9 = vld [vmem:[#allocation10] sm:$0xff]   ;;  %s5343_s11 = smov 32   ;;  %s5344_s13 = smov 96   ;;  %vm551_vm2 = vcmask 254976  }
  0xa7   :  { %4260 = vmatpush3.bf16.msra.mxu0 %v5515_v1  ;;  %4268 = vmatpush3.bf16.msra.mxu1 %v5521_v4  ;;  %v5534_v8 = vld [vmem:[#allocation10 + $0x8] sm:$0xff]   ;;  %v5567_v13 = vld [vmem:[#allocation11] ss:$0 sm:$0xff]  ;;  %v5570_v33 = vld [vmem:[#allocation14] ss:$0 sm:$0xff] }
  0xa8   :  { %4261 = vmatprep.subr.bf16.mxu0 %v5340_v0  ;;  %4269 = vmatprep.subr.bf16.mxu1 %v5340_v0  ;;  %v5573_v35 = vld [vmem:[#allocation13] ss:$0 sm:$0xff]  ;;  %v554_v40 = vld [vmem:[#allocation2 + $0x1] sm:$0x1] }
  0xab   :  { %4262 = vmatpush3.bf16.msra.mxu0 %v5518_v2  ;;  %4270 = vmatpush3.bf16.msra.mxu1 %v5528_v6 }
  0xac   :  { %4275 = vmatprep.subr.bf16.mxu0 %v5340_v0  ;;  %4283 = vmatprep.subr.bf16.mxu1 %v5340_v0 }
  0xae   :  { %4264 = vmatmul.mubr.msk.bf16.vlgmr.msra.gmra.mxu0 %vm326_vm1, %v313_v3  ;;  %4272 = vmatmul.mubr.msk.bf16.vlgmr.msra.gmra.mxu1 %vm326_vm1, %v313_v3 }
  0xaf   :  { %4276 = vmatpush3.bf16.msra.mxu0 %v5524_v5  ;;  %4279 = vmatprep.mubr.msk.bf16.mxu0 %vm5341_vm0, %v5340_v0 }
  0xb0   :  { %4277 = vmatprep.subr.bf16.mxu0 %v5340_v0  ;;  %4284 = vmatpush3.bf16.msra.mxu1 %v5534_v8 }
  0xb1   :  { %4287 = vmatprep.mubr.msk.bf16.mxu1 %vm5341_vm0, %v5340_v0  ;;  %4285 = vmatprep.subr.bf16.mxu1 %v5340_v0 }
  0xb3   :  { %4278 = vmatpush3.bf16.msra.mxu0 %v5530_v7 }
  0xb4   :  { %4291 = vmatprep.subr.bf16.mxu0 %v5340_v0  ;;  %4286 = vmatpush3.bf16.msra.mxu1 %v5542_v9 }
  0xb5   :  { %4299 = vmatprep.subr.bf16.mxu1 %v5340_v0 }
  0xb6   :  { %4280 = vmatmul.mubr.bf16.vlgmr.msra.gmra.mxu0 %v5342_v10 }
  0xb7   :  { %4292 = vmatpush3.bf16.msra.mxu0 %v5515_v1  ;;  %4295 = vmatprep.mubr.msk.bf16.mxu0 %vm5341_vm0, %v5340_v0 }
  0xb8   :  { %4293 = vmatprep.subr.bf16.mxu0 %v5340_v0  ;;  %4288 = vmatmul.mubr.bf16.vlgmr.msra.gmra.mxu1 %v5342_v10 }
  0xb9   :  { %4300 = vmatpush3.bf16.msra.mxu1 %v5521_v4  ;;  %4303 = vmatprep.mubr.msk.bf16.mxu1 %vm5341_vm0, %v5340_v0 }
  0xba   :  { %4301 = vmatprep.subr.bf16.mxu1 %v5340_v0 }
  0xbb   :  { %4294 = vmatpush3.bf16.msra.mxu0 %v5518_v2 }
  0xbc   :  { %4307 = vmatprep.subr.bf16.mxu0 %v5340_v0 }
  0xbd   :  { %4302 = vmatpush3.bf16.msra.mxu1 %v5528_v6 }
  0xbe   :  { %4315 = vmatprep.subr.bf16.mxu1 %v5340_v0  ;;  %4296 = vmatmul.mubr.msk.bf16.vlgmr.msra.gmra.mxu0 %vm326_vm1, %v554_v40 }
  0xbf   :  { %4308 = vmatpush3.bf16.msra.mxu0 %v5524_v5  ;;  %4311 = vmatprep.mubr.msk.bf16.mxu0 %vm5341_vm0, %v5340_v0 }
  0xc0   :  { %4304 = vmatmul.mubr.msk.bf16.vlgmr.msra.gmra.mxu1 %vm326_vm1, %v554_v40  ;;  %4309 = vmatprep.subr.bf16.mxu0 %v5340_v0 }
  0xc1   :  { %4316 = vmatpush3.bf16.msra.mxu1 %v5534_v8  ;;  %4319 = vmatprep.mubr.msk.bf16.mxu1 %vm5341_vm0, %v5340_v0 }
  0xc2   :  { %4317 = vmatprep.subr.bf16.mxu1 %v5340_v0 }
  0xc3   :  { %4310 = vmatpush3.bf16.msra.mxu0 %v5530_v7 }
  0xc4   :  { %4323 = vmatprep.subr.bf16.mxu0 %v5340_v0 }
  0xc5   :  { %4318 = vmatpush3.bf16.msra.mxu1 %v5542_v9 }
  0xc6   :  { %4331 = vmatprep.subr.bf16.mxu1 %v5340_v0 }
 0x16e   :  { %v364_v11 = vpop.f32.mrf.mxu0  ;;  %v416_v15 = vpop.f32.mrf.mxu1 }
 0x16f   :  { %v365_v17 = vadd.f32 %v5567_v13, %v364_v11  ;;  %v417_v37 = vadd.f32 %v5573_v35, %v416_v15 }
 0x170   :  { %v4265_v12 = vpop.f32.mrf.mxu0  ;;  %v4273_v18 = vpop.f32.mrf.mxu1 }
 0x172   :  { %v367_v14 = vpop.f32.mrf.mxu0  ;;  %v419_v21 = vpop.f32.mrf.mxu1 }
 0x174   :  { %v4266_v16 = vpop.f32.mrf.mxu0  ;;  %v4274_v24 = vpop.f32.mrf.mxu1 }
 0x176   :  { %v471_v19 = vpop.f32.mrf.mxu0 }
 0x177   :  { %v529_v20 = vadd.f32 %v471_v19, %v365_v17 }
 0x178   :  { %v4281_v22 = vpop.f32.mrf.mxu0  ;;  %v523_v26 = vpop.f32.mrf.mxu1 }
 0x179   :  { %v3942_v23 = vmul.f32 -1.442695, %v529_v20  ;;  %v524_v34 = vadd.f32 %v5570_v33, %v523_v26  ;;  %v750_v22 = vld [vmem:[#allocation2 + $0x2] sm:$0x1] }
 0x17a   :  { %v474_v25 = vpop.f32.mrf.mxu0  ;;  %v4289_v28 = vpop.f32.mrf.mxu1 }
 0x17b   :  { %4896 = vpow2.f32 %v3942_v23 }
 0x17c   :  { %v4282_v27 = vpop.f32.mrf.mxu0  ;;  %v526_v29 = vpop.f32.mrf.mxu1 }
 0x17e   :  { %v4290_v30 = vpop.f32.mrf.mxu1  ;;  %v592_v48 = vpop.f32.mrf.mxu0 }
 0x17f   :  { %v593_v57 = vadd.f32 %v5567_v13, %v592_v48 }
 0x180   :  { %v632_v49 = vpop.f32.mrf.mxu1  ;;  %v4297_v50 = vpop.f32.mrf.mxu0 }
 0x181   :  { %v633_v19 = vadd.f32 %v5573_v35, %v632_v49 }
 0x182   :  { %v4305_v51 = vpop.f32.mrf.mxu1  ;;  %v595_v52 = vpop.f32.mrf.mxu0 }
 0x184   :  { %v635_v53 = vpop.f32.mrf.mxu1  ;;  %v4298_v54 = vpop.f32.mrf.mxu0 }
 0x186   :  { %v4306_v55 = vpop.f32.mrf.mxu1 }
 0x188   :  { %v4897_v31 = vpop.eup %4896 }
 0x189   :  { %v533_v32 = vadd.f32 1.0, %v4897_v31 }
 0x18b   :  { %4898 = vrcp.f32 %v533_v32 }
 0x198   :  { %v4899_v36 = vpop.eup %4898 }
 0x199   :  { %v536_v38 = vmul.f32 %v4899_v36, %v524_v34  ;;  %v539_v42 = vsub.f32 1.0, %v4899_v36  ;;  %v545_v44 = vmul.f32 0.0, %v4899_v36 }
 0x19b   :  { %v537_v39 = vadd.f32 %v536_v38, %v417_v37 }
 0x19d   :  { %4900 = vtanh.f32 %v537_v39 }
 0x1aa   :  { %v4901_v41 = vpop.eup %4900 }
 0x1ab   :  { %541 = vrot.lane.b32.xlu0 %v4901_v41, %s5343_s11 }
 0x21d   :  { %v542_v43 = vpop.permute.xlu0 %541 }
 0x21e   :  { %v544_v45 = vmul.f32 %v542_v43, %v539_v42 }
 0x220   :  { %v5591_v46 = vadd.f32 %v545_v44, %v544_v45 }
 0x222   :  { %v638_v47 = vpack.c.bf16 %v5591_v46, %v5591_v46 }
 0x224   :  { %640 = vrot.lane.b32.xlu0 %v638_v47, %s5344_s13 }
 0x296   :  { %v641_v56 = vpop.permute.xlu0 %640 }
 0x297   :  { %4312 = vmatmul.mubr.msk.bf16.vlgmr.msra.gmra.mxu0 %vm326_vm1, %v641_v56  ;;  %4320 = vmatmul.mubr.msk.bf16.vlgmr.msra.gmra.mxu1 %vm326_vm1, %v641_v56 }
 0x298   :  { %4324 = vmatpush3.bf16.msra.mxu0 %v5515_v1  ;;  %4332 = vmatpush3.bf16.msra.mxu1 %v5521_v4 }
 0x299   :  { %4325 = vmatprep.subr.bf16.mxu0 %v5340_v0  ;;  %4327 = vmatprep.mubr.msk.bf16.mxu0 %vm5341_vm0, %v5340_v0 }
 0x29a   :  { %4333 = vmatprep.subr.bf16.mxu1 %v5340_v0  ;;  %4335 = vmatprep.mubr.msk.bf16.mxu1 %vm5341_vm0, %v5340_v0 }
 0x29c   :  { %4326 = vmatpush3.bf16.msra.mxu0 %v5518_v2  ;;  %4334 = vmatpush3.bf16.msra.mxu1 %v5528_v6 }
 0x29d   :  { %4339 = vmatprep.subr.bf16.mxu0 %v5340_v0  ;;  %4347 = vmatprep.subr.bf16.mxu1 %v5340_v0 }
 0x29f   :  { %4328 = vmatmul.mubr.msk.bf16.vlgmr.msra.gmra.mxu0 %vm326_vm1, %v750_v22  ;;  %4336 = vmatmul.mubr.msk.bf16.vlgmr.msra.gmra.mxu1 %vm326_vm1, %v750_v22 }
 0x2a0   :  { %4340 = vmatpush3.bf16.msra.mxu0 %v5524_v5  ;;  %4348 = vmatpush3.bf16.msra.mxu1 %v5534_v8 }
 0x2a1   :  { %4341 = vmatprep.subr.bf16.mxu0 %v5340_v0  ;;  %4349 = vmatprep.subr.bf16.mxu1 %v5340_v0 }
 0x2a2   :  { %4343 = vmatprep.mubr.msk.bf16.mxu0 %vm5341_vm0, %v5340_v0  ;;  %4351 = vmatprep.mubr.msk.bf16.mxu1 %vm5341_vm0, %v5340_v0 }
 0x2a4   :  { %4342 = vmatpush3.bf16.msra.mxu0 %v5530_v7  ;;  %4350 = vmatpush3.bf16.msra.mxu1 %v5542_v9 }
 0x2a5   :  { %4355 = vmatprep.subr.bf16.mxu0 %v5340_v0  ;;  %4363 = vmatprep.subr.bf16.mxu1 %v5340_v0 }
 0x357   :  { %v679_v58 = vpop.f32.mrf.mxu0  ;;  %v719_v59 = vpop.f32.mrf.mxu1 }
 0x358   :  { %v725_v60 = vadd.f32 %v679_v58, %v593_v57  ;;  %v720_v17 = vadd.f32 %v5570_v33, %v719_v59 }
 0x359   :  { %v4313_v61 = vpop.f32.mrf.mxu0  ;;  %v4321_v62 = vpop.f32.mrf.mxu1 }
 0x35a   :  { %v3947_v63 = vmul.f32 -1.442695, %v725_v60  ;;  %v946_v60 = vld [vmem:[#allocation2 + $0x3] sm:$0x1] }
 0x35b   :  { %v682_v3 = vpop.f32.mrf.mxu0  ;;  %v722_v11 = vpop.f32.mrf.mxu1 }
 0x35c   :  { %4902 = vpow2.f32 %v3947_v63 }
 0x35d   :  { %v4314_v12 = vpop.f32.mrf.mxu0  ;;  %v4322_v14 = vpop.f32.mrf.mxu1 }
 0x35f   :  { %v788_v30 = vpop.f32.mrf.mxu0  ;;  %v828_v31 = vpop.f32.mrf.mxu1 }
 0x360   :  { %v789_v41 = vadd.f32 %v5567_v13, %v788_v30  ;;  %v829_v57 = vadd.f32 %v5573_v35, %v828_v31 }
 0x361   :  { %v4329_v32 = vpop.f32.mrf.mxu0  ;;  %v4337_v34 = vpop.f32.mrf.mxu1 }
 0x363   :  { %v791_v36 = vpop.f32.mrf.mxu0  ;;  %v831_v37 = vpop.f32.mrf.mxu1 }
 0x365   :  { %v4330_v38 = vpop.f32.mrf.mxu0  ;;  %v4338_v39 = vpop.f32.mrf.mxu1 }
 0x369   :  { %v4903_v15 = vpop.eup %4902 }
 0x36a   :  { %v729_v16 = vadd.f32 1.0, %v4903_v15 }
 0x36c   :  { %4904 = vrcp.f32 %v729_v16 }
 0x379   :  { %v4905_v18 = vpop.eup %4904 }
 0x37a   :  { %v732_v20 = vmul.f32 %v4905_v18, %v720_v17  ;;  %v735_v24 = vsub.f32 1.0, %v4905_v18  ;;  %v741_v26 = vmul.f32 %v4905_v18, %v5591_v46 }
 0x37c   :  { %v733_v21 = vadd.f32 %v732_v20, %v633_v19 }
 0x37e   :  { %4906 = vtanh.f32 %v733_v21 }
 0x38b   :  { %v4907_v23 = vpop.eup %4906 }
 0x38c   :  { %737 = vrot.lane.b32.xlu1 %v4907_v23, %s5343_s11 }
 0x3fe   :  { %v738_v25 = vpop.permute.xlu1 %737 }
 0x3ff   :  { %v740_v27 = vmul.f32 %v738_v25, %v735_v24 }
 0x401   :  { %v5629_v28 = vadd.f32 %v741_v26, %v740_v27 }
 0x403   :  { %v834_v29 = vpack.c.bf16 %v5629_v28, %v5629_v28 }
 0x405   :  { %836 = vrot.lane.b32.xlu1 %v834_v29, %s5344_s13 }
 0x477   :  { %v837_v40 = vpop.permute.xlu1 %836 }
 0x478   :  { %4344 = vmatmul.mubr.msk.bf16.vlgmr.msra.gmra.mxu0 %vm326_vm1, %v837_v40  ;;  %4352 = vmatmul.mubr.msk.bf16.vlgmr.msra.gmra.mxu1 %vm326_vm1, %v837_v40 }
 0x479   :  { %4356 = vmatpush3.bf16.msra.mxu0 %v5515_v1  ;;  %4364 = vmatpush3.bf16.msra.mxu1 %v5521_v4 }
 0x47a   :  { %4357 = vmatprep.subr.bf16.mxu0 %v5340_v0  ;;  %4359 = vmatprep.mubr.msk.bf16.mxu0 %vm5341_vm0, %v5340_v0 }
 0x47b   :  { %4365 = vmatprep.subr.bf16.mxu1 %v5340_v0  ;;  %4367 = vmatprep.mubr.msk.bf16.mxu1 %vm5341_vm0, %v5340_v0 }
 0x47d   :  { %4358 = vmatpush3.bf16.msra.mxu0 %v5518_v2  ;;  %4366 = vmatpush3.bf16.msra.mxu1 %v5528_v6 }
 0x47e   :  { %4371 = vmatprep.subr.bf16.mxu0 %v5340_v0  ;;  %4379 = vmatprep.subr.bf16.mxu1 %v5340_v0 }
 0x480   :  { %4360 = vmatmul.mubr.msk.bf16.vlgmr.msra.gmra.mxu0 %vm326_vm1, %v946_v60  ;;  %4368 = vmatmul.mubr.msk.bf16.vlgmr.msra.gmra.mxu1 %vm326_vm1, %v946_v60 }
 0x481   :  { %4372 = vmatpush3.bf16.msra.mxu0 %v5524_v5  ;;  %4380 = vmatpush3.bf16.msra.mxu1 %v5534_v8 }
 0x482   :  { %4373 = vmatprep.subr.bf16.mxu0 %v5340_v0  ;;  %4381 = vmatprep.subr.bf16.mxu1 %v5340_v0 }
 0x483   :  { %4375 = vmatprep.mubr.msk.bf16.mxu0 %vm5341_vm0, %v5340_v0  ;;  %4383 = vmatprep.mubr.msk.bf16.mxu1 %vm5341_vm0, %v5340_v0 }
 0x485   :  { %4374 = vmatpush3.bf16.msra.mxu0 %v5530_v7  ;;  %4382 = vmatpush3.bf16.msra.mxu1 %v5542_v9 }
 0x486   :  { %4387 = vmatprep.subr.bf16.mxu0 %v5340_v0  ;;  %4395 = vmatprep.subr.bf16.mxu1 %v5340_v0 }
 0x538   :  { %v875_v42 = vpop.f32.mrf.mxu0  ;;  %v915_v43 = vpop.f32.mrf.mxu1 }
 0x539   :  { %v921_v44 = vadd.f32 %v875_v42, %v789_v41  ;;  %v916_v55 = vadd.f32 %v5570_v33, %v915_v43 }
 0x53a   :  { %v4345_v45 = vpop.f32.mrf.mxu0  ;;  %v4353_v47 = vpop.f32.mrf.mxu1 }
 0x53b   :  { %v3952_v48 = vmul.f32 -1.442695, %v921_v44  ;;  %v1142_v45 = vld [vmem:[#allocation2 + $0x4] sm:$0x1] }
 0x53c   :  { %v878_v49 = vpop.f32.mrf.mxu0  ;;  %v918_v50 = vpop.f32.mrf.mxu1 }
 0x53d   :  { %4908 = vpow2.f32 %v3952_v48 }
 0x53e   :  { %v4346_v51 = vpop.f32.mrf.mxu0  ;;  %v4354_v52 = vpop.f32.mrf.mxu1 }
 0x540   :  { %v984_v15 = vpop.f32.mrf.mxu0  ;;  %v1024_v16 = vpop.f32.mrf.mxu1 }
 0x541   :  { %v985_v24 = vadd.f32 %v5567_v13, %v984_v15  ;;  %v1025_v42 = vadd.f32 %v5573_v35, %v1024_v16 }
 0x542   :  { %v4361_v17 = vpop.f32.mrf.mxu0  ;;  %v4369_v18 = vpop.f32.mrf.mxu1 }
 0x544   :  { %v987_v19 = vpop.f32.mrf.mxu0  ;;  %v1027_v20 = vpop.f32.mrf.mxu1 }
 0x546   :  { %v4362_v21 = vpop.f32.mrf.mxu0  ;;  %v4370_v22 = vpop.f32.mrf.mxu1 }
 0x54a   :  { %v4909_v53 = vpop.eup %4908 }
 0x54b   :  { %v925_v54 = vadd.f32 1.0, %v4909_v53 }
 0x54d   :  { %4910 = vrcp.f32 %v925_v54 }
 0x55a   :  { %v4911_v56 = vpop.eup %4910 }
 0x55b   :  { %v928_v58 = vmul.f32 %v4911_v56, %v916_v55  ;;  %v931_v62 = vsub.f32 1.0, %v4911_v56  ;;  %v937_v3 = vmul.f32 %v4911_v56, %v5629_v28 }
 0x55d   :  { %v929_v59 = vadd.f32 %v928_v58, %v829_v57 }
 0x55f   :  { %4912 = vtanh.f32 %v929_v59 }
 0x56c   :  { %v4913_v61 = vpop.eup %4912 }
 0x56d   :  { %933 = vrot.lane.b32.xlu0 %v4913_v61, %s5343_s11 }
 0x5df   :  { %v934_v63 = vpop.permute.xlu0 %933 }
 0x5e0   :  { %v936_v11 = vmul.f32 %v934_v63, %v931_v62 }
 0x5e2   :  { %v5667_v12 = vadd.f32 %v937_v3, %v936_v11 }
 0x5e4   :  { %v1030_v14 = vpack.c.bf16 %v5667_v12, %v5667_v12 }
 0x5e6   :  { %1032 = vrot.lane.b32.xlu1 %v1030_v14, %s5344_s13 }
 0x658   :  { %v1033_v23 = vpop.permute.xlu1 %1032 }
 0x659   :  { %4376 = vmatmul.mubr.msk.bf16.vlgmr.msra.gmra.mxu0 %vm326_vm1, %v1033_v23  ;;  %4384 = vmatmul.mubr.msk.bf16.vlgmr.msra.gmra.mxu1 %vm326_vm1, %v1033_v23 }
 0x65a   :  { %4388 = vmatpush3.bf16.msra.mxu0 %v5515_v1  ;;  %4396 = vmatpush3.bf16.msra.mxu1 %v5521_v4 }
 0x65b   :  { %4389 = vmatprep.subr.bf16.mxu0 %v5340_v0  ;;  %4391 = vmatprep.mubr.msk.bf16.mxu0 %vm5341_vm0, %v5340_v0 }
 0x65c   :  { %4397 = vmatprep.subr.bf16.mxu1 %v5340_v0  ;;  %4399 = vmatprep.mubr.msk.bf16.mxu1 %vm5341_vm0, %v5340_v0 }
 0x65e   :  { %4390 = vmatpush3.bf16.msra.mxu0 %v5518_v2  ;;  %4398 = vmatpush3.bf16.msra.mxu1 %v5528_v6 }
 0x65f   :  { %4403 = vmatprep.subr.bf16.mxu0 %v5340_v0  ;;  %4411 = vmatprep.subr.bf16.mxu1 %v5340_v0 }
 0x661   :  { %4392 = vmatmul.mubr.msk.bf16.vlgmr.msra.gmra.mxu0 %vm326_vm1, %v1142_v45  ;;  %4400 = vmatmul.mubr.msk.bf16.vlgmr.msra.gmra.mxu1 %vm326_vm1, %v1142_v45 }
 0x662   :  { %4404 = vmatpush3.bf16.msra.mxu0 %v5524_v5  ;;  %4412 = vmatpush3.bf16.msra.mxu1 %v5534_v8 }
 0x663   :  { %4405 = vmatprep.subr.bf16.mxu0 %v5340_v0  ;;  %4413 = vmatprep.subr.bf16.mxu1 %v5340_v0 }
 0x664   :  { %4407 = vmatprep.mubr.msk.bf16.mxu0 %vm5341_vm0, %v5340_v0  ;;  %4415 = vmatprep.mubr.msk.bf16.mxu1 %vm5341_vm0, %v5340_v0 }
 0x666   :  { %4406 = vmatpush3.bf16.msra.mxu0 %v5530_v7  ;;  %4414 = vmatpush3.bf16.msra.mxu1 %v5542_v9 }
 0x667   :  { %4419 = vmatprep.subr.bf16.mxu0 %v5340_v0  ;;  %4427 = vmatprep.subr.bf16.mxu1 %v5340_v0 }
 0x719   :  { %v1071_v25 = vpop.f32.mrf.mxu0  ;;  %v1111_v26 = vpop.f32.mrf.mxu1 }
 0x71a   :  { %v1117_v27 = vadd.f32 %v1071_v25, %v985_v24  ;;  %v1112_v40 = vadd.f32 %v5570_v33, %v1111_v26 }
 0x71b   :  { %v4377_v29 = vpop.f32.mrf.mxu0  ;;  %v4385_v30 = vpop.f32.mrf.mxu1 }
 0x71c   :  { %v3957_v31 = vmul.f32 -1.442695, %v1117_v27  ;;  %v1338_v30 = vld [vmem:[#allocation2 + $0x5] sm:$0x1] }
 0x71d   :  { %v1074_v32 = vpop.f32.mrf.mxu0  ;;  %v1114_v34 = vpop.f32.mrf.mxu1 }
 0x71e   :  { %4914 = vpow2.f32 %v3957_v31 }
 0x71f   :  { %v4378_v36 = vpop.f32.mrf.mxu0  ;;  %v4386_v37 = vpop.f32.mrf.mxu1 }
 0x721   :  { %v1180_v54 = vpop.f32.mrf.mxu0  ;;  %v1220_v55 = vpop.f32.mrf.mxu1 }
 0x722   :  { %v1181_v63 = vadd.f32 %v5567_v13, %v1180_v54  ;;  %v1221_v26 = vadd.f32 %v5573_v35, %v1220_v55 }
 0x723   :  { %v4393_v56 = vpop.f32.mrf.mxu0  ;;  %v4401_v57 = vpop.f32.mrf.mxu1 }
 0x725   :  { %v1183_v58 = vpop.f32.mrf.mxu0  ;;  %v1223_v59 = vpop.f32.mrf.mxu1 }
 0x727   :  { %v4394_v60 = vpop.f32.mrf.mxu0  ;;  %v4402_v61 = vpop.f32.mrf.mxu1 }
 0x72b   :  { %v4915_v38 = vpop.eup %4914 }
 0x72c   :  { %v1121_v39 = vadd.f32 1.0, %v4915_v38 }
 0x72e   :  { %4916 = vrcp.f32 %v1121_v39 }
 0x73b   :  { %v4917_v41 = vpop.eup %4916 }
 0x73c   :  { %v1124_v43 = vmul.f32 %v4917_v41, %v1112_v40  ;;  %v1127_v48 = vsub.f32 1.0, %v4917_v41  ;;  %v1133_v50 = vmul.f32 %v4917_v41, %v5667_v12 }
 0x73e   :  { %v1125_v44 = vadd.f32 %v1124_v43, %v1025_v42 }
 0x740   :  { %4918 = vtanh.f32 %v1125_v44 }
 0x74d   :  { %v4919_v47 = vpop.eup %4918 }
 0x74e   :  { %1129 = vrot.lane.b32.xlu0 %v4919_v47, %s5343_s11 }
 0x7c0   :  { %v1130_v49 = vpop.permute.xlu0 %1129 }
 0x7c1   :  { %v1132_v51 = vmul.f32 %v1130_v49, %v1127_v48 }
 0x7c3   :  { %v5705_v52 = vadd.f32 %v1133_v50, %v1132_v51 }
 0x7c5   :  { %v1226_v53 = vpack.c.bf16 %v5705_v52, %v5705_v52 }
 0x7c7   :  { %1228 = vrot.lane.b32.xlu1 %v1226_v53, %s5344_s13 }
 0x839   :  { %v1229_v62 = vpop.permute.xlu1 %1228 }
 0x83a   :  { %4408 = vmatmul.mubr.msk.bf16.vlgmr.msra.gmra.mxu0 %vm326_vm1, %v1229_v62  ;;  %4416 = vmatmul.mubr.msk.bf16.vlgmr.msra.gmra.mxu1 %vm326_vm1, %v1229_v62 }
 0x83b   :  { %4420 = vmatpush3.bf16.msra.mxu0 %v5515_v1  ;;  %4428 = vmatpush3.bf16.msra.mxu1 %v5521_v4 }
 0x83c   :  { %4421 = vmatprep.subr.bf16.mxu0 %v5340_v0  ;;  %4423 = vmatprep.mubr.msk.bf16.mxu0 %vm5341_vm0, %v5340_v0 }
 0x83d   :  { %4429 = vmatprep.subr.bf16.mxu1 %v5340_v0  ;;  %4431 = vmatprep.mubr.msk.bf16.mxu1 %vm5341_vm0, %v5340_v0 }
 0x83f   :  { %4422 = vmatpush3.bf16.msra.mxu0 %v5518_v2  ;;  %4430 = vmatpush3.bf16.msra.mxu1 %v5528_v6 }
 0x840   :  { %4435 = vmatprep.subr.bf16.mxu0 %v5340_v0  ;;  %4443 = vmatprep.subr.bf16.mxu1 %v5340_v0 }
 0x842   :  { %4424 = vmatmul.mubr.msk.bf16.vlgmr.msra.gmra.mxu0 %vm326_vm1, %v1338_v30  ;;  %4432 = vmatmul.mubr.msk.bf16.vlgmr.msra.gmra.mxu1 %vm326_vm1, %v1338_v30 }
 0x843   :  { %4436 = vmatpush3.bf16.msra.mxu0 %v5524_v5  ;;  %4444 = vmatpush3.bf16.msra.mxu1 %v5534_v8 }
 0x844   :  { %4437 = vmatprep.subr.bf16.mxu0 %v5340_v0  ;;  %4445 = vmatprep.subr.bf16.mxu1 %v5340_v0 }
 0x845   :  { %4439 = vmatprep.mubr.msk.bf16.mxu0 %vm5341_vm0, %v5340_v0  ;;  %4447 = vmatprep.mubr.msk.bf16.mxu1 %vm5341_vm0, %v5340_v0 }
 0x847   :  { %4438 = vmatpush3.bf16.msra.mxu0 %v5530_v7  ;;  %4446 = vmatpush3.bf16.msra.mxu1 %v5542_v9 }
 0x848   :  { %4451 = vmatprep.subr.bf16.mxu0 %v5340_v0  ;;  %4459 = vmatprep.subr.bf16.mxu1 %v5340_v0 }
 0x8fa   :  { %v1267_v3 = vpop.f32.mrf.mxu0  ;;  %v1307_v11 = vpop.f32.mrf.mxu1 }
 0x8fb   :  { %v1313_v14 = vadd.f32 %v1267_v3, %v1181_v63  ;;  %v1308_v24 = vadd.f32 %v5570_v33, %v1307_v11 }
 0x8fc   :  { %v4409_v15 = vpop.f32.mrf.mxu0  ;;  %v4417_v16 = vpop.f32.mrf.mxu1 }
 0x8fd   :  { %v3962_v17 = vmul.f32 -1.442695, %v1313_v14 }
 0x8fe   :  { %v1270_v18 = vpop.f32.mrf.mxu0  ;;  %v1310_v19 = vpop.f32.mrf.mxu1 }
 0x8ff   :  { %4920 = vpow2.f32 %v3962_v17  ;;  %v1534_v17 = vld [vmem:[#allocation2 + $0x6] sm:$0x1] }
 0x900   :  { %v4410_v20 = vpop.f32.mrf.mxu0  ;;  %v4418_v21 = vpop.f32.mrf.mxu1 }
 0x902   :  { %v1376_v40 = vpop.f32.mrf.mxu0  ;;  %v1416_v41 = vpop.f32.mrf.mxu1 }
 0x903   :  { %v1377_v50 = vadd.f32 %v5567_v13, %v1376_v40  ;;  %v1417_v14 = vadd.f32 %v5573_v35, %v1416_v41 }
 0x904   :  { %v4425_v42 = vpop.f32.mrf.mxu0  ;;  %v4433_v43 = vpop.f32.mrf.mxu1 }
 0x906   :  { %v1379_v44 = vpop.f32.mrf.mxu0  ;;  %v1419_v45 = vpop.f32.mrf.mxu1 }
 0x908   :  { %v4426_v47 = vpop.f32.mrf.mxu0  ;;  %v4434_v48 = vpop.f32.mrf.mxu1 }
 0x90c   :  { %v4921_v22 = vpop.eup %4920 }
 0x90d   :  { %v1317_v23 = vadd.f32 1.0, %v4921_v22 }
 0x90f   :  { %4922 = vrcp.f32 %v1317_v23 }
 0x91c   :  { %v4923_v25 = vpop.eup %4922 }
 0x91d   :  { %v1320_v27 = vmul.f32 %v4923_v25, %v1308_v24  ;;  %v1323_v32 = vsub.f32 1.0, %v4923_v25  ;;  %v1329_v36 = vmul.f32 %v4923_v25, %v5705_v52 }
 0x91f   :  { %v1321_v29 = vadd.f32 %v1320_v27, %v1221_v26 }
 0x921   :  { %4924 = vtanh.f32 %v1321_v29 }
 0x92e   :  { %v4925_v31 = vpop.eup %4924 }
 0x92f   :  { %1325 = vrot.lane.b32.xlu0 %v4925_v31, %s5343_s11 }
 0x9a1   :  { %v1326_v34 = vpop.permute.xlu0 %1325 }
 0x9a2   :  { %v1328_v37 = vmul.f32 %v1326_v34, %v1323_v32 }
 0x9a4   :  { %v5743_v38 = vadd.f32 %v1329_v36, %v1328_v37 }
 0x9a6   :  { %v1422_v39 = vpack.c.bf16 %v5743_v38, %v5743_v38 }
 0x9a8   :  { %1424 = vrot.lane.b32.xlu1 %v1422_v39, %s5344_s13 }
 0xa1a   :  { %v1425_v49 = vpop.permute.xlu1 %1424 }
 0xa1b   :  { %4440 = vmatmul.mubr.msk.bf16.vlgmr.msra.gmra.mxu0 %vm326_vm1, %v1425_v49  ;;  %4448 = vmatmul.mubr.msk.bf16.vlgmr.msra.gmra.mxu1 %vm326_vm1, %v1425_v49 }
 0xa1c   :  { %4452 = vmatpush3.bf16.msra.mxu0 %v5515_v1  ;;  %4460 = vmatpush3.bf16.msra.mxu1 %v5521_v4 }
 0xa1d   :  { %4453 = vmatprep.subr.bf16.mxu0 %v5340_v0  ;;  %4455 = vmatprep.mubr.msk.bf16.mxu0 %vm5341_vm0, %v5340_v0 }
 0xa1e   :  { %4461 = vmatprep.subr.bf16.mxu1 %v5340_v0  ;;  %4463 = vmatprep.mubr.msk.bf16.mxu1 %vm5341_vm0, %v5340_v0 }
 0xa20   :  { %4454 = vmatpush3.bf16.msra.mxu0 %v5518_v2  ;;  %4462 = vmatpush3.bf16.msra.mxu1 %v5528_v6 }
 0xa21   :  { %4467 = vmatprep.subr.bf16.mxu0 %v5340_v0  ;;  %4475 = vmatprep.subr.bf16.mxu1 %v5340_v0 }
 0xa23   :  { %4456 = vmatmul.mubr.msk.bf16.vlgmr.msra.gmra.mxu0 %vm326_vm1, %v1534_v17  ;;  %4464 = vmatmul.mubr.msk.bf16.vlgmr.msra.gmra.mxu1 %vm326_vm1, %v1534_v17  ;;  %v1920_v17 = vld [vmem:[#allocation2 + $0x2] sm:$0x1] }
 0xa24   :  { %4468 = vmatpush3.bf16.msra.mxu0 %v5524_v5  ;;  %4476 = vmatpush3.bf16.msra.mxu1 %v5534_v8 }
 0xa25   :  { %4469 = vmatprep.subr.bf16.mxu0 %v5340_v0  ;;  %4477 = vmatprep.subr.bf16.mxu1 %v5340_v0 }
 0xa26   :  { %4471 = vmatprep.mubr.msk.bf16.mxu0 %vm5341_vm0, %v5340_v0  ;;  %4479 = vmatprep.mubr.msk.bf16.mxu1 %vm5341_vm0, %v5340_v0 }
 0xa28   :  { %4470 = vmatpush3.bf16.msra.mxu0 %v5530_v7  ;;  %4478 = vmatpush3.bf16.msra.mxu1 %v5542_v9 }
 0xa29   :  { %4483 = vmatprep.subr.bf16.mxu0 %v5340_v0  ;;  %4491 = vmatprep.subr.bf16.mxu1 %v5340_v0 }
 0xadb   :  { %v1463_v51 = vpop.f32.mrf.mxu0  ;;  %v1503_v53 = vpop.f32.mrf.mxu1 }
 0xadc   :  { %v1509_v54 = vadd.f32 %v1463_v51, %v1377_v50  ;;  %v1504_v3 = vadd.f32 %v5570_v33, %v1503_v53  ;;  %v5803_v53 = vld [vmem:[#allocation2 + $0x7] sm:$0x1] }
 0xadd   :  { %v4441_v55 = vpop.f32.mrf.mxu0  ;;  %v4449_v56 = vpop.f32.mrf.mxu1 }
 0xade   :  { %v3967_v57 = vmul.f32 -1.442695, %v1509_v54 }
 0xadf   :  { %v1466_v58 = vpop.f32.mrf.mxu0  ;;  %v1506_v59 = vpop.f32.mrf.mxu1 }
 0xae0   :  { %4926 = vpow2.f32 %v3967_v57 }
 0xae1   :  { %v4442_v60 = vpop.f32.mrf.mxu0  ;;  %v4450_v61 = vpop.f32.mrf.mxu1 }
 0xae3   :  { %v1572_v25 = vpop.f32.mrf.mxu0  ;;  %v1612_v26 = vpop.f32.mrf.mxu1 }
 0xae4   :  { %v1613_v50 = vadd.f32 %v5573_v35, %v1612_v26  ;;  %v5895_v26 = vld [vmem:[#allocation22] sm:$0xff]  }
 0xae5   :  { %v4457_v27 = vpop.f32.mrf.mxu0  ;;  %v4465_v29 = vpop.f32.mrf.mxu1 }
 0xae7   :  { %v1575_v30 = vpop.f32.mrf.mxu0  ;;  %v1615_v31 = vpop.f32.mrf.mxu1 }
 0xae9   :  { %v4458_v32 = vpop.f32.mrf.mxu0  ;;  %v4466_v34 = vpop.f32.mrf.mxu1 }
 0xaed   :  { %v4927_v62 = vpop.eup %4926 }
 0xaee   :  { %v1513_v63 = vadd.f32 1.0, %v4927_v62 }
 0xaf0   :  { %4928 = vrcp.f32 %v1513_v63  ;;  %v5832_v63 = vld [vmem:[#allocation17 + $0x8] sm:$0xff]  }
 0xafd   :  { %v4929_v11 = vpop.eup %4928 }
 0xafe   :  { %v1516_v15 = vmul.f32 %v4929_v11, %v1504_v3  ;;  %v1519_v19 = vsub.f32 1.0, %v4929_v11  ;;  %v1525_v21 = vmul.f32 %v4929_v11, %v5743_v38  ;;  %v5834_v3 = vld [vmem:[#allocation16 + $0x8] sm:$0xff]  }
 0xb00   :  { %v1517_v16 = vadd.f32 %v1516_v15, %v1417_v14  ;;  %v5840_v14 = vld [vmem:[#allocation17] sm:$0xff]   ;;  %v5842_v15 = vld [vmem:[#allocation16] sm:$0xff]  }
 0xb02   :  { %4930 = vtanh.f32 %v1517_v16  ;;  %v1921_v16 = vld [vmem:[#allocation2 + $0x1] sm:$0x1] }
 0xb0f   :  { %v4931_v18 = vpop.eup %4930 }
 0xb10   :  { %1521 = vrot.lane.b32.xlu0 %v4931_v18, %s5343_s11  ;;  %v5852_v18 = vld [vmem:[#allocation19 + $0x8] sm:$0xff]  }
 0xb82   :  { %v1522_v20 = vpop.permute.xlu0 %1521 }
 0xb83   :  { %v1524_v22 = vmul.f32 %v1522_v20, %v1519_v19  ;;  %v5857_v19 = vld [vmem:[%s6300_s9 + $0x8] sm:$0xff]  }
 0xb84   :  { %v5865_v20 = vld [vmem:[#allocation19] sm:$0xff]  }
 0xb85   :  { %v5781_v23 = vadd.f32 %v1525_v21, %v1524_v22  ;;  %v5870_v21 = vld [vmem:[%s6300_s9] sm:$0xff]  }
 0xb86   :  { %v5880_v22 = vld [vmem:[#allocation20 + $0x8] sm:$0xff]  }
 0xb87   :  { %v1618_v24 = vpack.c.bf16 %v5781_v23, %v5781_v23 }
 0xb89   :  { %1620 = vrot.lane.b32.xlu1 %v1618_v24, %s5344_s13  ;;  %v5884_v24 = vld [vmem:[#allocation22 + $0x8] sm:$0xff]  }
 0xbfb   :  { %v1621_v36 = vpop.permute.xlu1 %1620 }
 0xbfc   :  { %4472 = vmatmul.mubr.msk.bf16.vlgmr.msra.gmra.mxu0 %vm326_vm1, %v1621_v36  ;;  %4480 = vmatmul.mubr.msk.bf16.vlgmr.msra.gmra.mxu1 %vm326_vm1, %v1621_v36 }
 0xbfd   :  { %4484 = vmatpush3.bf16.msra.mxu0 %v5515_v1  ;;  %4492 = vmatpush3.bf16.msra.mxu1 %v5521_v4  ;;  %v1573_v1 = vadd.f32 %v5567_v13, %v1572_v25  ;;  %v5889_v25 = vld [vmem:[#allocation20] sm:$0xff]  }
 0xbfe   :  { %4485 = vmatprep.subr.bf16.mxu0 %v5340_v0  ;;  %4487 = vmatprep.mubr.msk.bf16.mxu0 %vm5341_vm0, %v5340_v0 }
 0xbff   :  { %4493 = vmatprep.subr.bf16.mxu1 %v5340_v0  ;;  %4495 = vmatprep.mubr.msk.bf16.mxu1 %vm5341_vm0, %v5340_v0 }
 0xc01   :  { %4486 = vmatpush3.bf16.msra.mxu0 %v5518_v2  ;;  %4494 = vmatpush3.bf16.msra.mxu1 %v5528_v6 }
 0xc02   :  { %4499 = vmatprep.subr.bf16.mxu0 %v5340_v0  ;;  %4507 = vmatprep.subr.bf16.mxu1 %v5340_v0 }
 0xc04   :  { %4488 = vmatmul.mubr.msk.bf16.vlgmr.msra.gmra.mxu0 %vm326_vm1, %v5803_v53  ;;  %4496 = vmatmul.mubr.msk.bf16.vlgmr.msra.gmra.mxu1 %vm326_vm1, %v5803_v53 }
 0xc05   :  { %4500 = vmatpush3.bf16.msra.mxu0 %v5524_v5  ;;  %4508 = vmatpush3.bf16.msra.mxu1 %v5534_v8 }
 0xc06   :  { %4501 = vmatprep.subr.bf16.mxu0 %v5340_v0  ;;  %4509 = vmatprep.subr.bf16.mxu1 %v5340_v0 }
 0xc07   :  { %4503 = vmatprep.mubr.msk.bf16.mxu0 %vm5341_vm0, %v5340_v0  ;;  %4511 = vmatprep.mubr.msk.bf16.mxu1 %vm5341_vm0, %v5340_v0 }
 0xc09   :  { %4502 = vmatpush3.bf16.msra.mxu0 %v5530_v7  ;;  %4510 = vmatpush3.bf16.msra.mxu1 %v5542_v9 }
 0xc0a   :  { %4515 = vmatprep.subr.bf16.mxu0 %v5340_v0  ;;  %4523 = vmatprep.subr.bf16.mxu1 %v5340_v0 }
 0xcbc   :  { %v1659_v4 = vpop.f32.mrf.mxu0  ;;  %v1699_v37 = vpop.f32.mrf.mxu1 }
 0xcbd   :  { %v1705_v39 = vadd.f32 %v1659_v4, %v1573_v1  ;;  %v1700_v6 = vadd.f32 %v5570_v33, %v1699_v37 }
 0xcbe   :  { %v4473_v40 = vpop.f32.mrf.mxu0  ;;  %v4481_v41 = vpop.f32.mrf.mxu1 }
 0xcbf   :  { %v3972_v42 = vmul.f32 -1.442695, %v1705_v39 }
 0xcc0   :  { %v1662_v43 = vpop.f32.mrf.mxu0  ;;  %v1702_v44 = vpop.f32.mrf.mxu1 }
 0xcc1   :  { %4932 = vpow2.f32 %v3972_v42 }
 0xcc2   :  { %v4474_v45 = vpop.f32.mrf.mxu0  ;;  %v4482_v47 = vpop.f32.mrf.mxu1 }
 0xcc4   :  { %v5828_v7 = vpop.f32.mrf.mxu0  ;;  %v5830_v9 = vpop.f32.mrf.mxu1 }
 0xcc6   :  { %v4489_v57 = vpop.f32.mrf.mxu0  ;;  %v4497_v58 = vpop.f32.mrf.mxu1 }
 0xcc8   :  { %v1771_v59 = vpop.f32.mrf.mxu0  ;;  %v1811_v60 = vpop.f32.mrf.mxu1 }
 0xcca   :  { %v4490_v61 = vpop.f32.mrf.mxu0  ;;  %v4498_v62 = vpop.f32.mrf.mxu1 }
 0xcce   :  { %v4933_v2 = vpop.eup %4932 }
 0xccf   :  { %v1709_v48 = vadd.f32 1.0, %v4933_v2 }
 0xcd1   :  { %4934 = vrcp.f32 %v1709_v48 }
 0xcde   :  { %v4935_v49 = vpop.eup %4934 }
 0xcdf   :  { %v1712_v13 = vmul.f32 %v4935_v49, %v1700_v6  ;;  %v1715_v5 = vsub.f32 1.0, %v4935_v49  ;;  %v1721_v35 = vmul.f32 %v4935_v49, %v5781_v23 }
 0xce1   :  { %v1713_v51 = vadd.f32 %v1712_v13, %v1613_v50 }
 0xce3   :  { %4936 = vtanh.f32 %v1713_v51 }
 0xcf0   :  { %v4937_v33 = vpop.eup %4936 }
 0xcf1   :  { %1717 = vrot.lane.b32.xlu0 %v4937_v33, %s5343_s11 }
 0xd63   :  { %v1718_v8 = vpop.permute.xlu0 %1717 }
 0xd64   :  { %v1720_v54 = vmul.f32 %v1718_v8, %v1715_v5  ;;  %v5936_v8 = vld [vmem:[%s6305_s14] ss:$0 sm:$0xff] }
 0xd66   :  { %v5823_v55 = vadd.f32 %v1721_v35, %v1720_v54 }
 0xd68   :  { %v1814_v56 = vpack.c.bf16 %v5823_v55, %v5823_v55 }
 0xd6a   :  { %1816 = vrot.lane.b32.xlu1 %v1814_v56, %s5344_s13 }
 0xddc   :  { %v1817_v11 = vpop.permute.xlu1 %1816 }
 0xddd   :  { %4504 = vmatmul.mubr.msk.bf16.vlgmr.msra.gmra.mxu0 %vm326_vm1, %v1817_v11  ;;  %4512 = vmatmul.mubr.msk.bf16.vlgmr.msra.gmra.mxu1 %vm326_vm1, %v1817_v11 }
 0xdde   :  { %4516 = vmatpush3.bf16.msra.mxu0 %v5832_v63  ;;  %4524 = vmatpush3.bf16.msra.mxu1 %v5834_v3 }
 0xddf   :  { %4517 = vmatprep.subr.bf16.mxu0 %v5340_v0  ;;  %4525 = vmatprep.subr.bf16.mxu1 %v5340_v0 }
 0xde0   :  { %4519 = vmatprep.mubr.msk.bf16.mxu0 %vm5341_vm0, %v5340_v0  ;;  %4527 = vmatprep.mubr.msk.bf16.mxu1 %vm5341_vm0, %v5340_v0 }
 0xde2   :  { %4518 = vmatpush3.bf16.msra.mxu0 %v5840_v14  ;;  %4526 = vmatpush3.bf16.msra.mxu1 %v5842_v15 }
 0xde3   :  { %4531 = vmatprep.subr.bf16.mxu0 %v5340_v0  ;;  %4539 = vmatprep.subr.bf16.mxu1 %v5340_v0 }
 0xde5   :  { %4520 = vmatmul.mubr.msk.bf16.vlgmr.msra.gmra.mxu0 %vm326_vm1, %v1921_v16  ;;  %4528 = vmatmul.mubr.msk.bf16.vlgmr.msra.gmra.mxu1 %vm326_vm1, %v1920_v17 }
 0xde6   :  { %4532 = vmatpush3.bf16.msra.mxu0 %v5852_v18  ;;  %4540 = vmatpush3.bf16.msra.mxu1 %v5857_v19 }
 0xde7   :  { %4533 = vmatprep.subr.bf16.mxu0 %v5340_v0  ;;  %4541 = vmatprep.subr.bf16.mxu1 %v5340_v0 }
 0xde8   :  { %4535 = vmatprep.mubr.msk.bf16.mxu0 %vm5341_vm0, %v5340_v0  ;;  %4543 = vmatprep.mubr.msk.bf16.mxu1 %vm5341_vm0, %v5340_v0 }
 0xdea   :  { %4534 = vmatpush3.bf16.msra.mxu0 %v5865_v20  ;;  %4542 = vmatpush3.bf16.msra.mxu1 %v5870_v21 }
 0xdeb   :  { %4547 = vmatprep.subr.bf16.mxu0 %v5340_v0  ;;  %4555 = vmatprep.subr.bf16.mxu1 %v5340_v0 }
 0xded   :  { %4536 = vmatmul.mubr.msk.bf16.vlgmr.msra.gmra.mxu0 %vm326_vm1, %v1921_v16  ;;  %4544 = vmatmul.mubr.msk.bf16.vlgmr.msra.gmra.mxu1 %vm326_vm1, %v1920_v17 }
 0xdee   :  { %4548 = vmatpush3.bf16.msra.mxu0 %v5880_v22  ;;  %4551 = vmatprep.mubr.msk.bf16.mxu0 %vm5341_vm0, %v5340_v0 }
 0xdef   :  { %4549 = vmatprep.subr.bf16.mxu0 %v5340_v0  ;;  %4556 = vmatpush3.bf16.msra.mxu1 %v5884_v24 }
 0xdf0   :  { %4557 = vmatprep.subr.bf16.mxu1 %v5340_v0  ;;  %4559 = vmatprep.mubr.msk.bf16.mxu1 %vm5341_vm0, %v5340_v0 }
 0xdf2   :  { %4550 = vmatpush3.bf16.msra.mxu0 %v5889_v25 }
 0xdf3   :  { %4558 = vmatpush3.bf16.msra.mxu1 %v5895_v26  ;;  %4563 = vmatprep.subr.bf16.mxu0 %v5340_v0 }
 0xdf4   :  { %4571 = vmatprep.subr.bf16.mxu1 %v5340_v0 }
 0xdf5   :  { %4552 = vmatmul.mubr.bf16.vlgmr.msra.gmra.mxu0 %v5342_v10 }
 0xdf6   :  { %4560 = vmatmul.mubr.bf16.vlgmr.msra.gmra.mxu1 %v5342_v10  ;;  %4564 = vmatpush3.bf16.msra.mxu0 %v5832_v63  ;;  %v4986_v10 = vld [vmem:[#allocation11] ss:$0 sm:$0xff] }
 0xdf7   :  { %4565 = vmatprep.subr.bf16.mxu0 %v5340_v0  ;;  %4572 = vmatpush3.bf16.msra.mxu1 %v5834_v3  ;;  %v1769_v27 = vadd.f32 %v4986_v10, %v5828_v7 }
 0xdf8   :  { %4567 = vmatprep.mubr.msk.bf16.mxu0 %vm5341_vm0, %v5340_v0  ;;  %4573 = vmatprep.subr.bf16.mxu1 %v5340_v0 }
 0xdf9   :  { %4575 = vmatprep.mubr.msk.bf16.mxu1 %vm5341_vm0, %v5340_v0 }
 0xdfa   :  { %4566 = vmatpush3.bf16.msra.mxu0 %v5840_v14 }
 0xdfb   :  { %4579 = vmatprep.subr.bf16.mxu0 %v5340_v0  ;;  %4574 = vmatpush3.bf16.msra.mxu1 %v5842_v15 }
 0xdfc   :  { %4587 = vmatprep.subr.bf16.mxu1 %v5340_v0 }
 0xdfd   :  { %4568 = vmatmul.mubr.msk.bf16.vlgmr.msra.gmra.mxu0 %vm326_vm1, %v1920_v17 }
 0xdfe   :  { %4580 = vmatpush3.bf16.msra.mxu0 %v5852_v18  ;;  %4583 = vmatprep.mubr.msk.bf16.mxu0 %vm5341_vm0, %v5340_v0 }
 0xdff   :  { %4581 = vmatprep.subr.bf16.mxu0 %v5340_v0 }
 0xe02   :  { %4582 = vmatpush3.bf16.msra.mxu0 %v5865_v20 }
 0xe03   :  { %4595 = vmatprep.subr.bf16.mxu0 %v5340_v0 }
 0xe05   :  { %4584 = vmatmul.mubr.msk.bf16.vlgmr.msra.gmra.mxu0 %vm326_vm1, %v1920_v17 }
 0xe06   :  { %4596 = vmatpush3.bf16.msra.mxu0 %v5880_v22  ;;  %4599 = vmatprep.mubr.msk.bf16.mxu0 %vm5341_vm0, %v5340_v0 }
 0xe07   :  { %4597 = vmatprep.subr.bf16.mxu0 %v5340_v0 }
 0xe0a   :  { %4598 = vmatpush3.bf16.msra.mxu0 %v5889_v25 }
 0xe0b   :  { %4611 = vmatprep.subr.bf16.mxu0 %v5340_v0 }
 0xe9d   :  { %v1855_v29 = vpop.f32.mrf.mxu0  ;;  %v1895_v30 = vpop.f32.mrf.mxu1 }
 0xe9e   :  { %v1901_v31 = vadd.f32 %v1855_v29, %v1769_v27  ;;  %v4987_v27 = vld [vmem:[#allocation14] ss:$0 sm:$0xff] }
 0xe9f   :  { %v4505_v32 = vpop.f32.mrf.mxu0  ;;  %v4513_v34 = vpop.f32.mrf.mxu1  ;;  %v1896_v29 = vadd.f32 %v4987_v27, %v1895_v30 }
 0xea0   :  { %v3977_v36 = vmul.f32 -1.442695, %v1901_v31  ;;  %v4988_v32 = vld [vmem:[#allocation13] ss:$0 sm:$0xff] }
 0xea1   :  { %v1858_v1 = vpop.f32.mrf.mxu0  ;;  %v1898_v4 = vpop.f32.mrf.mxu1  ;;  %v1809_v34 = vadd.f32 %v4988_v32, %v5830_v9 }
 0xea2   :  { %4938 = vpow2.f32 %v3977_v36 }
 0xea3   :  { %v4506_v37 = vpop.f32.mrf.mxu0  ;;  %v4514_v39 = vpop.f32.mrf.mxu1 }
 0xea4   :  { %v5948_v39 = vld [vmem:[%s6307_s16] ss:$0 sm:$0xff] }
 0xea5   :  { %v1971_v40 = vpop.f32.mrf.mxu0  ;;  %v2026_v41 = vpop.f32.mrf.mxu1 }
 0xea6   :  { %v2027_v33 = vadd.f32 %v2026_v41, %v1971_v40  ;;  %v5954_v41 = vld [vmem:[%s6306_s15] ss:$0 sm:$0xff] }
 0xea7   :  { %v4521_v42 = vpop.f32.mrf.mxu0  ;;  %v4529_v43 = vpop.f32.mrf.mxu1 }
 0xea8   :  { %v2032_v7 = vadd.f32 %v5936_v8, %v2027_v33 }
 0xea9   :  { %v1974_v44 = vpop.f32.mrf.mxu0  ;;  %v2029_v45 = vpop.f32.mrf.mxu1 }
 0xeaa   :  { %v2260_v45 = vld [vmem:[#allocation2 + $0x3] sm:$0x1] }
 0xeab   :  { %v4522_v47 = vpop.f32.mrf.mxu0  ;;  %v4530_v2 = vpop.f32.mrf.mxu1  ;;  %4576 = vmatmul.mubr.msk.bf16.vlgmr.msra.gmra.mxu1 %vm326_vm1, %v2260_v45 }
 0xeac   :  { %4588 = vmatpush3.bf16.msra.mxu1 %v5857_v19  ;;  %4591 = vmatprep.mubr.msk.bf16.mxu1 %vm5341_vm0, %v5340_v0 }
 0xead   :  { %v2079_v48 = vpop.f32.mrf.mxu0  ;;  %v2131_v6 = vpop.f32.mrf.mxu1  ;;  %4589 = vmatprep.subr.bf16.mxu1 %v5340_v0 }
 0xeae   :  { %v2132_v40 = vadd.f32 %v2131_v6, %v2079_v48 }
 0xeaf   :  { %v4939_v49 = vpop.eup %4938  ;;  %v4537_v50 = vpop.f32.mrf.mxu0 }
 0xeb0   :  { %v4545_v13 = vpop.f32.mrf.mxu1  ;;  %v1905_v51 = vadd.f32 1.0, %v4939_v49  ;;  %v2137_v42 = vadd.f32 %v5954_v41, %v2132_v40  ;;  %4590 = vmatpush3.bf16.msra.mxu1 %v5870_v21 }
 0xeb1   :  { %v2082_v5 = vpop.f32.mrf.mxu0  ;;  %4603 = vmatprep.subr.bf16.mxu1 %v5340_v0 }
 0xeb2   :  { %v2134_v35 = vpop.f32.mrf.mxu1  ;;  %4940 = vrcp.f32 %v1905_v51 }
 0xeb3   :  { %v4538_v54 = vpop.f32.mrf.mxu0  ;;  %4592 = vmatmul.mubr.msk.bf16.vlgmr.msra.gmra.mxu1 %vm326_vm1, %v2260_v45 }
 0xeb4   :  { %v4546_v56 = vpop.f32.mrf.mxu1  ;;  %4604 = vmatpush3.bf16.msra.mxu1 %v5884_v24  ;;  %4607 = vmatprep.mubr.msk.bf16.mxu1 %vm5341_vm0, %v5340_v0 }
 0xeb5   :  { %v2184_v57 = vpop.f32.mrf.mxu0  ;;  %4605 = vmatprep.subr.bf16.mxu1 %v5340_v0 }
 0xeb6   :  { %v2242_v58 = vadd.f32 %v2184_v57, %v2032_v7  ;;  %v2236_v59 = vpop.f32.mrf.mxu1 }
 0xeb7   :  { %v4553_v60 = vpop.f32.mrf.mxu0  ;;  %v2237_v30 = vadd.f32 %v5948_v39, %v2236_v59 }
 0xeb8   :  { %v3994_v61 = vmul.f32 -1.442695, %v2242_v58  ;;  %v4561_v62 = vpop.f32.mrf.mxu1  ;;  %4606 = vmatpush3.bf16.msra.mxu1 %v5895_v26 }
 0xeb9   :  { %v2187_v11 = vpop.f32.mrf.mxu0  ;;  %4619 = vmatprep.subr.bf16.mxu1 %v5340_v0 }
 0xeba   :  { %4942 = vpow2.f32 %v3994_v61  ;;  %v2239_v16 = vpop.f32.mrf.mxu1 }
 0xebb   :  { %v4554_v17 = vpop.f32.mrf.mxu0 }
 0xebc   :  { %v4562_v10 = vpop.f32.mrf.mxu1 }
 0xebd   :  { %v2295_v2 = vpop.f32.mrf.mxu0 }
 0xebf   :  { %v5939_v31 = vpop.eup %4940  ;;  %v4569_v48 = vpop.f32.mrf.mxu0 }
 0xec0   :  { %v1908_v36 = vmul.f32 %v5939_v31, %v1896_v29 }
 0xec1   :  { %v2298_v6 = vpop.f32.mrf.mxu0 }
 0xec2   :  { %v5943_v1 = vadd.f32 %v1908_v36, %v1809_v34 }
 0xec3   :  { %v4570_v13 = vpop.f32.mrf.mxu0 }
 0xec4   :  { %v2531_v13 = vld [vmem:[#allocation2 + $0x4] sm:$0x1] }
 0xec5   :  { %v2379_v5 = vpop.f32.mrf.mxu0 }
 0xec7   :  { %v4943_v4 = vpop.eup %4942  ;;  %v4585_v54 = vpop.f32.mrf.mxu0 }
 0xec8   :  { %v2246_v37 = vadd.f32 1.0, %v4943_v4 }
 0xec9   :  { %v2382_v7 = vpop.f32.mrf.mxu0 }
 0xeca   :  { %4944 = vrcp.f32 %v2246_v37 }
 0xecb   :  { %v4586_v57 = vpop.f32.mrf.mxu0 }
 0xed7   :  { %v4945_v9 = vpop.eup %4944 }
 0xed8   :  { %v2249_v43 = vmul.f32 %v4945_v9, %v2237_v30  ;;  %v2252_v49 = vsub.f32 1.0, %v4945_v9  ;;  %v2258_v51 = vmul.f32 0.0, %v4945_v9 }
 0xeda   :  { %v2250_v44 = vadd.f32 %v2249_v43, %v2137_v42 }
 0xedc   :  { %4946 = vtanh.f32 %v2250_v44 }
 0xee9   :  { %v4947_v47 = vpop.eup %4946 }
 0xeea   :  { %2254 = vrot.lane.b32.xlu0 %v4947_v47, %s5343_s11 }
 0xf5c   :  { %v2255_v50 = vpop.permute.xlu0 %2254 }
 0xf5d   :  { %v2257_v33 = vmul.f32 %v2255_v50, %v2252_v49 }
 0xf5f   :  { %v5972_v35 = vadd.f32 %v2258_v51, %v2257_v33 }
 0xf61   :  { %v2426_v56 = vpack.c.bf16 %v5972_v35, %v5972_v35 }
 0xf63   :  { %2428 = vrot.lane.b32.xlu1 %v2426_v56, %s5344_s13 }
 0xf6b   :  { %v2338_v58 = vpop.f32.mrf.mxu1 }
 0xf6c   :  { %v2339_v27 = vadd.f32 %v2338_v58, %v2295_v2 }
 0xf6d   :  { %v4577_v59 = vpop.f32.mrf.mxu1 }
 0xf6e   :  { %v2344_v29 = vadd.f32 %v5936_v8, %v2339_v27 }
 0xf6f   :  { %v2341_v60 = vpop.f32.mrf.mxu1 }
 0xf71   :  { %v4578_v61 = vpop.f32.mrf.mxu1 }
 0xf73   :  { %v2419_v62 = vpop.f32.mrf.mxu1 }
 0xf74   :  { %v2420_v47 = vadd.f32 %v2419_v62, %v2379_v5 }
 0xf75   :  { %v4593_v11 = vpop.f32.mrf.mxu1 }
 0xf76   :  { %v2425_v6 = vadd.f32 %v5954_v41, %v2420_v47 }
 0xf77   :  { %v2422_v16 = vpop.f32.mrf.mxu1 }
 0xf79   :  { %v4594_v17 = vpop.f32.mrf.mxu1 }
 0xfd5   :  { %v2429_v10 = vpop.permute.xlu1 %2428 }
 0xfd6   :  { %4600 = vmatmul.mubr.msk.bf16.vlgmr.msra.gmra.mxu0 %vm326_vm1, %v2429_v10  ;;  %4608 = vmatmul.mubr.msk.bf16.vlgmr.msra.gmra.mxu1 %vm326_vm1, %v2429_v10 }
 0xfd7   :  { %4612 = vmatpush3.bf16.msra.mxu0 %v5832_v63  ;;  %4620 = vmatpush3.bf16.msra.mxu1 %v5834_v3 }
 0xfd8   :  { %4613 = vmatprep.subr.bf16.mxu0 %v5340_v0  ;;  %4615 = vmatprep.mubr.msk.bf16.mxu0 %vm5341_vm0, %v5340_v0 }
 0xfd9   :  { %4621 = vmatprep.subr.bf16.mxu1 %v5340_v0  ;;  %4623 = vmatprep.mubr.msk.bf16.mxu1 %vm5341_vm0, %v5340_v0 }
 0xfdb   :  { %4614 = vmatpush3.bf16.msra.mxu0 %v5840_v14  ;;  %4622 = vmatpush3.bf16.msra.mxu1 %v5842_v15 }
 0xfdc   :  { %4627 = vmatprep.subr.bf16.mxu0 %v5340_v0  ;;  %4635 = vmatprep.subr.bf16.mxu1 %v5340_v0 }
 0xfde   :  { %4616 = vmatmul.mubr.msk.bf16.vlgmr.msra.gmra.mxu0 %vm326_vm1, %v2260_v45  ;;  %4624 = vmatmul.mubr.msk.bf16.vlgmr.msra.gmra.mxu1 %vm326_vm1, %v2531_v13 }
 0xfdf   :  { %4628 = vmatpush3.bf16.msra.mxu0 %v5852_v18  ;;  %4631 = vmatprep.mubr.msk.bf16.mxu0 %vm5341_vm0, %v5340_v0 }
 0xfe0   :  { %4629 = vmatprep.subr.bf16.mxu0 %v5340_v0  ;;  %4636 = vmatpush3.bf16.msra.mxu1 %v5857_v19 }
 0xfe1   :  { %4639 = vmatprep.mubr.msk.bf16.mxu1 %vm5341_vm0, %v5340_v0  ;;  %4637 = vmatprep.subr.bf16.mxu1 %v5340_v0 }
 0xfe3   :  { %4630 = vmatpush3.bf16.msra.mxu0 %v5865_v20 }
 0xfe4   :  { %4643 = vmatprep.subr.bf16.mxu0 %v5340_v0  ;;  %4638 = vmatpush3.bf16.msra.mxu1 %v5870_v21 }
 0xfe5   :  { %4651 = vmatprep.subr.bf16.mxu1 %v5340_v0 }
 0xfe6   :  { %4632 = vmatmul.mubr.msk.bf16.vlgmr.msra.gmra.mxu0 %vm326_vm1, %v2260_v45 }
 0xfe7   :  { %4644 = vmatpush3.bf16.msra.mxu0 %v5880_v22  ;;  %4647 = vmatprep.mubr.msk.bf16.mxu0 %vm5341_vm0, %v5340_v0 }
 0xfe8   :  { %4645 = vmatprep.subr.bf16.mxu0 %v5340_v0  ;;  %4640 = vmatmul.mubr.msk.bf16.vlgmr.msra.gmra.mxu1 %vm326_vm1, %v2531_v13 }
 0xfe9   :  { %4652 = vmatpush3.bf16.msra.mxu1 %v5884_v24  ;;  %4655 = vmatprep.mubr.msk.bf16.mxu1 %vm5341_vm0, %v5340_v0 }
 0xfea   :  { %4653 = vmatprep.subr.bf16.mxu1 %v5340_v0 }
 0xfeb   :  { %4646 = vmatpush3.bf16.msra.mxu0 %v5889_v25 }
 0xfec   :  { %4659 = vmatprep.subr.bf16.mxu0 %v5340_v0 }
 0xfed   :  { %4654 = vmatpush3.bf16.msra.mxu1 %v5895_v26 }
 0xfee   :  { %4667 = vmatprep.subr.bf16.mxu1 %v5340_v0 }
0x1096   :  { %v2467_v32 = vpop.f32.mrf.mxu0  ;;  %v2507_v34 = vpop.f32.mrf.mxu1 }
0x1097   :  { %v2513_v36 = vadd.f32 %v2467_v32, %v2344_v29  ;;  %v2508_v48 = vadd.f32 %v5948_v39, %v2507_v34 }
0x1098   :  { %v4601_v4 = vpop.f32.mrf.mxu0  ;;  %v4609_v37 = vpop.f32.mrf.mxu1 }
0x1099   :  { %v4001_v40 = vmul.f32 -1.442695, %v2513_v36 }
0x109a   :  { %v2470_v30 = vpop.f32.mrf.mxu0  ;;  %v2510_v9 = vpop.f32.mrf.mxu1 }
0x109b   :  { %4948 = vpow2.f32 %v4001_v40 }
0x109c   :  { %v4602_v42 = vpop.f32.mrf.mxu0  ;;  %v4610_v43 = vpop.f32.mrf.mxu1 }
0x109e   :  { %v2566_v33 = vpop.f32.mrf.mxu0  ;;  %v2609_v10 = vpop.f32.mrf.mxu1 }
0x109f   :  { %v2610_v40 = vadd.f32 %v2609_v10, %v2566_v33 }
0x10a0   :  { %v4617_v5 = vpop.f32.mrf.mxu0  ;;  %v4625_v27 = vpop.f32.mrf.mxu1 }
0x10a1   :  { %v2615_v30 = vadd.f32 %v5936_v8, %v2610_v40 }
0x10a2   :  { %v2569_v54 = vpop.f32.mrf.mxu0  ;;  %v2612_v29 = vpop.f32.mrf.mxu1 }
0x10a4   :  { %v4618_v57 = vpop.f32.mrf.mxu0  ;;  %v4626_v32 = vpop.f32.mrf.mxu1 }
0x10a5   :  { %v2802_v57 = vld [vmem:[#allocation2 + $0x5] sm:$0x1] }
0x10a6   :  { %v2650_v60 = vpop.f32.mrf.mxu0 }
0x10a8   :  { %v4949_v44 = vpop.eup %4948  ;;  %v4633_v62 = vpop.f32.mrf.mxu0 }
0x10a9   :  { %v2517_v45 = vadd.f32 1.0, %v4949_v44  ;;  %v2690_v34 = vpop.f32.mrf.mxu1 }
0x10aa   :  { %v2653_v16 = vpop.f32.mrf.mxu0 }
0x10ab   :  { %4950 = vrcp.f32 %v2517_v45  ;;  %v4641_v36 = vpop.f32.mrf.mxu1 }
0x10ac   :  { %v4634_v17 = vpop.f32.mrf.mxu0 }
0x10ad   :  { %v2693_v4 = vpop.f32.mrf.mxu1 }
0x10b8   :  { %v4951_v2 = vpop.eup %4950 }
0x10b9   :  { %v2520_v49 = vmul.f32 %v4951_v2, %v2508_v48  ;;  %v2523_v56 = vsub.f32 1.0, %v4951_v2  ;;  %v2529_v58 = vmul.f32 %v4951_v2, %v5972_v35  ;;  %v4642_v35 = vpop.f32.mrf.mxu1 }
0x10bb   :  { %v2521_v50 = vadd.f32 %v2520_v49, %v2425_v6 }
0x10bd   :  { %4952 = vtanh.f32 %v2521_v50 }
0x10ca   :  { %v4953_v51 = vpop.eup %4952 }
0x10cb   :  { %2525 = vrot.lane.b32.xlu0 %v4953_v51, %s5343_s11  ;;  %v2691_v51 = vadd.f32 %v2690_v34, %v2650_v60 }
0x10cd   :  { %v2696_v54 = vadd.f32 %v5954_v41, %v2691_v51 }
0x113d   :  { %v2526_v7 = vpop.permute.xlu0 %2525 }
0x113e   :  { %v2528_v59 = vmul.f32 %v2526_v7, %v2523_v56 }
0x1140   :  { %v6024_v61 = vadd.f32 %v2529_v58, %v2528_v59 }
0x1142   :  { %v2697_v11 = vpack.c.bf16 %v6024_v61, %v6024_v61 }
0x1144   :  { %2699 = vrot.lane.b32.xlu1 %v2697_v11, %s5344_s13 }
0x11b6   :  { %v2700_v37 = vpop.permute.xlu1 %2699 }
0x11b7   :  { %4648 = vmatmul.mubr.msk.bf16.vlgmr.msra.gmra.mxu0 %vm326_vm1, %v2700_v37  ;;  %4656 = vmatmul.mubr.msk.bf16.vlgmr.msra.gmra.mxu1 %vm326_vm1, %v2700_v37 }
0x11b8   :  { %4660 = vmatpush3.bf16.msra.mxu0 %v5832_v63  ;;  %4668 = vmatpush3.bf16.msra.mxu1 %v5834_v3 }
0x11b9   :  { %4661 = vmatprep.subr.bf16.mxu0 %v5340_v0  ;;  %4663 = vmatprep.mubr.msk.bf16.mxu0 %vm5341_vm0, %v5340_v0 }
0x11ba   :  { %4669 = vmatprep.subr.bf16.mxu1 %v5340_v0  ;;  %4671 = vmatprep.mubr.msk.bf16.mxu1 %vm5341_vm0, %v5340_v0 }
0x11bc   :  { %4662 = vmatpush3.bf16.msra.mxu0 %v5840_v14  ;;  %4670 = vmatpush3.bf16.msra.mxu1 %v5842_v15 }
0x11bd   :  { %4675 = vmatprep.subr.bf16.mxu0 %v5340_v0  ;;  %4683 = vmatprep.subr.bf16.mxu1 %v5340_v0 }
0x11bf   :  { %4664 = vmatmul.mubr.msk.bf16.vlgmr.msra.gmra.mxu0 %vm326_vm1, %v2531_v13  ;;  %4672 = vmatmul.mubr.msk.bf16.vlgmr.msra.gmra.mxu1 %vm326_vm1, %v2802_v57 }
0x11c0   :  { %4676 = vmatpush3.bf16.msra.mxu0 %v5852_v18  ;;  %4679 = vmatprep.mubr.msk.bf16.mxu0 %vm5341_vm0, %v5340_v0 }
0x11c1   :  { %4677 = vmatprep.subr.bf16.mxu0 %v5340_v0  ;;  %4684 = vmatpush3.bf16.msra.mxu1 %v5857_v19 }
0x11c2   :  { %4687 = vmatprep.mubr.msk.bf16.mxu1 %vm5341_vm0, %v5340_v0  ;;  %4685 = vmatprep.subr.bf16.mxu1 %v5340_v0 }
0x11c4   :  { %4678 = vmatpush3.bf16.msra.mxu0 %v5865_v20 }
0x11c5   :  { %4691 = vmatprep.subr.bf16.mxu0 %v5340_v0  ;;  %4686 = vmatpush3.bf16.msra.mxu1 %v5870_v21 }
0x11c6   :  { %4699 = vmatprep.subr.bf16.mxu1 %v5340_v0 }
0x11c7   :  { %4680 = vmatmul.mubr.msk.bf16.vlgmr.msra.gmra.mxu0 %vm326_vm1, %v2531_v13 }
0x11c8   :  { %4692 = vmatpush3.bf16.msra.mxu0 %v5880_v22  ;;  %4695 = vmatprep.mubr.msk.bf16.mxu0 %vm5341_vm0, %v5340_v0 }
0x11c9   :  { %4693 = vmatprep.subr.bf16.mxu0 %v5340_v0  ;;  %4688 = vmatmul.mubr.msk.bf16.vlgmr.msra.gmra.mxu1 %vm326_vm1, %v2802_v57 }
0x11ca   :  { %4700 = vmatpush3.bf16.msra.mxu1 %v5884_v24  ;;  %4703 = vmatprep.mubr.msk.bf16.mxu1 %vm5341_vm0, %v5340_v0 }
0x11cb   :  { %4701 = vmatprep.subr.bf16.mxu1 %v5340_v0 }
0x11cc   :  { %4694 = vmatpush3.bf16.msra.mxu0 %v5889_v25 }
0x11cd   :  { %4707 = vmatprep.subr.bf16.mxu0 %v5340_v0 }
0x11ce   :  { %4702 = vmatpush3.bf16.msra.mxu1 %v5895_v26 }
0x11cf   :  { %4715 = vmatprep.subr.bf16.mxu1 %v5340_v0 }
0x1277   :  { %v2738_v9 = vpop.f32.mrf.mxu0  ;;  %v2778_v42 = vpop.f32.mrf.mxu1 }
0x1278   :  { %v2784_v43 = vadd.f32 %v2738_v9, %v2615_v30  ;;  %v2779_v5 = vadd.f32 %v5948_v39, %v2778_v42 }
0x1279   :  { %v4649_v44 = vpop.f32.mrf.mxu0  ;;  %v4657_v45 = vpop.f32.mrf.mxu1 }
0x127a   :  { %v4008_v47 = vmul.f32 -1.442695, %v2784_v43 }
0x127b   :  { %v2741_v48 = vpop.f32.mrf.mxu0  ;;  %v2781_v2 = vpop.f32.mrf.mxu1 }
0x127c   :  { %4954 = vpow2.f32 %v4008_v47 }
0x127d   :  { %v4650_v6 = vpop.f32.mrf.mxu0  ;;  %v4658_v49 = vpop.f32.mrf.mxu1 }
0x127f   :  { %v2837_v59 = vpop.f32.mrf.mxu0  ;;  %v2880_v37 = vpop.f32.mrf.mxu1 }
0x1280   :  { %v2881_v47 = vadd.f32 %v2880_v37, %v2837_v59 }
0x1281   :  { %v4665_v60 = vpop.f32.mrf.mxu0  ;;  %v4673_v40 = vpop.f32.mrf.mxu1 }
0x1282   :  { %v2886_v48 = vadd.f32 %v5936_v8, %v2881_v47 }
0x1283   :  { %v2840_v62 = vpop.f32.mrf.mxu0  ;;  %v2883_v30 = vpop.f32.mrf.mxu1 }
0x1285   :  { %v4666_v17 = vpop.f32.mrf.mxu0  ;;  %v4674_v9 = vpop.f32.mrf.mxu1 }
0x1286   :  { %v6112_v17 = vld [vmem:[#allocation2 + $0x6] sm:$0x1] }
0x1287   :  { %v2921_v29 = vpop.f32.mrf.mxu0 }
0x1289   :  { %v4955_v50 = vpop.eup %4954  ;;  %v4681_v34 = vpop.f32.mrf.mxu0 }
0x128a   :  { %v2788_v13 = vadd.f32 1.0, %v4955_v50  ;;  %v2961_v42 = vpop.f32.mrf.mxu1 }
0x128b   :  { %v2924_v4 = vpop.f32.mrf.mxu0 }
0x128c   :  { %4956 = vrcp.f32 %v2788_v13  ;;  %v4689_v43 = vpop.f32.mrf.mxu1 }
0x128d   :  { %v4682_v35 = vpop.f32.mrf.mxu0 }
0x128e   :  { %v2964_v44 = vpop.f32.mrf.mxu1 }
0x1299   :  { %v4957_v33 = vpop.eup %4956 }
0x129a   :  { %v2791_v56 = vmul.f32 %v4957_v33, %v2779_v5  ;;  %v2794_v11 = vsub.f32 1.0, %v4957_v33  ;;  %v2800_v10 = vmul.f32 %v4957_v33, %v6024_v61  ;;  %v4690_v61 = vpop.f32.mrf.mxu1 }
0x129c   :  { %v2792_v7 = vadd.f32 %v2791_v56, %v2696_v54 }
0x129e   :  { %4958 = vtanh.f32 %v2792_v7 }
0x12ab   :  { %v4959_v58 = vpop.eup %4958 }
0x12ac   :  { %2796 = vrot.lane.b32.xlu0 %v4959_v58, %s5343_s11  ;;  %v2962_v58 = vadd.f32 %v2961_v42, %v2921_v29 }
0x12ae   :  { %v2967_v62 = vadd.f32 %v5954_v41, %v2962_v58 }
0x131e   :  { %v2797_v16 = vpop.permute.xlu0 %2796 }
0x131f   :  { %v2799_v27 = vmul.f32 %v2797_v16, %v2794_v11 }
0x1321   :  { %v6076_v32 = vadd.f32 %v2800_v10, %v2799_v27 }
0x1323   :  { %v2968_v36 = vpack.c.bf16 %v6076_v32, %v6076_v32 }
0x1325   :  { %2970 = vrot.lane.b32.xlu1 %v2968_v36, %s5344_s13 }
0x1397   :  { %v2971_v45 = vpop.permute.xlu1 %2970 }
0x1398   :  { %4696 = vmatmul.mubr.msk.bf16.vlgmr.msra.gmra.mxu0 %vm326_vm1, %v2971_v45  ;;  %4704 = vmatmul.mubr.msk.bf16.vlgmr.msra.gmra.mxu1 %vm326_vm1, %v2971_v45 }
0x1399   :  { %4708 = vmatpush3.bf16.msra.mxu0 %v5832_v63  ;;  %4716 = vmatpush3.bf16.msra.mxu1 %v5834_v3 }
0x139a   :  { %4709 = vmatprep.subr.bf16.mxu0 %v5340_v0  ;;  %4711 = vmatprep.mubr.msk.bf16.mxu0 %vm5341_vm0, %v5340_v0 }
0x139b   :  { %4717 = vmatprep.subr.bf16.mxu1 %v5340_v0  ;;  %4719 = vmatprep.mubr.msk.bf16.mxu1 %vm5341_vm0, %v5340_v0 }
0x139d   :  { %4710 = vmatpush3.bf16.msra.mxu0 %v5840_v14  ;;  %4718 = vmatpush3.bf16.msra.mxu1 %v5842_v15 }
0x139e   :  { %4723 = vmatprep.subr.bf16.mxu0 %v5340_v0  ;;  %4731 = vmatprep.subr.bf16.mxu1 %v5340_v0 }
0x13a0   :  { %4712 = vmatmul.mubr.msk.bf16.vlgmr.msra.gmra.mxu0 %vm326_vm1, %v2802_v57  ;;  %4720 = vmatmul.mubr.msk.bf16.vlgmr.msra.gmra.mxu1 %vm326_vm1, %v6112_v17 }
0x13a1   :  { %4724 = vmatpush3.bf16.msra.mxu0 %v5852_v18  ;;  %4727 = vmatprep.mubr.msk.bf16.mxu0 %vm5341_vm0, %v5340_v0 }
0x13a2   :  { %4725 = vmatprep.subr.bf16.mxu0 %v5340_v0  ;;  %4732 = vmatpush3.bf16.msra.mxu1 %v5857_v19 }
0x13a3   :  { %4735 = vmatprep.mubr.msk.bf16.mxu1 %vm5341_vm0, %v5340_v0  ;;  %4733 = vmatprep.subr.bf16.mxu1 %v5340_v0 }
0x13a5   :  { %4726 = vmatpush3.bf16.msra.mxu0 %v5865_v20 }
0x13a6   :  { %4739 = vmatprep.subr.bf16.mxu0 %v5340_v0  ;;  %4734 = vmatpush3.bf16.msra.mxu1 %v5870_v21 }
0x13a7   :  { %4747 = vmatprep.subr.bf16.mxu1 %v5340_v0 }
0x13a8   :  { %4728 = vmatmul.mubr.msk.bf16.vlgmr.msra.gmra.mxu0 %vm326_vm1, %v2802_v57 }
0x13a9   :  { %4740 = vmatpush3.bf16.msra.mxu0 %v5880_v22  ;;  %4743 = vmatprep.mubr.msk.bf16.mxu0 %vm5341_vm0, %v5340_v0 }
0x13aa   :  { %4741 = vmatprep.subr.bf16.mxu0 %v5340_v0  ;;  %4736 = vmatmul.mubr.msk.bf16.vlgmr.msra.gmra.mxu1 %vm326_vm1, %v6112_v17 }
0x13ab   :  { %4748 = vmatpush3.bf16.msra.mxu1 %v5884_v24  ;;  %4751 = vmatprep.mubr.msk.bf16.mxu1 %vm5341_vm0, %v5340_v0 }
0x13ac   :  { %4749 = vmatprep.subr.bf16.mxu1 %v5340_v0 }
0x13ad   :  { %4742 = vmatpush3.bf16.msra.mxu0 %v5889_v25 }
0x13ae   :  { %4755 = vmatprep.subr.bf16.mxu0 %v5340_v0 }
0x13af   :  { %4750 = vmatpush3.bf16.msra.mxu1 %v5895_v26 }
0x13b0   :  { %4763 = vmatprep.subr.bf16.mxu1 %v5340_v0 }
0x1458   :  { %v3009_v2 = vpop.f32.mrf.mxu0  ;;  %v3049_v6 = vpop.f32.mrf.mxu1 }
0x1459   :  { %v3055_v49 = vadd.f32 %v3009_v2, %v2886_v48  ;;  %v3050_v60 = vadd.f32 %v5948_v39, %v3049_v6 }
0x145a   :  { %v4697_v50 = vpop.f32.mrf.mxu0  ;;  %v4705_v13 = vpop.f32.mrf.mxu1 }
0x145b   :  { %v4015_v51 = vmul.f32 -1.442695, %v3055_v49 }
0x145c   :  { %v3012_v5 = vpop.f32.mrf.mxu0  ;;  %v3052_v33 = vpop.f32.mrf.mxu1 }
0x145d   :  { %4960 = vpow2.f32 %v4015_v51 }
0x145e   :  { %v4698_v54 = vpop.f32.mrf.mxu0  ;;  %v4706_v56 = vpop.f32.mrf.mxu1 }
0x1460   :  { %v3108_v27 = vpop.f32.mrf.mxu0  ;;  %v3151_v45 = vpop.f32.mrf.mxu1 }
0x1462   :  { %v4713_v29 = vpop.f32.mrf.mxu0  ;;  %v4721_v47 = vpop.f32.mrf.mxu1 }
0x1463   :  { %v1917_v29 = vmul.f32 %v5939_v31, %v5823_v55 }
0x1464   :  { %v3111_v34 = vpop.f32.mrf.mxu0  ;;  %v3154_v48 = vpop.f32.mrf.mxu1 }
0x1466   :  { %v4714_v35 = vpop.f32.mrf.mxu0  ;;  %v4722_v2 = vpop.f32.mrf.mxu1 }
0x1468   :  { %v6132_v30 = vpop.f32.mrf.mxu0 }
0x146a   :  { %v4961_v7 = vpop.eup %4960  ;;  %v4729_v42 = vpop.f32.mrf.mxu0 }
0x146b   :  { %v3059_v57 = vadd.f32 1.0, %v4961_v7  ;;  %v3232_v6 = vpop.f32.mrf.mxu1 }
0x146c   :  { %v3195_v44 = vpop.f32.mrf.mxu0  ;;  %v3233_v5 = vadd.f32 %v3232_v6, %v6132_v30 }
0x146d   :  { %4962 = vrcp.f32 %v3059_v57  ;;  %v4737_v49 = vpop.f32.mrf.mxu1 }
0x146e   :  { %v4730_v61 = vpop.f32.mrf.mxu0  ;;  %v3238_v56 = vadd.f32 %v5954_v41, %v3233_v5 }
0x147a   :  { %v4963_v59 = vpop.eup %4962 }
0x147b   :  { %v3062_v11 = vmul.f32 %v4963_v59, %v3050_v60  ;;  %v3065_v36 = vsub.f32 1.0, %v4963_v59  ;;  %v3071_v37 = vmul.f32 %v4963_v59, %v6076_v32  ;;  %v3235_v32 = vpop.f32.mrf.mxu1 }
0x147d   :  { %v3063_v16 = vadd.f32 %v3062_v11, %v2967_v62  ;;  %v4738_v50 = vpop.f32.mrf.mxu1 }
0x147f   :  { %4964 = vtanh.f32 %v3063_v16 }
0x148c   :  { %v4965_v10 = vpop.eup %4964 }
0x148d   :  { %3067 = vrot.lane.b32.xlu0 %v4965_v10, %s5343_s11  ;;  %v1911_v10 = vsub.f32 1.0, %v5939_v31 }
0x14ff   :  { %v3068_v4 = vpop.permute.xlu0 %3067 }
0x1500   :  { %v3070_v40 = vmul.f32 %v3068_v4, %v3065_v36 }
0x1502   :  { %v6134_v9 = vadd.f32 %v3071_v37, %v3070_v40 }
0x1504   :  { %v3239_v43 = vpack.c.bf16 %v6134_v9, %v6134_v9 }
0x1506   :  { %3241 = vrot.lane.b32.xlu1 %v3239_v43, %s5344_s13 }
0x1578   :  { %v3242_v13 = vpop.permute.xlu1 %3241 }
0x1579   :  { %4744 = vmatmul.mubr.msk.bf16.vlgmr.msra.gmra.mxu0 %vm326_vm1, %v3242_v13  ;;  %4752 = vmatmul.mubr.msk.bf16.vlgmr.msra.gmra.mxu1 %vm326_vm1, %v3242_v13 }
0x157a   :  { %4756 = vmatpush3.bf16.msra.mxu0 %v5832_v63  ;;  %4764 = vmatpush3.bf16.msra.mxu1 %v5834_v3 }
0x157b   :  { %4757 = vmatprep.subr.bf16.mxu0 %v5340_v0  ;;  %4759 = vmatprep.mubr.msk.bf16.mxu0 %vm5341_vm0, %v5340_v0 }
0x157c   :  { %4765 = vmatprep.subr.bf16.mxu1 %v5340_v0  ;;  %4767 = vmatprep.mubr.msk.bf16.mxu1 %vm5341_vm0, %v5340_v0 }
0x157e   :  { %4758 = vmatpush3.bf16.msra.mxu0 %v5840_v14  ;;  %4766 = vmatpush3.bf16.msra.mxu1 %v5842_v15 }
0x157f   :  { %4771 = vmatprep.subr.bf16.mxu0 %v5340_v0  ;;  %4779 = vmatprep.subr.bf16.mxu1 %v5340_v0 }
0x1581   :  { %4760 = vmatmul.mubr.msk.bf16.vlgmr.msra.gmra.mxu0 %vm326_vm1, %v6112_v17  ;;  %4768 = vmatmul.mubr.msk.bf16.vlgmr.msra.gmra.mxu1 %vm326_vm1, %v5803_v53 }
0x1582   :  { %4772 = vmatpush3.bf16.msra.mxu0 %v5852_v18  ;;  %4780 = vmatpush3.bf16.msra.mxu1 %v5857_v19 }
0x1583   :  { %4773 = vmatprep.subr.bf16.mxu0 %v5340_v0  ;;  %4775 = vmatprep.mubr.msk.bf16.mxu0 %vm5341_vm0, %v5340_v0 }
0x1584   :  { %4781 = vmatprep.subr.bf16.mxu1 %v5340_v0  ;;  %4783 = vmatprep.mubr.msk.bf16.mxu1 %vm5341_vm0, %v5340_v0 }
0x1586   :  { %4774 = vmatpush3.bf16.msra.mxu0 %v5865_v20  ;;  %4782 = vmatpush3.bf16.msra.mxu1 %v5870_v21 }
0x1587   :  { %4787 = vmatprep.subr.bf16.mxu0 %v5340_v0  ;;  %4795 = vmatprep.subr.bf16.mxu1 %v5340_v0 }
0x1589   :  { %4776 = vmatmul.mubr.msk.bf16.vlgmr.msra.gmra.mxu0 %vm326_vm1, %v6112_v17  ;;  %4784 = vmatmul.mubr.msk.bf16.vlgmr.msra.gmra.mxu1 %vm326_vm1, %v5803_v53  ;;  %v3152_v53 = vadd.f32 %v3151_v45, %v3108_v27 }
0x158a   :  { %4788 = vmatpush3.bf16.msra.mxu0 %v5880_v22  ;;  %4796 = vmatpush3.bf16.msra.mxu1 %v5884_v24 }
0x158b   :  { %4789 = vmatprep.subr.bf16.mxu0 %v5340_v0  ;;  %4797 = vmatprep.subr.bf16.mxu1 %v5340_v0  ;;  %v3157_v63 = vadd.f32 %v5936_v8, %v3152_v53  ;;  %v4989_v53 = vld [vmem:[#allocation17 + $0x8] sm:$0xff]  }
0x158c   :  { %4791 = vmatprep.mubr.msk.bf16.mxu0 %vm5341_vm0, %v5340_v0  ;;  %4799 = vmatprep.mubr.msk.bf16.mxu1 %vm5341_vm0, %v5340_v0 }
0x158e   :  { %4790 = vmatpush3.bf16.msra.mxu0 %v5889_v25  ;;  %4798 = vmatpush3.bf16.msra.mxu1 %v5895_v26 }
0x158f   :  { %4803 = vmatprep.subr.bf16.mxu0 %v5340_v0  ;;  %4811 = vmatprep.subr.bf16.mxu1 %v5340_v0 }
0x1639   :  { %v3280_v3 = vpop.f32.mrf.mxu0  ;;  %v3320_v14 = vpop.f32.mrf.mxu1 }
0x163a   :  { %v3326_v15 = vadd.f32 %v3280_v3, %v3157_v63  ;;  %v3321_v33 = vadd.f32 %v5948_v39, %v3320_v14  ;;  %v4990_v63 = vld [vmem:[#allocation16 + $0x8] sm:$0xff]   ;;  %v4991_v3 = vld [vmem:[#allocation17] sm:$0xff]   ;;  %v4992_v14 = vld [vmem:[#allocation16] sm:$0xff]  }
0x163b   :  { %v4745_v18 = vpop.f32.mrf.mxu0  ;;  %v4753_v19 = vpop.f32.mrf.mxu1 }
0x163c   :  { %v4022_v20 = vmul.f32 -1.442695, %v3326_v15  ;;  %v4993_v18 = vld [vmem:[#allocation2 + $0x7] sm:$0x1]  ;;  %v4994_v19 = vld [vmem:[#allocation19 + $0x8] sm:$0xff]  }
0x163d   :  { %v3283_v21 = vpop.f32.mrf.mxu0  ;;  %v3323_v22 = vpop.f32.mrf.mxu1 }
0x163e   :  { %4966 = vpow2.f32 %v4022_v20  ;;  %v4995_v20 = vld [vmem:[%s6300_s9 + $0x8] sm:$0xff]   ;;  %v4997_v22 = vld [vmem:[%s6300_s9] sm:$0xff]  }
0x163f   :  { %v4746_v24 = vpop.f32.mrf.mxu0  ;;  %v4754_v25 = vpop.f32.mrf.mxu1  ;;  %v4996_v21 = vld [vmem:[#allocation19] sm:$0xff]  }
0x1640   :  { %v4998_v24 = vld [vmem:[#allocation20 + $0x8] sm:$0xff]   ;;  %v4999_v25 = vld [vmem:[#allocation22 + $0x8] sm:$0xff]  }
0x1641   :  { %v3378_v35 = vpop.f32.mrf.mxu0  ;;  %v3418_v37 = vpop.f32.mrf.mxu1 }
0x1642   :  { %v6202_v40 = vadd.f32 %v3418_v37, %v3378_v35 }
0x1643   :  { %v4761_v30 = vpop.f32.mrf.mxu0 }
0x1644   :  { %v3424_v5 = vadd.f32 %v5936_v8, %v6202_v40 }
0x1645   :  { %v3381_v42 = vpop.f32.mrf.mxu0 }
0x1647   :  { %v4762_v44 = vpop.f32.mrf.mxu0 }
0x1649   :  { %v3459_v61 = vpop.f32.mrf.mxu0 }
0x164b   :  { %v4967_v51 = vpop.eup %4966  ;;  %v4777_v48 = vpop.f32.mrf.mxu0 }
0x164c   :  { %v3330_v26 = vadd.f32 1.0, %v4967_v51  ;;  %v5000_v51 = vld [vmem:[#allocation20] sm:$0xff]  }
0x164d   :  { %v3462_v6 = vpop.f32.mrf.mxu0 }
0x164e   :  { %4968 = vrcp.f32 %v3330_v26  ;;  %v5001_v26 = vld [vmem:[#allocation22] sm:$0xff]  }
0x164f   :  { %v4778_v32 = vpop.f32.mrf.mxu0 }
0x165b   :  { %v4969_v54 = vpop.eup %4968 }
0x165c   :  { %v3333_v7 = vmul.f32 %v4969_v54, %v3321_v33  ;;  %v3336_v59 = vsub.f32 1.0, %v4969_v54  ;;  %v3342_v11 = vmul.f32 %v4969_v54, %v6134_v9  ;;  %v4769_v9 = vpop.f32.mrf.mxu1 }
0x165e   :  { %v3334_v57 = vadd.f32 %v3333_v7, %v3238_v56  ;;  %v3421_v43 = vpop.f32.mrf.mxu1 }
0x1660   :  { %4970 = vtanh.f32 %v3334_v57  ;;  %v4770_v31 = vpop.f32.mrf.mxu1 }
0x1661   :  { %4972 = vtanh.f32 %v5943_v1 }
0x1662   :  { %v3499_v45 = vpop.f32.mrf.mxu1 }
0x1663   :  { %v6204_v47 = vadd.f32 %v3499_v45, %v3459_v61 }
0x1664   :  { %v4785_v2 = vpop.f32.mrf.mxu1 }
0x1665   :  { %v3505_v2 = vadd.f32 %v5954_v41, %v6204_v47 }
0x1666   :  { %v3502_v49 = vpop.f32.mrf.mxu1 }
0x1668   :  { %v4786_v50 = vpop.f32.mrf.mxu1 }
0x166d   :  { %v4971_v58 = vpop.eup %4970 }
0x166e   :  { %3338 = vrot.lane.b32.xlu0 %v4971_v58, %s5343_s11  ;;  %v4973_v60 = vpop.eup %4972 }
0x1672   :  { %1913 = vrot.lane.b32.xlu0 %v4973_v60, %s5343_s11 }
0x16e0   :  { %v3339_v62 = vpop.permute.xlu0 %3338 }
0x16e1   :  { %v3341_v16 = vmul.f32 %v3339_v62, %v3336_v59 }
0x16e3   :  { %v6193_v17 = vadd.f32 %v3342_v11, %v3341_v16 }
0x16e4   :  { %v1914_v27 = vpop.permute.xlu0 %1913 }
0x16e5   :  { %v1916_v1 = vmul.f32 %v1914_v27, %v1911_v10  ;;  %v3506_v34 = vpack.c.bf16 %v6193_v17, %v6193_v17 }
0x16e7   :  { %v1918_v36 = vadd.f32 %v1917_v29, %v1916_v1  ;;  %3508 = vrot.lane.b32.xlu1 %v3506_v34, %s5344_s13 }
0x16e9   :  { %v1919_v4 = vpack.c.bf16 %v1918_v36, %v1918_v36 }
0x16eb   :  { %3652 = vrot.lane.b32.xlu0 %v1919_v4, %s5344_s13 }
0x1759   :  { %v3509_v13 = vpop.permute.xlu1 %3508 }
0x175a   :  { %4792 = vmatmul.mubr.msk.bf16.vlgmr.msra.gmra.mxu0 %vm326_vm1, %v3509_v13  ;;  %4800 = vmatmul.mubr.msk.bf16.vlgmr.msra.gmra.mxu1 %vm326_vm1, %v3509_v13 }
0x175b   :  { %4804 = vmatpush3.bf16.msra.mxu0 %v4989_v53  ;;  %4812 = vmatpush3.bf16.msra.mxu1 %v4990_v63 }
0x175c   :  { %4805 = vmatprep.subr.bf16.mxu0 %v5340_v0  ;;  %4813 = vmatprep.subr.bf16.mxu1 %v5340_v0 }
0x175d   :  { %4807 = vmatprep.mubr.msk.bf16.mxu0 %vm5341_vm0, %v5340_v0  ;;  %4815 = vmatprep.mubr.msk.bf16.mxu1 %vm5341_vm0, %v5340_v0  ;;  %v3653_v15 = vpop.permute.xlu0 %3652 }
0x175f   :  { %4806 = vmatpush3.bf16.msra.mxu0 %v4991_v3  ;;  %4814 = vmatpush3.bf16.msra.mxu1 %v4992_v14 }
0x1760   :  { %4819 = vmatprep.subr.bf16.mxu0 %v5340_v0  ;;  %4827 = vmatprep.subr.bf16.mxu1 %v5340_v0 }
0x1762   :  { %4808 = vmatmul.mubr.msk.bf16.vlgmr.msra.gmra.mxu0 %vm326_vm1, %v4993_v18  ;;  %4816 = vmatmul.mubr.msk.bf16.vlgmr.msra.gmra.mxu1 %vm326_vm1, %v3653_v15 }
0x1763   :  { %4820 = vmatpush3.bf16.msra.mxu0 %v4994_v19  ;;  %4828 = vmatpush3.bf16.msra.mxu1 %v4995_v20 }
0x1764   :  { %4821 = vmatprep.subr.bf16.mxu0 %v5340_v0  ;;  %4829 = vmatprep.subr.bf16.mxu1 %v5340_v0 }
0x1765   :  { %4823 = vmatprep.mubr.msk.bf16.mxu0 %vm5341_vm0, %v5340_v0  ;;  %4831 = vmatprep.mubr.msk.bf16.mxu1 %vm5341_vm0, %v5340_v0 }
0x1767   :  { %4822 = vmatpush3.bf16.msra.mxu0 %v4996_v21  ;;  %4830 = vmatpush3.bf16.msra.mxu1 %v4997_v22 }
0x1768   :  { %4835 = vmatprep.subr.bf16.mxu0 %v5340_v0  ;;  %4843 = vmatprep.subr.bf16.mxu1 %v5340_v0 }
0x176a   :  { %4824 = vmatmul.mubr.msk.bf16.vlgmr.msra.gmra.mxu0 %vm326_vm1, %v4993_v18  ;;  %4832 = vmatmul.mubr.msk.bf16.vlgmr.msra.gmra.mxu1 %vm326_vm1, %v3653_v15 }
0x176b   :  { %4836 = vmatpush3.bf16.msra.mxu0 %v4998_v24  ;;  %4844 = vmatpush3.bf16.msra.mxu1 %v4999_v25 }
0x176c   :  { %4837 = vmatprep.subr.bf16.mxu0 %v5340_v0  ;;  %4845 = vmatprep.subr.bf16.mxu1 %v5340_v0 }
0x176d   :  { %4839 = vmatprep.mubr.msk.bf16.mxu0 %vm5341_vm0, %v5340_v0  ;;  %4847 = vmatprep.mubr.msk.bf16.mxu1 %vm5341_vm0, %v5340_v0 }
0x176f   :  { %4838 = vmatpush3.bf16.msra.mxu0 %v5000_v51  ;;  %4846 = vmatpush3.bf16.msra.mxu1 %v5001_v26 }
0x181a   :  { %v3547_v33 = vpop.f32.mrf.mxu0  ;;  %v3587_v54 = vpop.f32.mrf.mxu1 }
0x181b   :  { %v3593_v56 = vadd.f32 %v3547_v33, %v3424_v5  ;;  %v3588_v45 = vadd.f32 %v5948_v39, %v3587_v54  ;;  %v5003_v33 = vld [vmem:[%s6307_s16] ss:$0 sm:$0xff] }
0x181c   :  { %v4793_v7 = vpop.f32.mrf.mxu0  ;;  %v4801_v57 = vpop.f32.mrf.mxu1 }
0x181d   :  { %v4029_v58 = vmul.f32 -1.442695, %v3593_v56  ;;  %v5004_v7 = vld [vmem:[%s6306_s15] ss:$0 sm:$0xff]  ;;  %s5345_s15 = smov [#allocation23]  }
0x181e   :  { %v3550_v60 = vpop.f32.mrf.mxu0  ;;  %v3590_v59 = vpop.f32.mrf.mxu1  ;;  %s3894_s16 = sshll.u32 %s5345_s15, 4  ;;  %s3895_s16 = int_to_ptr.vmem [resolvable:$true] %s3894_s16 }
0x181f   :  { %4974 = vpow2.f32 %v4029_v58  ;;  %s5265_s29 = scalar_lea.vmem %s3895_s16, 224  ;;  %p5270_p10 = scmp.lt.s32.totalorder %s3895_s16, %s3895_s16 }
0x1820   :  { %v4794_v62 = vpop.f32.mrf.mxu0  ;;  %v4802_v11 = vpop.f32.mrf.mxu1  ;;  %p5266_p9 = scmp.ne.s32.totalorder %s3895_s16, %s5265_s29  ;;  %p5271_p11 = scmp.lt.s32.totalorder %s5265_s29, %s5265_s29 }
0x1822   :  { %v3645_v16 = vpop.f32.mrf.mxu0  ;;  %v3691_v0 = vpop.f32.mrf.mxu1  ;;  %p5272_p12 = por %p5271_p11, %p5270_p10 }
0x1823   :  { %v3692_v10 = vadd.f32 %v3691_v0, %v3645_v16 }
0x1824   :  { %v4809_v27 = vpop.f32.mrf.mxu0  ;;  %v4817_v29 = vpop.f32.mrf.mxu1  ;;  %p5273_p13 = pnand %p5272_p12, %p5266_p9 }
0x1826   :  { %v3648_v1 = vpop.f32.mrf.mxu0  ;;  %v3694_v34 = vpop.f32.mrf.mxu1 }
0x1828   :  { %v4810_v36 = vpop.f32.mrf.mxu0  ;;  %v4818_v8 = vpop.f32.mrf.mxu1 }
0x182a   :  { %v3732_v4 = vpop.f32.mrf.mxu0  ;;  %v3772_v35 = vpop.f32.mrf.mxu1 }
0x182b   :  { %v3773_v37 = vadd.f32 %v3772_v35, %v3732_v4 }
0x182c   :  { %v4975_v40 = vpop.eup %4974  ;;  %v4833_v30 = vpop.f32.mrf.mxu1 }
0x182d   :  { %v4825_v9 = vpop.f32.mrf.mxu0  ;;  %v3597_v42 = vadd.f32 1.0, %v4975_v40  ;;  %v3778_v57 = vadd.f32 %v5004_v7, %v3773_v37 }
0x182e   :  { %v3775_v43 = vpop.f32.mrf.mxu1 }
0x182f   :  { %v3735_v44 = vpop.f32.mrf.mxu0  ;;  %4976 = vrcp.f32 %v3597_v42 }
0x1830   :  { %v4834_v31 = vpop.f32.mrf.mxu1 }
0x1831   :  { %v4826_v61 = vpop.f32.mrf.mxu0 }
0x183c   :  { %v4977_v48 = vpop.eup %4976 }
0x183d   :  { %v3600_v6 = vmul.f32 %v4977_v48, %v3588_v45  ;;  %v3603_v50 = vsub.f32 1.0, %v4977_v48  ;;  %v3609_v53 = vmul.f32 %v4977_v48, %v6193_v17 }
0x183f   :  { %v3601_v49 = vadd.f32 %v3600_v6, %v3505_v2 }
0x1841   :  { %4978 = vtanh.f32 %v3601_v49 }
0x184e   :  { %v4979_v32 = vpop.eup %4978 }
0x184f   :  { %3605 = vrot.lane.b32.xlu1 %v4979_v32, %s5343_s11 }
0x18c1   :  { %v3606_v13 = vpop.permute.xlu1 %3605 }
0x18c2   :  { %v3608_v63 = vmul.f32 %v3606_v13, %v3603_v50 }
0x18c4   :  { %v3610_v3 = vadd.f32 %v3609_v53, %v3608_v63 }
0x18c6   :  { %v3779_v14 = vpack.c.bf16 %v3610_v3, %v3610_v3 }
0x18c8   :  { %3781 = vrot.lane.b32.xlu1 %v3779_v14, %s5344_s13 }
0x18cc   :  { %548 = vrot.lane.b32.xlu1 %v5591_v46, %s5344_s13 }
0x18d0   :  { %940 = vrot.lane.b32.xlu1 %v5667_v12, %s5344_s13 }
0x18d4   :  { %1332 = vrot.lane.b32.xlu1 %v5743_v38, %s5344_s13  ;;  %v5002_v38 = vld [vmem:[%s6305_s14] ss:$0 sm:$0xff] }
0x18d8   :  { %1724 = vrot.lane.b32.xlu1 %v5823_v55, %s5344_s13  ;;  %v3697_v55 = vadd.f32 %v5002_v38, %v3692_v10 }
0x193a   :  { %v3782_v39 = vpop.permute.xlu1 %3781 }
0x193b   :  { %4840 = vmatmul.mubr.msk.bf16.vlgmr.msra.gmra.mxu0 %vm326_vm1, %v3782_v39  ;;  %4848 = vmatmul.mubr.msk.bf16.vlgmr.msra.gmra.mxu1 %vm326_vm1, %v3782_v39 }
0x193e   :  { %v549_v41 = vpop.permute.xlu1 %548 }
0x193f   :  { %552 = vst.msk [vmem:[#allocation23] sm:$0x3] %vm551_vm2, %v549_v41 }
0x1942   :  { %v941_v17 = vpop.permute.xlu1 %940 }
0x1943   :  { %944 = vst.msk [vmem:[#allocation23 + $0x4] sm:$0x3] %vm551_vm2, %v941_v17 }
0x1946   :  { %v1333_v46 = vpop.permute.xlu1 %1332 }
0x1947   :  { %1336 = vst.msk [vmem:[#allocation23 + $0x8] sm:$0x3] %vm551_vm2, %v1333_v46 }
0x194a   :  { %v1725_v12 = vpop.permute.xlu1 %1724 }
0x194b   :  { %1728 = vst.msk [vmem:[#allocation23 + $0xc] sm:$0x3] %vm551_vm2, %v1725_v12 }
0x19fb   :  { %v3820_v47 = vpop.f32.mrf.mxu0  ;;  %v3860_v15 = vpop.f32.mrf.mxu1 }
0x19fc   :  { %v3866_v18 = vadd.f32 %v3820_v47, %v3697_v55  ;;  %v3861_v54 = vadd.f32 %v5003_v33, %v3860_v15 }
0x19fd   :  { %v4841_v19 = vpop.f32.mrf.mxu0  ;;  %v4849_v20 = vpop.f32.mrf.mxu1 }
0x19fe   :  { %v4036_v21 = vmul.f32 -1.442695, %v3866_v18 }
0x19ff   :  { %v3823_v22 = vpop.f32.mrf.mxu0  ;;  %v3863_v24 = vpop.f32.mrf.mxu1 }
0x1a00   :  { %4980 = vpow2.f32 %v4036_v21 }
0x1a01   :  { %v4842_v25 = vpop.f32.mrf.mxu0  ;;  %v4850_v51 = vpop.f32.mrf.mxu1 }
0x1a0d   :  { %v4981_v26 = vpop.eup %4980 }
0x1a0e   :  { %v3870_v5 = vadd.f32 1.0, %v4981_v26 }
0x1a10   :  { %4982 = vrcp.f32 %v3870_v5 }
0x1a1d   :  { %v4983_v56 = vpop.eup %4982 }
0x1a1e   :  { %v3873_v58 = vmul.f32 %v4983_v56, %v3861_v54  ;;  %v3876_v62 = vsub.f32 1.0, %v4983_v56  ;;  %v3882_v16 = vmul.f32 %v4983_v56, %v3610_v3 }
0x1a20   :  { %v3874_v60 = vadd.f32 %v3873_v58, %v3778_v57 }
0x1a22   :  { %4984 = vtanh.f32 %v3874_v60 }
0x1a2f   :  { %v4985_v59 = vpop.eup %4984 }
0x1a30   :  { %3878 = vrot.lane.b32.xlu0 %v4985_v59, %s5343_s11 }
0x1a34   :  { %744 = vrot.lane.b32.xlu0 %v5629_v28, %s5344_s13 }
0x1a38   :  { %1136 = vrot.lane.b32.xlu0 %v5705_v52, %s5344_s13 }
0x1a3c   :  { %1528 = vrot.lane.b32.xlu0 %v5781_v23, %s5344_s13 }
0x1aa2   :  { %v3879_v11 = vpop.permute.xlu0 %3878 }
0x1aa3   :  { %v3881_v0 = vmul.f32 %v3879_v11, %v3876_v62 }
0x1aa5   :  { %v3883_v10 = vadd.f32 %v3882_v16, %v3881_v0 }
0x1aa6   :  { %v745_v27 = vpop.permute.xlu0 %744 }
0x1aa7   :  { %748 = vst.msk [vmem:[#allocation23 + $0x2] sm:$0x3] %vm551_vm2, %v745_v27  ;;  %3885 = vrot.lane.b32.xlu0 %v3883_v10, %s5344_s13 }
0x1aaa   :  { %v1137_v29 = vpop.permute.xlu0 %1136 }
0x1aab   :  { %1140 = vst.msk [vmem:[#allocation23 + $0x6] sm:$0x3] %vm551_vm2, %v1137_v29 }
0x1aae   :  { %v1529_v28 = vpop.permute.xlu0 %1528 }
0x1aaf   :  { %1532 = vst.msk [vmem:[#allocation23 + $0xa] sm:$0x3] %vm551_vm2, %v1529_v28 }
0x1ab0   :  { %5276 = shalt.err (!%p5273_p13)
}
0x1ab1   :  { %s5346_s7 = smov 2   ;;  %s5347_s1 = smov [#allocation24]  }
0x1ab2   :  { %3900 = dma.vmem_to_hbm [thread:$0]  %s3895_s16, 224, %s6308_s17, [#allocation4], %s5343_s11, %s5343_s11, %s5346_s7  }
0x1ab3   :  { %s3907_s13 = sshll.u32 %s5347_s1, 4  ;;  %s3908_s13 = int_to_ptr.vmem [resolvable:$true] %s3907_s13 }
0x1ab4   :  { %s5285_s30 = scalar_lea.vmem %s3908_s13, 32  ;;  %p5290_p1 = scmp.lt.s32.totalorder %s3908_s13, %s3908_s13 }
0x1ab5   :  { %p5286_p0 = scmp.ne.s32.totalorder %s3908_s13, %s5285_s30  ;;  %p5291_p2 = scmp.lt.s32.totalorder %s5285_s30, %s5285_s30 }
0x1ab7   :  { %p5292_p3 = por %p5291_p2, %p5290_p1 }
0x1ab9   :  { %p5293_p4 = pnand %p5292_p3, %p5286_p0 }
0x1b19   :  { %v3886_v52 = vpop.permute.xlu0 %3885 }
0x1b1a   :  { %3888 = vst.msk [vmem:[#allocation24] sm:$0x3] %vm551_vm2, %v3886_v52 }
0x1b1b   :  { %5296 = shalt.err (!%p5293_p4)
}
0x1b1c   :  { %3910 = dma.vmem_to_hbm [thread:$0]  %s3908_s13, 32, %s6309_s18, [#allocation25]  }
0x1b1d   :  { %5319 = dma.done.wait [#allocation4], 224  }
0x1b1e   :  { %5320 = vsyncadd [#allocation4], 4294967072 }
0x1b1f   :  { %5321 = dma.done.wait [#allocation25], 32  }
0x1b20   :  { %5322 = vsyncadd [#allocation25], 4294967264 }
0x1b21   :  { %3917 = vsyncpa [#allocation3], 1 }
0x1b22   :  { %3918 = vsyncpa [#allocation6], 1 }
0x1b23   :  { %3919 = vsyncpa [#allocation9], 1 }
0x1b24   :  { %3920 = vsyncpa [#allocation12], 1 }
0x1b25   :  { %3921 = vsyncpa [#allocation15], 1 }
0x1b26   :  { %3922 = vsyncpa [#allocation18], 1 }
0x1b27   :  { %3923 = vsyncpa [#allocation21], 1 }
0x1b28   :  { %3924 = vsyncpa [#allocation4], 1 }
0x1b29   :  { %3925 = vsyncpa [#allocation25], 1 }

</bundles_post_ra>
